<compile_context>
chip_gen: v5e
topology: v5e:2x2
jax: 0.10.0
libtpu: 0.0.40
codegen_flags: <defaults>
</compile_context>

<pallas_src>
import jax
import jax.numpy as jnp
from jax.experimental import pallas as pl
from jax.experimental.pallas import tpu as pltpu


# --------------------------- Pallas kernel (hot path) ---------------------------

def _lgp_attn_kernel(x_ref, pq_ref, pk_ref, pv_ref,
                     wq_ref, wk_ref, wv_ref,
                     seg_ref, segt_ref, wp_ref, bp_ref, o_ref):
    # x_ref/pq_ref/pk_ref/pv_ref : (TB, S, D) bf16
    # wq/wk/wv : (D, D) bf16       seg : (D, H) f32 (scale folded in)   segt : (H, D) f32
    # wp : (D, Dp) f32 (zero-padded)   bp : (1, Dp) f32   o_ref : (TB, Dp) f32
    TB, S, D = x_ref.shape
    H = seg_ref.shape[1]

    x = x_ref[...]                                    # (TB, S, D) bf16
    x2d = x.reshape(TB * S, D)                        # leading-dim fold (layout-free)

    # k/v projections as flat 2-D matmuls: M = TB*S feeds the MXU well; f32 accumulate.
    k = jnp.dot(x2d, wk_ref[...],
                preferred_element_type=jnp.float32).reshape(TB, S, D)
    v = jnp.dot(x2d, wv_ref[...],
                preferred_element_type=jnp.float32).reshape(TB, S, D)

    # Only neighbour row 0 of q and k is consumed downstream (reference takes out[:,0,:]).
    # k0 is row 0 of the already-computed k projection; only q needs an extra matmul.
    q0 = jnp.dot(x[:, 0, :], wq_ref[...],
                 preferred_element_type=jnp.float32)   # (TB, D)
    k0 = k[:, 0, :]                                    # (TB, D)

    # Positional biases fused once at full width.
    kpq = k + pq_ref[...].astype(jnp.float32)          # k + pos_q   (TB, S, D)
    vpv = v + pv_ref[...].astype(jnp.float32)          # v + pos_v   (TB, S, D)
    pk = pk_ref[...].astype(jnp.float32)               # pos_k       (TB, S, D)

    # Row-0 scores for ALL heads in one shot:
    #   dots[b, t, h] = scale * sum_{d in head h} (q0[b,d]*(k+pq)[b,t,d] + k0[b,d]*pk[b,t,d])
    # The within-head reduction is one (TB*S, D) @ (D, H) matmul with the scale folded
    # into `seg`, so no per-head lane slicing and no pass over the score tensor.
    pp = q0[:, None, :] * kpq + k0[:, None, :] * pk    # (TB, S, D) f32
    dots = jnp.dot(pp.reshape(TB * S, D), seg_ref[...],
                   preferred_element_type=jnp.float32).reshape(TB, S, H)

    # Softmax over the neighbour axis, kept in f32 (v5e VPU/EUP have no bf16 path);
    # normalisation via approximate reciprocal on the otherwise-idle EUP slot.
    m = jnp.max(dots, axis=1, keepdims=True)           # (TB, 1, H)
    e = jnp.exp(dots - m)
    attn = e * pl.reciprocal(jnp.sum(e, axis=1, keepdims=True), approx=True)

    # Expand head weights back to channels (tiny (TB*S, H) @ (H, D) matmul), then
    # contract the neighbour axis: merged-head row-0 output, no per-head accumulation.
    attn_c = jnp.dot(attn.reshape(TB * S, H), segt_ref[...],
                     preferred_element_type=jnp.float32).reshape(TB, S, D)
    out0 = jnp.sum(attn_c * vpv, axis=1)               # (TB, D)

    # Merged output projection; weight zero-padded to Dp=128 -> lane-dense full stores.
    o_ref[...] = jnp.dot(out0, wp_ref[...],
                         preferred_element_type=jnp.float32) + bp_ref[...]


def _pick_tile_n(n):
    # Largest point-tile <= 512 that divides n while keeping >= 2 grid steps
    # (v7x has 2 TensorCores per chip; a 1-step grid would idle one of them).
    for t in (512, 256, 128, 64, 32, 16, 8):
        if n % t == 0 and n // t >= 2:
            return t
    return n


def lgp_attention(x_grp, pos_q, pos_k, pos_v, w_qkv, w_proj, b_proj,
                  *, num_heads, scale, tile_n=None):
    N, S, D = x_grp.shape
    H = num_heads
    dh = D // H
    if tile_n is None:
        tile_n = _pick_tile_n(N)
    assert N % tile_n == 0
    assert tile_n % 8 == 0 or tile_n == N

    # Split fused qkv weight at trace time (avoids in-kernel lane-axis slicing).
    w_q = w_qkv[:, 0 * D:1 * D]
    w_k = w_qkv[:, 1 * D:2 * D]
    w_v = w_qkv[:, 2 * D:3 * D]

    # Head segment matrices: seg reduces channels -> heads (scale folded in),
    # seg_t broadcasts head weights back to channels.
    head_of = jnp.arange(D, dtype=jnp.int32) // dh
    onehot = jax.nn.one_hot(head_of, H, dtype=jnp.float32)       # (D, H)
    seg = onehot * jnp.float32(scale)
    seg_t = onehot.T                                             # (H, D)

    # Zero-pad the output projection so the kernel writes a lane-dense (tile_n, Dp) slab.
    Dp = max(128, ((D + 127) // 128) * 128)
    w_proj_p = jnp.zeros((D, Dp), jnp.float32).at[:, :D].set(w_proj.astype(jnp.float32))
    b_proj_p = jnp.zeros((1, Dp), jnp.float32).at[:, :D].set(
        b_proj.reshape(1, D).astype(jnp.float32))

    # bf16 inputs/weights for the MXU + halved DMA bytes; accumulation stays f32.
    bf = jnp.bfloat16
    args = (x_grp.astype(bf), pos_q.astype(bf), pos_k.astype(bf), pos_v.astype(bf),
            w_q.astype(bf), w_k.astype(bf), w_v.astype(bf),
            seg, seg_t, w_proj_p, b_proj_p)

    grp_spec = pl.BlockSpec((tile_n, S, D), lambda i: (i, 0, 0))

    def full2d(shape):
        return pl.BlockSpec(shape, lambda i: (0, 0))

    out = pl.pallas_call(
        _lgp_attn_kernel,
        out_shape=jax.ShapeDtypeStruct((N, Dp), jnp.float32),
        grid_spec=pltpu.PrefetchScalarGridSpec(
            num_scalar_prefetch=0,
            grid=(N // tile_n,),
            in_specs=[grp_spec, grp_spec, grp_spec, grp_spec,
                      full2d((D, D)), full2d((D, D)), full2d((D, D)),
                      full2d((D, H)), full2d((H, D)),
                      full2d((D, Dp)), full2d((1, Dp))],
            out_specs=pl.BlockSpec((tile_n, Dp), lambda i: (i, 0)),
        ),
        # Per-step VMEM: 4 bf16 grouped blocks (tile_n*S*D*2B, double-buffered) plus a
        # (tile_n, Dp) f32 output block — a few MiB at tile_n=512, well inside the
        # default scoped limit on v5e/v6e and v7x's smaller 64 MiB physical VMEM.
        # Weight blocks have constant index maps, so they are not re-DMA'd per step.
        compiler_params=pltpu.CompilerParams(dimension_semantics=("parallel",)),
    )(*args)
    return out[:, :D]


# --------------------------- parameters (deterministic) ---------------------------

def _linear(key, fan_in, fan_out, bias=True):
    k1, k2 = jax.random.split(key)
    bound = 1.0 / (fan_in ** 0.5)
    w = jax.random.uniform(k1, (fan_in, fan_out), jnp.float32, -bound, bound)
    b = jax.random.uniform(k2, (fan_out,), jnp.float32, -bound, bound) if bias else None
    return w, b


def init_lgp_params(key, dim, num_heads, nsample, num_ksp):
    keys = jax.random.split(key, 16)
    p = {}
    p['qkv_w'], _ = _linear(keys[0], dim, 3 * dim, bias=False)   # qkv_bias=False
    p['proj_w'], p['proj_b'] = _linear(keys[1], dim, dim)
    p['geo_adapter'] = _linear(keys[2], 9, dim)
    p['geo_adapter2'] = _linear(keys[3], 1, dim)
    p['geo_adapter3'] = _linear(keys[4], 1, dim)
    for name, ki in (('posi_q', 5), ('posi_k', 6), ('posi_v', 7)):
        k1, k2 = jax.random.split(keys[ki])
        w1, b1 = _linear(k1, nsample * 3, dim)
        w2, b2 = _linear(k2, dim, dim)
        # BatchNorm1d affine params default: gamma=1, beta=0
        p[name] = (w1, b1, jnp.ones((dim,), jnp.float32), jnp.zeros((dim,), jnp.float32), w2, b2)
    p['kn'] = jax.random.normal(keys[8], (num_ksp, 3), jnp.float32)
    d4 = dim // 4
    p['dist_enc1'] = _linear(keys[9], 1, d4)
    p['dist_enc2'] = _linear(keys[10], d4, dim)
    # TODO(synk): PropagateLayer / KeyPointAttention / FeatureFusion definitions are not
    # provided with the module; deterministic minimal stand-ins are parameterized here.
    p['prop_pe'] = _linear(keys[11], 3, dim)
    p['prop_h'] = _linear(keys[12], dim, dim)
    p['kp_score'] = _linear(keys[13], dim, 1)
    p['fusion'] = _linear(keys[14], 5 * dim, dim)
    return p


# --------------------------- glue (plain JAX) ---------------------------

def _posi_mlp(pos, prm):
    # Sequential: Linear(nsample*3, dim) -> BatchNorm1d(dim) over (b, c, n) -> ReLU -> Linear(dim, dim)
    # TODO(synk): BatchNorm uses batch statistics (training mode); eval would use running stats.
    w1, b1, gamma, beta, w2, b2 = prm
    h = pos @ w1 + b1                                  # (n, nsample, dim)
    mean = h.mean(axis=(0, 1), keepdims=True)
    var = h.var(axis=(0, 1), keepdims=True)
    h = gamma * (h - mean) / jnp.sqrt(var + 1e-5) + beta
    return jax.nn.relu(h) @ w2 + b2


def lgp_forward(params, p_xyz, x, o, *, dim, num_heads, nsample):
    n = x.shape[0]
    scale = (dim // num_heads) ** (-0.5)

    # TODO(synk): pointops.knnquery with multi-segment offsets `o`; single segment here.
    d2 = jnp.sum((p_xyz[:, None, :] - p_xyz[None, :, :]) ** 2, axis=-1)
    _, knn_idx = jax.lax.top_k(-d2, nsample)           # (n, nsample), self first

    knn_xyz = p_xyz[knn_idx]                           # (n, s, 3)
    p_r = knn_xyz - p_xyz[:, None, :]                  # (n, s, 3)
    x_knn = x[knn_idx]                                 # (n, s, dim)

    # TODO(synk): PropagateLayer definition unknown; stand-in = pos-encoded MLP + max-pool + residual.
    w_pe, b_pe = params['prop_pe']
    w_h, b_h = params['prop_h']
    pe = p_r @ w_pe + b_pe
    hh = jax.nn.relu((x_knn + pe) @ w_h + b_h)
    x = x + jnp.max(hh, axis=1)

    # TODO(synk): local_polar_representation definition unknown; 9-dim polar stand-in.
    r = jnp.linalg.norm(p_r, axis=-1, keepdims=True)                    # (n, s, 1)
    theta = jnp.arccos(jnp.clip(p_r[..., 2:3] / (r + 1e-8), -1.0, 1.0))
    phi = jnp.arctan2(p_r[..., 1:2], p_r[..., 0:1])
    center = jnp.broadcast_to(p_xyz[:, None, :], knn_xyz.shape)
    geo_rep = jnp.concatenate([center, p_r, r, theta, phi], axis=-1)    # (n, s, 9)
    geo_dis = r                                                         # (n, s, 1)
    bbox = jnp.prod(p_xyz.max(axis=0) - p_xyz.min(axis=0) + 1e-8)
    vol_ratio = jnp.full((n, 1), jnp.mean(jnp.max(r, axis=1) ** 3) / bbox, jnp.float32)

    # keypoint distance features + KeyPointAttention stand-in (attention pooling)
    dist = jnp.sqrt(jnp.sum((p_xyz[:, None, :] - params['kn'][None, :, :]) ** 2, axis=-1))
    w1, b1 = params['dist_enc1']
    w2, b2 = params['dist_enc2']
    dist_feat = jax.nn.relu(dist[..., None] @ w1 + b1) @ w2 + b2        # (n, K, dim)
    ws, bs = params['kp_score']
    kp_sc = jax.nn.softmax(dist_feat @ ws + bs, axis=1)
    dist_feat = jnp.sum(kp_sc * dist_feat, axis=1)                      # (n, dim)

    ga_w, ga_b = params['geo_adapter']
    geo_rep = geo_rep.mean(axis=1) @ ga_w + ga_b
    ga2_w, ga2_b = params['geo_adapter2']
    geo_dis = geo_dis.max(axis=1) @ ga2_w + ga2_b
    ga3_w, ga3_b = params['geo_adapter3']
    vol_ratio = vol_ratio @ ga3_w + ga3_b

    # TODO(synk): FeatureFusion definition unknown; stand-in = residual linear over concat.
    fw, fb = params['fusion']
    x = x + jnp.concatenate([x, geo_rep, geo_dis, vol_ratio, dist_feat], axis=-1) @ fw + fb

    # TODO(synk): QueryGroup(local=True) definition unknown; stand-in = grouped features and
    # pairwise relative coords within each neighborhood (gives nsample*3 channels after reshape).
    pos = knn_xyz[:, None, :, :] - knn_xyz[:, :, None, :]               # (n, s, s, 3)
    x_grp = x[knn_idx]                                                  # (n, s, dim)
    pos = pos.reshape(n, nsample, nsample * 3)

    pos_q = _posi_mlp(pos, params['posi_q'])
    pos_k = _posi_mlp(pos, params['posi_k'])
    pos_v = _posi_mlp(pos, params['posi_v'])

    out = lgp_attention(
        x_grp, pos_q, pos_k, pos_v,
        params['qkv_w'], params['proj_w'], params['proj_b'],
        num_heads=num_heads, scale=scale,
    )
    return out  # (n, dim); proj_drop p=0 => identity


# --------------------------- demo ---------------------------

if __name__ == "__main__":
    dim, num_heads, nsample, num_ksp = 32, 4, 16, 16
    N = 64

    key = jax.random.PRNGKey(0)
    kp, kx, kparam = jax.random.split(key, 3)
    p_xyz = jax.random.uniform(kp, (N, 3), jnp.float32)
    x = jax.random.normal(kx, (N, dim), jnp.float32) * 0.1
    o = jnp.array([N], jnp.int32)

    params = init_lgp_params(kparam, dim, num_heads, nsample, num_ksp)
    out = lgp_forward(params, p_xyz, x, o, dim=dim, num_heads=num_heads, nsample=nsample)
    out = jax.block_until_ready(out)
    assert out.shape == (N, dim) and out.dtype == jnp.float32
    print("KERNEL_OK")
</pallas_src>

<mosaic_0001>
module attributes {stable_mosaic.version = 11 : i64} {
  func.func @_lgp_attn_kernel(%arg0: i32, %arg1: memref<32x16x32xbf16, #tpu.memory_space<vmem>>, %arg2: memref<32x16x32xbf16, #tpu.memory_space<vmem>>, %arg3: memref<32x16x32xbf16, #tpu.memory_space<vmem>>, %arg4: memref<32x16x32xbf16, #tpu.memory_space<vmem>>, %arg5: memref<32x32xbf16, #tpu.memory_space<vmem>>, %arg6: memref<32x32xbf16, #tpu.memory_space<vmem>>, %arg7: memref<32x32xbf16, #tpu.memory_space<vmem>>, %arg8: memref<32x4xf32, #tpu.memory_space<vmem>>, %arg9: memref<4x32xf32, #tpu.memory_space<vmem>>, %arg10: memref<32x128xf32, #tpu.memory_space<vmem>>, %arg11: memref<1x128xf32, #tpu.memory_space<vmem>>, %arg12: memref<32x128xf32, #tpu.memory_space<vmem>>) attributes {dimension_semantics = [#tpu.dimension_semantics<parallel>], iteration_bounds = array<i64: 2>, scalar_prefetch = 0 : i64, scratch_operands = 0 : i64, tpu.core_type = #tpu.core_type<tc>, window_params = [{transform_indices = @transform_0, window_bounds = array<i64: 32, 16, 32>}, {transform_indices = @transform_1, window_bounds = array<i64: 32, 16, 32>}, {transform_indices = @transform_2, window_bounds = array<i64: 32, 16, 32>}, {transform_indices = @transform_3, window_bounds = array<i64: 32, 16, 32>}, {pipeline_mode = #tpu.pipeline_mode<synchronous>, transform_indices = @transform_4, window_bounds = array<i64: 32, 32>}, {pipeline_mode = #tpu.pipeline_mode<synchronous>, transform_indices = @transform_5, window_bounds = array<i64: 32, 32>}, {pipeline_mode = #tpu.pipeline_mode<synchronous>, transform_indices = @transform_6, window_bounds = array<i64: 32, 32>}, {pipeline_mode = #tpu.pipeline_mode<synchronous>, transform_indices = @transform_7, window_bounds = array<i64: 32, 4>}, {pipeline_mode = #tpu.pipeline_mode<synchronous>, transform_indices = @transform_8, window_bounds = array<i64: 4, 32>}, {pipeline_mode = #tpu.pipeline_mode<synchronous>, transform_indices = @transform_9, window_bounds = array<i64: 32, 128>}, {pipeline_mode = #tpu.pipeline_mode<synchronous>, transform_indices = @transform_10, window_bounds = array<i64: 1, 128>}, {transform_indices = @transform_11, window_bounds = array<i64: 32, 128>}]} {
    %c0 = arith.constant 0 : index
    %c0_0 = arith.constant 0 : index
    %c0_1 = arith.constant 0 : index
    %0 = vector.load %arg1[%c0, %c0_0, %c0_1] : memref<32x16x32xbf16, #tpu.memory_space<vmem>>, vector<32x16x32xbf16>
    %1 = vector.shape_cast %0 : vector<32x16x32xbf16> to vector<512x32xbf16>
    %c0_2 = arith.constant 0 : index
    %c0_3 = arith.constant 0 : index
    %2 = vector.load %arg6[%c0_2, %c0_3] : memref<32x32xbf16, #tpu.memory_space<vmem>>, vector<32x32xbf16>
    %cst = arith.constant dense<0.000000e+00> : vector<512x32xf32>
    %3 = tpu.matmul %1, %2, %cst {dimension_numbers = #tpu.dot_dimension_numbers<[1], [0], [0], [1], [0, 0, 1, 1], [], []>} : vector<512x32xbf16>, vector<32x32xbf16>, vector<512x32xf32> -> vector<512x32xf32>
    %4 = vector.shape_cast %3 : vector<512x32xf32> to vector<32x16x32xf32>
    %c0_4 = arith.constant 0 : index
    %c0_5 = arith.constant 0 : index
    %5 = vector.load %arg7[%c0_4, %c0_5] : memref<32x32xbf16, #tpu.memory_space<vmem>>, vector<32x32xbf16>
    %cst_6 = arith.constant dense<0.000000e+00> : vector<512x32xf32>
    %6 = tpu.matmul %1, %5, %cst_6 {dimension_numbers = #tpu.dot_dimension_numbers<[1], [0], [0], [1], [0, 0, 1, 1], [], []>} : vector<512x32xbf16>, vector<32x32xbf16>, vector<512x32xf32> -> vector<512x32xf32>
    %7 = vector.shape_cast %6 : vector<512x32xf32> to vector<32x16x32xf32>
    %8 = vector.extract_strided_slice %0 {offsets = [0, 0, 0], sizes = [32, 1, 32], strides = [1, 1, 1]} : vector<32x16x32xbf16> to vector<32x1x32xbf16>
    %9 = vector.shape_cast %8 : vector<32x1x32xbf16> to vector<32x32xbf16>
    %c0_7 = arith.constant 0 : index
    %c0_8 = arith.constant 0 : index
    %10 = vector.load %arg5[%c0_7, %c0_8] : memref<32x32xbf16, #tpu.memory_space<vmem>>, vector<32x32xbf16>
    %cst_9 = arith.constant dense<0.000000e+00> : vector<32x32xf32>
    %11 = tpu.matmul %9, %10, %cst_9 {dimension_numbers = #tpu.dot_dimension_numbers<[1], [0], [0], [1], [0, 0, 1, 1], [], []>} : vector<32x32xbf16>, vector<32x32xbf16>, vector<32x32xf32> -> vector<32x32xf32>
    %12 = vector.extract_strided_slice %4 {offsets = [0, 0, 0], sizes = [32, 1, 32], strides = [1, 1, 1]} : vector<32x16x32xf32> to vector<32x1x32xf32>
    %13 = vector.shape_cast %12 : vector<32x1x32xf32> to vector<32x32xf32>
    %c0_10 = arith.constant 0 : index
    %c0_11 = arith.constant 0 : index
    %c0_12 = arith.constant 0 : index
    %14 = vector.load %arg2[%c0_10, %c0_11, %c0_12] : memref<32x16x32xbf16, #tpu.memory_space<vmem>>, vector<32x16x32xbf16>
    %15 = arith.extf %14 : vector<32x16x32xbf16> to vector<32x16x32xf32>
    %16 = arith.addf %4, %15 : vector<32x16x32xf32>
    %c0_13 = arith.constant 0 : index
    %c0_14 = arith.constant 0 : index
    %c0_15 = arith.constant 0 : index
    %17 = vector.load %arg4[%c0_13, %c0_14, %c0_15] : memref<32x16x32xbf16, #tpu.memory_space<vmem>>, vector<32x16x32xbf16>
    %18 = arith.extf %17 : vector<32x16x32xbf16> to vector<32x16x32xf32>
    %19 = arith.addf %7, %18 : vector<32x16x32xf32>
    %c0_16 = arith.constant 0 : index
    %c0_17 = arith.constant 0 : index
    %c0_18 = arith.constant 0 : index
    %20 = vector.load %arg3[%c0_16, %c0_17, %c0_18] : memref<32x16x32xbf16, #tpu.memory_space<vmem>>, vector<32x16x32xbf16>
    %21 = arith.extf %20 : vector<32x16x32xbf16> to vector<32x16x32xf32>
    %22 = vector.shape_cast %11 : vector<32x32xf32> to vector<32x1x32xf32>
    %23 = vector.broadcast %22 : vector<32x1x32xf32> to vector<32x16x32xf32>
    %24 = arith.mulf %23, %16 : vector<32x16x32xf32>
    %25 = vector.shape_cast %13 : vector<32x32xf32> to vector<32x1x32xf32>
    %26 = vector.broadcast %25 : vector<32x1x32xf32> to vector<32x16x32xf32>
    %27 = arith.mulf %26, %21 : vector<32x16x32xf32>
    %28 = arith.addf %24, %27 : vector<32x16x32xf32>
    %29 = vector.shape_cast %28 : vector<32x16x32xf32> to vector<512x32xf32>
    %c0_19 = arith.constant 0 : index
    %c0_20 = arith.constant 0 : index
    %30 = vector.load %arg8[%c0_19, %c0_20] : memref<32x4xf32, #tpu.memory_space<vmem>>, vector<32x4xf32>
    %cst_21 = arith.constant dense<0.000000e+00> : vector<512x4xf32>
    %31 = tpu.matmul %29, %30, %cst_21 {dimension_numbers = #tpu.dot_dimension_numbers<[1], [0], [0], [1], [0, 0, 1, 1], [], []>} : vector<512x32xf32>, vector<32x4xf32>, vector<512x4xf32> -> vector<512x4xf32>
    %32 = vector.shape_cast %31 : vector<512x4xf32> to vector<32x16x4xf32>
    %cst_22 = arith.constant dense<0xFF800000> : vector<32x4xf32>
    %33 = vector.multi_reduction <maximumf>, %32, %cst_22 [1] : vector<32x16x4xf32> to vector<32x4xf32>
    %34 = vector.shape_cast %33 : vector<32x4xf32> to vector<32x1x4xf32>
    %35 = vector.broadcast %34 : vector<32x1x4xf32> to vector<32x16x4xf32>
    %36 = arith.subf %32, %35 : vector<32x16x4xf32>
    %37 = math.exp %36 : vector<32x16x4xf32>
    %cst_23 = arith.constant dense<0.000000e+00> : vector<32x4xf32>
    %38 = vector.multi_reduction <add>, %37, %cst_23 [1] : vector<32x16x4xf32> to vector<32x4xf32>
    %39 = vector.shape_cast %38 : vector<32x4xf32> to vector<32x1x4xf32>
    %40 = tpu.reciprocal %39 {approx = true} : vector<32x1x4xf32> -> vector<32x1x4xf32>
    %41 = vector.broadcast %40 : vector<32x1x4xf32> to vector<32x16x4xf32>
    %42 = arith.mulf %37, %41 : vector<32x16x4xf32>
    %43 = vector.shape_cast %42 : vector<32x16x4xf32> to vector<512x4xf32>
    %c0_24 = arith.constant 0 : index
    %c0_25 = arith.constant 0 : index
    %44 = vector.load %arg9[%c0_24, %c0_25] : memref<4x32xf32, #tpu.memory_space<vmem>>, vector<4x32xf32>
    %cst_26 = arith.constant dense<0.000000e+00> : vector<512x32xf32>
    %45 = tpu.matmul %43, %44, %cst_26 {dimension_numbers = #tpu.dot_dimension_numbers<[1], [0], [0], [1], [0, 0, 1, 1], [], []>} : vector<512x4xf32>, vector<4x32xf32>, vector<512x32xf32> -> vector<512x32xf32>
    %46 = vector.shape_cast %45 : vector<512x32xf32> to vector<32x16x32xf32>
    %47 = arith.mulf %46, %19 : vector<32x16x32xf32>
    %cst_27 = arith.constant dense<0.000000e+00> : vector<32x32xf32>
    %48 = vector.multi_reduction <add>, %47, %cst_27 [1] : vector<32x16x32xf32> to vector<32x32xf32>
    %c0_28 = arith.constant 0 : index
    %c0_29 = arith.constant 0 : index
    %49 = vector.load %arg10[%c0_28, %c0_29] : memref<32x128xf32, #tpu.memory_space<vmem>>, vector<32x128xf32>
    %cst_30 = arith.constant dense<0.000000e+00> : vector<32x128xf32>
    %50 = tpu.matmul %48, %49, %cst_30 {dimension_numbers = #tpu.dot_dimension_numbers<[1], [0], [0], [1], [0, 0, 1, 1], [], []>} : vector<32x32xf32>, vector<32x128xf32>, vector<32x128xf32> -> vector<32x128xf32>
    %c0_31 = arith.constant 0 : index
    %c0_32 = arith.constant 0 : index
    %51 = vector.load %arg11[%c0_31, %c0_32] : memref<1x128xf32, #tpu.memory_space<vmem>>, vector<1x128xf32>
    %52 = vector.broadcast %51 : vector<1x128xf32> to vector<32x128xf32>
    %53 = arith.addf %50, %52 : vector<32x128xf32>
    %c0_33 = arith.constant 0 : index
    %c0_34 = arith.constant 0 : index
    %54 = vector.load %arg12[%c0_33, %c0_34] : memref<32x128xf32, #tpu.memory_space<vmem>>, vector<32x128xf32>
    tpu.vector_store %arg12[%c0_33, %c0_34], %53 {strides = array<i32>} : memref<32x128xf32, #tpu.memory_space<vmem>>, vector<32x128xf32>,
    return
  }
  func.func @transform_0(%arg0: i32) -> (i32, i32, i32) {
    %c0_i32 = arith.constant 0 : i32
    %c0_i32_0 = arith.constant 0 : i32
    %c0_i32_1 = arith.constant 0 : i32
    return %arg0, %c0_i32, %c0_i32_0 : i32, i32, i32
  }
  func.func @transform_1(%arg0: i32) -> (i32, i32, i32) {
    %c0_i32 = arith.constant 0 : i32
    %c0_i32_0 = arith.constant 0 : i32
    %c0_i32_1 = arith.constant 0 : i32
    return %arg0, %c0_i32, %c0_i32_0 : i32, i32, i32
  }
  func.func @transform_2(%arg0: i32) -> (i32, i32, i32) {
    %c0_i32 = arith.constant 0 : i32
    %c0_i32_0 = arith.constant 0 : i32
    %c0_i32_1 = arith.constant 0 : i32
    return %arg0, %c0_i32, %c0_i32_0 : i32, i32, i32
  }
  func.func @transform_3(%arg0: i32) -> (i32, i32, i32) {
    %c0_i32 = arith.constant 0 : i32
    %c0_i32_0 = arith.constant 0 : i32
    %c0_i32_1 = arith.constant 0 : i32
    return %arg0, %c0_i32, %c0_i32_0 : i32, i32, i32
  }
  func.func @transform_4(%arg0: i32) -> (i32, i32) {
    %c0_i32 = arith.constant 0 : i32
    %c0_i32_0 = arith.constant 0 : i32
    %c0_i32_1 = arith.constant 0 : i32
    return %c0_i32, %c0_i32_0 : i32, i32
  }
  func.func @transform_5(%arg0: i32) -> (i32, i32) {
    %c0_i32 = arith.constant 0 : i32
    %c0_i32_0 = arith.constant 0 : i32
    %c0_i32_1 = arith.constant 0 : i32
    return %c0_i32, %c0_i32_0 : i32, i32
  }
  func.func @transform_6(%arg0: i32) -> (i32, i32) {
    %c0_i32 = arith.constant 0 : i32
    %c0_i32_0 = arith.constant 0 : i32
    %c0_i32_1 = arith.constant 0 : i32
    return %c0_i32, %c0_i32_0 : i32, i32
  }
  func.func @transform_7(%arg0: i32) -> (i32, i32) {
    %c0_i32 = arith.constant 0 : i32
    %c0_i32_0 = arith.constant 0 : i32
    %c0_i32_1 = arith.constant 0 : i32
    return %c0_i32, %c0_i32_0 : i32, i32
  }
  func.func @transform_8(%arg0: i32) -> (i32, i32) {
    %c0_i32 = arith.constant 0 : i32
    %c0_i32_0 = arith.constant 0 : i32
    %c0_i32_1 = arith.constant 0 : i32
    return %c0_i32, %c0_i32_0 : i32, i32
  }
  func.func @transform_9(%arg0: i32) -> (i32, i32) {
    %c0_i32 = arith.constant 0 : i32
    %c0_i32_0 = arith.constant 0 : i32
    %c0_i32_1 = arith.constant 0 : i32
    return %c0_i32, %c0_i32_0 : i32, i32
  }
  func.func @transform_10(%arg0: i32) -> (i32, i32) {
    %c0_i32 = arith.constant 0 : i32
    %c0_i32_0 = arith.constant 0 : i32
    %c0_i32_1 = arith.constant 0 : i32
    return %c0_i32, %c0_i32_0 : i32, i32
  }
  func.func @transform_11(%arg0: i32) -> (i32, i32) {
    %c0_i32 = arith.constant 0 : i32
    %c0_i32_0 = arith.constant 0 : i32
    return %arg0, %c0_i32 : i32, i32
  }
}

</mosaic_0001>

<bundles_post_ra>
// kernel: tpu_custom_call.1
= control target key start
LH: loop header
LB: loop body
LE: loop exit
PB: predicated region body
PF: predicated region fallthrough
CT: control target
= control target key end

     0   :  { %s7608_s0 = inlined_call_operand.vmem [shape: bf16[64,16,32], index: 0, kind: input, shape index: {}]   ;;  %s7609_s1 = inlined_call_operand.vmem [shape: bf16[64,16,32], index: 1, kind: input, shape index: {}]   ;;  %s7610_s2 = inlined_call_operand.vmem [shape: bf16[64,16,32], index: 2, kind: input, shape index: {}]   ;;  %s7611_s3 = inlined_call_operand.vmem [shape: bf16[64,16,32], index: 3, kind: input, shape index: {}]   ;;  %s7612_s4 = inlined_call_operand.vmem [shape: bf16[32,32], index: 4, kind: input, shape index: {}]   ;;  %s7613_s5 = inlined_call_operand.vmem [shape: bf16[32,32], index: 5, kind: input, shape index: {}]   ;;  %s7614_s6 = inlined_call_operand.vmem [shape: bf16[32,32], index: 6, kind: input, shape index: {}]   ;;  %s7615_s7 = inlined_call_operand.vmem [shape: f32[32,4], index: 7, kind: input, shape index: {}]   ;;  %s7616_s8 = inlined_call_operand.vmem [shape: f32[4,32], index: 8, kind: input, shape index: {}]   ;;  %s7617_s9 = inlined_call_operand.vmem [shape: f32[32,128], index: 9, kind: input, shape index: {}]   ;;  %s7618_s10 = inlined_call_operand.vmem [shape: f32[1,128], index: 10, kind: input, shape index: {}]   ;;  %s7619_s11 = inlined_call_operand.hbm [shape: f32[64,128], index: 11, kind: output, shape index: {}]  }
   0x1   :  { %7620 = sst [smem:[#allocation5_spill]] %s7608_s0 }
   0x2   :  { %7621 = sst [smem:[#allocation6_spill]] %s7609_s1 }
   0x3   :  { %16 = vsyncpa [#allocation3], 0 }
   0x4   :  { %18 = vsyncpa [#allocation3 + $0x1], 0  ;;  %s5737_s17 = smov 0   ;;  %s5739_s18 = smov 0  }
   0x5   :  { %s5741_s19 = smov 0   ;;  %s5743_s20 = smov 0  }
   0x6 LB: > { %s4410_s21 = sadd.s32 4294967295, %s5673_s20   ;;  %s4411_s22 = sadd.s32 4294967294, %s5673_s20   ;;  %s5673_s20 = sphi %s5743_s20, %s7629_s20   ;;  %s5669_s19 = sphi %s5741_s19, %s7628_s19   ;;  %s5665_s18 = sphi %s5739_s18, %s7627_s18   ;;  %s5661_s17 = sphi %s5737_s17, %s7626_s17  }
   0x7   : > { %s5760_s23 = sadd.s32 1, %s5673_s20   ;;  %s282_s24 = sadd.s32 1, %s5669_s19 }
   0x8   : > { %s279_s25 = ssub.s32 %s5673_s20, %s5760_s23  ;;  %p292_p0 = scmp.ne.s32.totalorder %s5669_s19, %s5665_s18 }
   0x9   : > { %p280_p1 = scmp.eq.s32.totalorder %s279_s25, 0  ;;  %p293_p2 = scmp.eq.s32.totalorder %s4410_s21, 1 }
   0xa   : > { %p298_p3 = scmp.ne.s32.totalorder %s5665_s18, %s5661_s17  ;;  %p299_p4 = scmp.eq.s32.totalorder %s4411_s22, 1 }
   0xb   : > { %s5770_s26 = scalar_select %p280_p1, %s5669_s19, %s282_s24  }
   0xc   : > { %p5772_p5 = por %p293_p2, %p292_p0  ;;  %p5776_p6 = por %p299_p4, %p298_p3 }
   0xd   : > { %p4414_p7 = scmp.ge.s32.totalorder %s5673_s20, 1  ;;  %p378_p8 = scmp.lt.s32.totalorder %s5673_s20, 3 }
   0xf   : > { %p379_p9 = pnand %p4414_p7, %p378_p8 }
  0x10   : > { %s5785_s12 = sshll.u32 (!%p379_p9), %s4410_s21, 5  ;;  %s7624_s0 = sld [smem:[#allocation5_spill]] (!%p379_p9) }
  0x11   : > { %382 = sbr.rel (%p379_p9) target bundleno = 1164 (0x48c), region = 64  ;;  %p438_p10 = scmp.lt.s32.totalorder (!%p379_p9), %s5785_s12, 63 }
  0x12   : > { %s7625_s1 = sld [smem:[#allocation6_spill]] (!%p379_p9)  ;;  %s4309_s15 = scalar_lea.hbm (!%p379_p9), %s7619_s11, %s5785_s12 }
  0x16   : > { %v4693_v0 = vld [vmem:[%s7613_s5 + $0x8] sm:$0xff]  ;;  %v4692_v2 = vld [vmem:[%s7613_s5] sm:$0xff]  ;;  %s439_s22 = scalar_select %p438_p10, %s5785_s12, 63  ;;  %vm707_vm0 = vcmask 261120   ;;  %vm1227_vm1 = vcmask 1041409   ;;  %vm1230_vm2 = vcmask 1042434  }
  0x17   : > { %v4697_v1 = vld [vmem:[%s7612_s4 + $0x8] sm:$0xff]  ;;  %810 = vmatpush.bf16.msra.mxu0 %v4693_v0  ;;  %5335 = vmatpush.bf16.msra.mxu1 %v4693_v0  ;;  %v4696_v3 = vld [vmem:[%s7612_s4] sm:$0xff]  ;;  %vm1233_vm3 = vcmask 1043459   ;;  %vm1236_vm4 = vcmask 1044484   ;;  %vm1239_vm5 = vcmask 1045509   ;;  %vm1242_vm6 = vcmask 1046534  }
  0x18   : > { %1315 = vmatpush.bf16.msra.mxu2 %v4697_v1  ;;  %5337 = vmatpush.bf16.msra.mxu3 %v4697_v1  ;;  %s5798_s21 = sshll.u32 %s439_s22, 3  ;;  %vm1245_vm7 = vcmask 1047559   ;;  %vm2565_vm8 = vcmask 31744   ;;  %vm3623_vm9 = vcmask 1043456   ;;  %s4312_s22 = sshll.u32 %s4309_s15, 4  ;;  %s4313_s22 = int_to_ptr.hbm [resolvable:$true] %s4312_s22 }
  0x19   : > { %s5804_s13 = scalar_lea.vmem %s7624_s0, %s5798_s21  ;;  %s5975_s16 = scalar_lea.vmem %s7625_s1, %s5798_s21 }
  0x1a   : > { %v5807_v4 = vld [vmem:[%s5804_s13] sm:$0xff]   ;;  %v5810_v5 = vld [vmem:[%s5804_s13 + $0x8] sm:$0xff]   ;;  %v5813_v6 = vld [vmem:[%s5804_s13 + $0x10] sm:$0xff]   ;;  %s5981_s25 = scalar_lea.vmem %s7610_s2, %s5798_s21  ;;  %s6452_s14 = scalar_lea.vmem %s7611_s3, %s5798_s21 }
  0x1b   : > { %811 = vmatpush.bf16.msra.mxu0 %v4692_v2  ;;  %5336 = vmatpush.bf16.msra.mxu1 %v4692_v2  ;;  %v4701_v7 = vunpack.c.l.b16 %v5807_v4  ;;  %v4705_v8 = vunpack.c.l.b16 %v5810_v5  ;;  %v4709_v9 = vunpack.c.l.b16 %v5813_v6  ;;  %v5819_v10 = vld [vmem:[%s5804_s13 + $0x18] sm:$0xff]   ;;  %v5822_v11 = vld [vmem:[%s5804_s13 + $0x20] sm:$0xff]   ;;  %v5825_v12 = vld [vmem:[%s5804_s13 + $0x28] sm:$0xff]   ;;  %s5631_s12 = scalar_lea.hbm %s7619_s11, 64 }
  0x1c   : > { %1316 = vmatpush.bf16.msra.mxu2 %v4696_v3  ;;  %5338 = vmatpush.bf16.msra.mxu3 %v4696_v3  ;;  %v4713_v13 = vunpack.c.l.b16 %v5819_v10  ;;  %v4717_v14 = vunpack.c.l.b16 %v5822_v11  ;;  %v5832_v15 = vld [vmem:[%s5804_s13 + $0x30] sm:$0xff]   ;;  %v5835_v16 = vld [vmem:[%s5804_s13 + $0x38] sm:$0xff]   ;;  %v5838_v17 = vld [vmem:[%s5804_s13 + $0x40] sm:$0xff]   ;;  %v4721_v21 = vunpack.c.l.b16 %v5825_v12 }
  0x1d   : > { %v4508_v18 = vunpack.i.l.s16 %v4701_v7  ;;  %v4509_v19 = vunpack.i.l.s16 %v4705_v8  ;;  %v4510_v20 = vunpack.i.l.s16 %v4709_v9  ;;  %v5842_v22 = vld [vmem:[%s5804_s13 + $0x48] sm:$0xff]   ;;  %v5845_v23 = vld [vmem:[%s5804_s13 + $0x50] sm:$0xff]   ;;  %v5848_v24 = vld [vmem:[%s5804_s13 + $0x58] sm:$0xff]   ;;  %v4725_v26 = vunpack.c.l.b16 %v5832_v15 }
  0x1e   : > { %4436 = vmatmul.msk.bf16.vlgmr.msra.gmra.mxu0 %vm707_vm0, %v5807_v4  ;;  %v4511_v25 = vunpack.i.l.s16 %v4713_v13  ;;  %v4729_v27 = vunpack.c.l.b16 %v5835_v16  ;;  %v4737_v28 = vunpack.c.l.b16 %v5842_v22  ;;  %v5854_v29 = vld [vmem:[%s5804_s13 + $0x60] sm:$0xff]   ;;  %v5857_v30 = vld [vmem:[%s5804_s13 + $0x68] sm:$0xff]   ;;  %v5860_v31 = vld [vmem:[%s5804_s13 + $0x70] sm:$0xff]   ;;  %v4741_v34 = vunpack.c.l.b16 %v5845_v23 }
  0x1f   : > { %v1226_v32 = vrot.slane %v4509_v19, 7  ;;  %v1229_v33 = vrot.slane %v4510_v20, 6  ;;  %v4745_v35 = vunpack.c.l.b16 %v5848_v24  ;;  %v5865_v36 = vld [vmem:[%s5804_s13 + $0x78] sm:$0xff]   ;;  %v4733_v38 = vunpack.c.l.b16 %v5838_v17 }
  0x20   : > { %v1232_v37 = vrot.slane %v4511_v25, 5  ;;  %v4749_v39 = vunpack.c.l.b16 %v5854_v29  ;;  %v4753_v40 = vunpack.c.l.b16 %v5857_v30  ;;  %v4757_v42 = vunpack.c.l.b16 %v5860_v31 }
  0x21   : > { %v1228_v41 = vsel %vm1227_vm1, %v1226_v32, %v4508_v18  ;;  %v4512_v43 = vunpack.i.l.s16 %v4717_v14  ;;  %v4513_v44 = vunpack.i.l.s16 %v4721_v21  ;;  %v4761_v46 = vunpack.c.l.b16 %v5865_v36  ;;  %v5898_v32 = vld [vmem:[%s5804_s13 + $0x88] sm:$0xff]  }
  0x22   : > { %v1231_v45 = vsel %vm1230_vm2, %v1229_v33, %v1228_v41  ;;  %v4514_v47 = vunpack.i.l.s16 %v4725_v26  ;;  %v4515_v48 = vunpack.i.l.s16 %v4729_v27  ;;  %v4517_v49 = vunpack.i.l.s16 %v4737_v28  ;;  %v5235_v33 = vld [vmem:[%s5804_s13 + $0xc8] sm:$0xff]   ;;  %v5237_v41 = vld [vmem:[%s5804_s13 + $0xd8] sm:$0xff]  }
  0x23   : > { %v4518_v50 = vunpack.i.l.s16 %v4741_v34  ;;  %v4519_v51 = vunpack.i.l.s16 %v4745_v35  ;;  %v1234_v52 = vsel %vm1233_vm3, %v1232_v37, %v1231_v45  ;;  %v4516_v53 = vunpack.i.l.s16 %v4733_v38  ;;  %v5903_v35 = vld [vmem:[%s5804_s13 + $0x90] sm:$0xff]   ;;  %v5907_v37 = vld [vmem:[%s5804_s13 + $0x80] sm:$0xff]   ;;  %v5911_v38 = vld [vmem:[%s5804_s13 + $0x98] sm:$0xff]  }
  0x24   : > { %v4520_v54 = vunpack.i.l.s16 %v4749_v39  ;;  %v4521_v55 = vunpack.i.l.s16 %v4753_v40  ;;  %v4522_v56 = vunpack.i.l.s16 %v4757_v42  ;;  %v1235_v57 = vrot.slane %v4512_v43, 4  ;;  %v5916_v39 = vld [vmem:[%s5804_s13 + $0xa0] sm:$0xff]   ;;  %v5923_v45 = vld [vmem:[%s5804_s13 + $0xa8] sm:$0xff]  }
  0x25   : > { %v1238_v58 = vrot.slane %v4513_v44, 3  ;;  %v1241_v59 = vrot.slane %v4514_v47, 2  ;;  %v4523_v60 = vunpack.i.l.s16 %v4761_v46  ;;  %v1247_v61 = vrot.slane %v4517_v49, 7  ;;  %v5238_v42 = vld [vmem:[%s5804_s13 + $0xe0] sm:$0xff]  }
  0x26   : > { %v1249_v62 = vrot.slane %v4518_v50, 6  ;;  %v1251_v63 = vrot.slane %v4519_v51, 5  ;;  %v1237_v0 = vsel %vm1236_vm4, %v1235_v57, %v1234_v52  ;;  %v1253_v1 = vrot.slane %v4520_v54, 4  ;;  %v5928_v50 = vld [vmem:[%s5804_s13 + $0xb0] sm:$0xff]  }
  0x27   : > { %v1240_v2 = vsel %vm1239_vm5, %v1238_v58, %v1237_v0  ;;  %v1244_v3 = vrot.slane %v4515_v48, 1  ;;  %v1248_v7 = vsel %vm1227_vm1, %v1247_v61, %v4516_v53  ;;  %v1255_v8 = vrot.slane %v4521_v55, 3  ;;  %v5239_v48 = vld [vmem:[%s5804_s13 + $0xe8] sm:$0xff]   ;;  %v5240_v53 = vld [vmem:[%s5804_s13 + $0xf0] sm:$0xff]  }
  0x28   : > { %v1243_v9 = vsel %vm1242_vm6, %v1241_v59, %v1240_v2  ;;  %v1250_v13 = vsel %vm1230_vm2, %v1249_v62, %v1248_v7  ;;  %v1257_v14 = vrot.slane %v4522_v56, 2  ;;  %v1259_v19 = vrot.slane %v4523_v60, 1  ;;  %v5933_v56 = vld [vmem:[%s5804_s13 + $0xb8] sm:$0xff]  }
  0x29   : > { %v1252_v18 = vsel %vm1233_vm3, %v1251_v63, %v1250_v13  ;;  %v1246_v21 = vsel %vm1245_vm7, %v1244_v3, %v1243_v9  ;;  %v4769_v34 = vunpack.c.l.b16 %v5898_v32  ;;  %v4801_v40 = vunpack.c.l.b16 %v5235_v33  ;;  %v5241_v59 = vld [vmem:[%s5804_s13 + $0xf8] sm:$0xff]  }
  0x2a   : > { %v1254_v20 = vsel %vm1236_vm4, %v1253_v1, %v1252_v18  ;;  %v4765_v43 = vunpack.c.l.b16 %v5907_v37  ;;  %v4781_v44 = vunpack.c.l.b16 %v5916_v39  ;;  %v4785_v49 = vunpack.c.l.b16 %v5923_v45  ;;  %4467 = vmatmul.msk.bf16.vlgmr.msra.gmra.mxu1 %vm707_vm0, %v5241_v59 }
  0x2b   : > { %v1256_v25 = vsel %vm1239_vm5, %v1255_v8, %v1254_v20  ;;  %v4809_v51 = vunpack.c.l.b16 %v5237_v41  ;;  %v4813_v52 = vunpack.c.l.b16 %v5238_v42  ;;  %v4525_v54 = vunpack.i.l.s16 %v4769_v34 }
  0x2c   : > { %v1258_v26 = vsel %vm1242_vm6, %v1257_v14, %v1256_v25  ;;  %v4789_v55 = vunpack.c.l.b16 %v5928_v50  ;;  %v4817_v57 = vunpack.c.l.b16 %v5239_v48  ;;  %v4821_v58 = vunpack.c.l.b16 %v5240_v53 }
  0x2d   : > { %v1260_v27 = vsel %vm1245_vm7, %v1259_v19, %v1258_v26  ;;  %v4793_v61 = vunpack.c.l.b16 %v5933_v56  ;;  %v4825_v62 = vunpack.c.l.b16 %v5241_v59  ;;  %v4528_v0 = vunpack.i.l.s16 %v4781_v44 }
  0x2e   : > { %4437 = vmatmul.msk.bf16.gmra.mxu0 %vm707_vm0, %v5810_v5  ;;  %v1289_v28 = vpack.c.b16 %v1260_v27, %v1246_v21  ;;  %v4524_v1 = vunpack.i.l.s16 %v4765_v43  ;;  %v4529_v2 = vunpack.i.l.s16 %v4785_v49  ;;  %v4530_v3 = vunpack.i.l.s16 %v4789_v55  ;;  %v2163_v49 = vld [vmem:[%s7615_s7 + $0x18] sm:$0xff] }
  0x2f   : > { %v4533_v7 = vunpack.i.l.s16 %v4801_v40  ;;  %v4535_v13 = vunpack.i.l.s16 %v4809_v51  ;;  %v4536_v14 = vunpack.i.l.s16 %v4813_v52  ;;  %v4531_v18 = vunpack.i.l.s16 %v4793_v61  ;;  %v2162_v51 = vld [vmem:[%s7615_s7 + $0x10] sm:$0xff]  ;;  %2368 = vmatpush.msrb.mxu3 %v2163_v49 }
  0x30   : > { %4548 = vmatmul.msk.bf16.vlgmr.msra.gmra.mxu2 %vm707_vm0, %v1289_v28  ;;  %v4537_v19 = vunpack.i.l.s16 %v4817_v57  ;;  %v4538_v20 = vunpack.i.l.s16 %v4821_v58  ;;  %v1261_v21 = vrot.slane %v4525_v54, 7  ;;  %v4539_v25 = vunpack.i.l.s16 %v4825_v62 }
  0x31   : > { %v1267_v28 = vrot.slane %v4528_v0, 4  ;;  %v1269_v34 = vrot.slane %v4529_v2, 3  ;;  %v1281_v40 = vrot.slane %v4536_v14, 4  ;;  %v1273_v42 = vrot.slane %v4531_v18, 1  ;;  %2369 = vmatpush.msrb.mxu3 %v2162_v51  ;;  %v2160_v0 = vld [vmem:[%s7615_s7] sm:$0xff] }
  0x32   : > { %v1262_v33 = vsel %vm1227_vm1, %v1261_v21, %v4524_v1  ;;  %v1283_v44 = vrot.slane %v4537_v19, 3  ;;  %v1285_v48 = vrot.slane %v4538_v20, 2  ;;  %v1287_v54 = vrot.slane %v4539_v25, 1 }
  0x3e   : > { %4438 = vmatmul.msk.bf16.gmra.mxu0 %vm707_vm0, %v5813_v6  ;;  %v5236_v6 = vld [vmem:[%s5804_s13 + $0xd0] sm:$0xff]  }
  0x3f   : > { %v4805_v47 = vunpack.c.l.b16 %v5236_v6  ;;  %v1271_v6 = vrot.slane %v4530_v3, 2  ;;  %v4828_v3 = vld [vmem:[%s5975_s16] sm:$0xff]  }
  0x40   : > { %v4830_v20 = vunpack.c.h.bf16 %v4828_v3 }
  0x41   : > { %v4534_v9 = vunpack.i.l.s16 %v4805_v47 }
  0x4e   : > { %4439 = vmatmul.msk.bf16.gmra.mxu0 %vm707_vm0, %v5819_v10  ;;  %v4773_v10 = vunpack.c.l.b16 %v5903_v35 }
  0x50   : > { %v4526_v60 = vunpack.i.l.s16 %v4773_v10  ;;  %v1275_v10 = vrot.slane %v4533_v7, 7  ;;  %v4829_v7 = vunpack.c.l.bf16 %v4828_v3 }
  0x52   : > { %v1263_v26 = vrot.slane %v4526_v60, 6 }
  0x5e   : > { %4440 = vmatmul.msk.bf16.gmra.mxu0 %vm707_vm0, %v5822_v11  ;;  %v5234_v11 = vld [vmem:[%s5804_s13 + $0xc0] sm:$0xff]  }
  0x5f   : > { %v4797_v46 = vunpack.c.l.b16 %v5234_v11  ;;  %v1264_v11 = vsel %vm1230_vm2, %v1263_v26, %v1262_v33 }
  0x61   : > { %v4532_v8 = vunpack.i.l.s16 %v4797_v46 }
  0x63   : > { %v1276_v43 = vsel %vm1227_vm1, %v1275_v10, %v4532_v8  ;;  %v5304_v10 = vld [vmem:[%s5981_s25 + $0x8] sm:$0xff]  }
  0x6e   : > { %4441 = vmatmul.msk.bf16.gmra.mxu0 %vm707_vm0, %v5825_v12  ;;  %v4777_v12 = vunpack.c.l.b16 %v5911_v38 }
  0x70   : > { %v4527_v63 = vunpack.i.l.s16 %v4777_v12  ;;  %v1279_v12 = vrot.slane %v4535_v13, 5 }
  0x72   : > { %v1265_v27 = vrot.slane %v4527_v63, 5  ;;  %v2161_v63 = vld [vmem:[%s7615_s7 + $0x8] sm:$0xff] }
  0x73   : > { %2370 = vmatpush.msrb.mxu3 %v2161_v63 }
  0x74   : > { %v1266_v41 = vsel %vm1233_vm3, %v1265_v27, %v1264_v11 }
  0x75   : > { %v1268_v46 = vsel %vm1236_vm4, %v1267_v28, %v1266_v41  ;;  %2371 = vmatpush.msrb.mxu3 %v2160_v0 }
  0x76   : > { %v1270_v52 = vsel %vm1239_vm5, %v1269_v34, %v1268_v46 }
  0x77   : > { %v1272_v55 = vsel %vm1242_vm6, %v1271_v6, %v1270_v52 }
  0x78   : > { %v1274_v58 = vsel %vm1245_vm7, %v1273_v42, %v1272_v55 }
  0x7e   : > { %4442 = vmatmul.msk.bf16.gmra.mxu0 %vm707_vm0, %v5832_v15  ;;  %v1277_v15 = vrot.slane %v4534_v9, 6 }
  0x80   : > { %v1278_v47 = vsel %vm1230_vm2, %v1277_v15, %v1276_v43 }
  0x81   : > { %v1280_v53 = vsel %vm1233_vm3, %v1279_v12, %v1278_v47  ;;  %v5089_v12 = vunpack.c.l.bf16 %v5304_v10 }
  0x82   : > { %v1282_v57 = vsel %vm1236_vm4, %v1281_v40, %v1280_v53  ;;  %v5243_v53 = vld [vmem:[%s5975_s16 + $0x10] sm:$0xff]  }
  0x83   : > { %v1284_v59 = vsel %vm1239_vm5, %v1283_v44, %v1282_v57  ;;  %v4837_v57 = vunpack.c.l.bf16 %v5243_v53  ;;  %v4838_v3 = vunpack.c.h.bf16 %v5243_v53 }
  0x84   : > { %v1286_v60 = vsel %vm1242_vm6, %v1285_v48, %v1284_v59 }
  0x85   : > { %v1288_v61 = vsel %vm1245_vm7, %v1287_v54, %v1286_v60 }
  0x86   : > { %v1290_v62 = vpack.c.b16 %v1288_v61, %v1274_v58  ;;  %v5305_v58 = vld [vmem:[%s5981_s25 + $0x10] sm:$0xff]  }
  0x87   : > { %v5093_v61 = vunpack.c.l.bf16 %v5305_v58 }
  0x88   : > { %4549 = vmatmul.msk.bf16.vlgmr.msra.gmra.mxu3 %vm707_vm0, %v1290_v62 }
  0x8e   : > { %4443 = vmatmul.msk.bf16.gmra.mxu0 %vm707_vm0, %v5835_v16 }
  0x9b   : > { %v813_v1 = vpop.f32.mrf.mxu0 }
  0x9c   : > { %v2000_v9 = vperm.slane %v813_v1, 0  ;;  %v1456_v14 = vadd.f32 %v4829_v7, %v813_v1 }
  0x9e   : > { %4444 = vmatmul.msk.bf16.gmra.mxu0 %vm707_vm0, %v5838_v17  ;;  %v5084_v17 = vld [vmem:[%s5981_s25] sm:$0xff]  }
  0x9f   : > { %v5085_v8 = vunpack.c.l.bf16 %v5084_v17  ;;  %v5086_v26 = vunpack.c.h.bf16 %v5084_v17 }
  0xa1   : > { %v2032_v19 = vmul.f32 %v5085_v8, %v2000_v9  ;;  %v2033_v34 = vmul.f32 %v5086_v26, %v2000_v9  ;;  %v5244_v9 = vld [vmem:[%s5975_s16 + $0x18] sm:$0xff]  }
  0xa3   : > { %v815_v2 = vpop.f32.mrf.mxu0 }
  0xa4   : > { %v1457_v27 = vadd.f32 %v4830_v20, %v815_v2  ;;  %v5306_v20 = vld [vmem:[%s5981_s25 + $0x18] sm:$0xff]  }
  0xa5   : > { %v5097_v26 = vunpack.c.l.bf16 %v5306_v20 }
  0xab   : > { %v818_v16 = vpop.f32.mrf.mxu0 }
  0xac   : > { %v2001_v41 = vperm.slane %v818_v16, 0 }
  0xae   : > { %4445 = vmatmul.msk.bf16.gmra.mxu0 %vm707_vm0, %v5842_v22  ;;  %v5242_v22 = vld [vmem:[%s5975_s16 + $0x8] sm:$0xff]   ;;  %v2034_v46 = vmul.f32 %v5089_v12, %v2001_v41 }
  0xaf   : > { %v4833_v6 = vunpack.c.l.bf16 %v5242_v22  ;;  %v4834_v47 = vunpack.c.h.bf16 %v5242_v22 }
  0xb1   : > { %v1458_v40 = vadd.f32 %v4833_v6, %v818_v16 }
  0xb3   : > { %v820_v13 = vpop.f32.mrf.mxu0  ;;  %v5987_v18 = vpop.f32.mrf.mxu2 }
  0xb4   : > { %v1872_v21 = vperm.slane %v5987_v18, 0  ;;  %v1844_v11 = vrot.slane %v5987_v18, 1  ;;  %v1459_v49 = vadd.f32 %v4834_v47, %v820_v13  ;;  %v1845_v59 = vrot.slane %v5987_v18, 2 }
  0xb6   : > { %v1936_v25 = vmul.f32 %v1872_v21, %v1456_v14  ;;  %v1937_v15 = vmul.f32 %v1872_v21, %v1457_v27  ;;  %v1873_v42 = vperm.slane %v1844_v11, 0  ;;  %v1874_v1 = vperm.slane %v1845_v59, 0 }
  0xb7   : > { %v1846_v21 = vrot.slane %v5987_v18, 3 }
  0xb8   : > { %v2096_v28 = vadd.f32 %v2032_v19, %v1936_v25  ;;  %v2097_v43 = vadd.f32 %v2033_v34, %v1937_v15  ;;  %v1938_v48 = vmul.f32 %v1873_v42, %v1458_v40  ;;  %v1939_v55 = vmul.f32 %v1873_v42, %v1459_v49  ;;  %v5245_v40 = vld [vmem:[%s5975_s16 + $0x20] sm:$0xff]  }
  0xb9   : > { %v4841_v19 = vunpack.c.l.bf16 %v5244_v9  ;;  %v1875_v22 = vperm.slane %v1846_v21, 0  ;;  %v5247_v21 = vld [vmem:[%s5975_s16 + $0x30] sm:$0xff]  }
  0xba   : > { %4550 = vmatmul.msk.f32.vlgmr.msrb.gmra.mxu3 %vm707_vm0, %v2096_v28  ;;  %v2098_v51 = vadd.f32 %v2034_v46, %v1938_v48  ;;  %v1847_v46 = vrot.slane %v5987_v18, 4 }
  0xbb   : > { %v823_v33 = vpop.f32.mrf.mxu0 }
  0xbc   : > { %v1460_v60 = vadd.f32 %v4837_v57, %v823_v33  ;;  %v2002_v62 = vperm.slane %v823_v33, 0 }
  0xbe   : > { %4446 = vmatmul.msk.bf16.gmra.mxu0 %vm707_vm0, %v5845_v23  ;;  %v5090_v23 = vunpack.c.h.bf16 %v5304_v10  ;;  %v1940_v2 = vmul.f32 %v1874_v1, %v1460_v60  ;;  %v2036_v16 = vmul.f32 %v5093_v61, %v2002_v62  ;;  %v4842_v10 = vunpack.c.h.bf16 %v5244_v9  ;;  %v5246_v60 = vld [vmem:[%s5975_s16 + $0x28] sm:$0xff]  }
  0xc0   : > { %v2035_v54 = vmul.f32 %v5090_v23, %v2001_v41  ;;  %v2100_v7 = vadd.f32 %v2036_v16, %v1940_v2 }
  0xc2   : > { %4551 = vmatmul.msk.f32.gmra.mxu3 %vm707_vm0, %v2097_v43  ;;  %v2099_v63 = vadd.f32 %v2035_v54, %v1939_v55  ;;  %v4845_v43 = vunpack.c.l.bf16 %v5245_v40  ;;  %v4846_v55 = vunpack.c.h.bf16 %v5245_v40  ;;  %v4854_v40 = vunpack.c.h.bf16 %v5247_v21 }
  0xc3   : > { %v825_v44 = vpop.f32.mrf.mxu0 }
  0xc4   : > { %v1461_v17 = vadd.f32 %v4838_v3, %v825_v44  ;;  %v5307_v44 = vld [vmem:[%s5981_s25 + $0x20] sm:$0xff]  }
  0xc5   : > { %v5101_v48 = vunpack.c.l.bf16 %v5307_v44 }
  0xc6   : > { %v1941_v14 = vmul.f32 %v1874_v1, %v1461_v17  ;;  %v1848_v1 = vrot.slane %v5987_v18, 5 }
  0xca   : > { %4552 = vmatmul.msk.f32.gmra.mxu3 %vm707_vm0, %v2098_v51 }
  0xcb   : > { %v828_v52 = vpop.f32.mrf.mxu0 }
  0xcc   : > { %v1462_v25 = vadd.f32 %v4841_v19, %v828_v52  ;;  %v2003_v27 = vperm.slane %v828_v52, 0  ;;  %v1876_v52 = vperm.slane %v1847_v46, 0 }
  0xce   : > { %4447 = vmatmul.msk.bf16.gmra.mxu0 %vm707_vm0, %v5848_v24  ;;  %v5094_v24 = vunpack.c.h.bf16 %v5305_v58  ;;  %v1942_v34 = vmul.f32 %v1875_v22, %v1462_v25  ;;  %v2038_v6 = vmul.f32 %v5097_v26, %v2003_v27 }
  0xd0   : > { %v2037_v13 = vmul.f32 %v5094_v24, %v2002_v62  ;;  %v2102_v15 = vadd.f32 %v2038_v6, %v1942_v34 }
  0xd2   : > { %4553 = vmatmul.msk.f32.gmra.mxu3 %vm707_vm0, %v2099_v63  ;;  %v2101_v28 = vadd.f32 %v2037_v13, %v1941_v14  ;;  %v4849_v63 = vunpack.c.l.bf16 %v5246_v60  ;;  %v4850_v13 = vunpack.c.h.bf16 %v5246_v60 }
  0xd3   : > { %v830_v0 = vpop.f32.mrf.mxu0 }
  0xd4   : > { %v1463_v11 = vadd.f32 %v4842_v10, %v830_v0  ;;  %v5308_v0 = vld [vmem:[%s5981_s25 + $0x28] sm:$0xff]  }
  0xd5   : > { %v5105_v16 = vunpack.c.l.bf16 %v5308_v0 }
  0xd6   : > { %v1943_v42 = vmul.f32 %v1875_v22, %v1463_v11 }
  0xda   : > { %4554 = vmatmul.msk.f32.gmra.mxu3 %vm707_vm0, %v2100_v7  ;;  %v1877_v7 = vperm.slane %v1848_v1, 0 }
  0xdb   : > { %v833_v8 = vpop.f32.mrf.mxu0 }
  0xdc   : > { %v1464_v47 = vadd.f32 %v4845_v43, %v833_v8  ;;  %v2004_v23 = vperm.slane %v833_v8, 0 }
  0xde   : > { %4448 = vmatmul.msk.bf16.gmra.mxu0 %vm707_vm0, %v5854_v29  ;;  %v5098_v29 = vunpack.c.h.bf16 %v5306_v20  ;;  %v1944_v53 = vmul.f32 %v1876_v52, %v1464_v47  ;;  %v2040_v54 = vmul.f32 %v5101_v48, %v2004_v23 }
  0xe0   : > { %v2039_v41 = vmul.f32 %v5098_v29, %v2003_v27  ;;  %v2104_v58 = vadd.f32 %v2040_v54, %v1944_v53  ;;  %v4853_v27 = vunpack.c.l.bf16 %v5247_v21 }
  0xe2   : > { %4555 = vmatmul.msk.f32.gmra.mxu3 %vm707_vm0, %v2101_v28  ;;  %v2103_v49 = vadd.f32 %v2039_v41, %v1943_v42  ;;  %v5309_v28 = vld [vmem:[%s5981_s25 + $0x30] sm:$0xff]  }
  0xe3   : > { %v835_v33 = vpop.f32.mrf.mxu0  ;;  %v5109_v34 = vunpack.c.l.bf16 %v5309_v28 }
  0xe4   : > { %v1465_v57 = vadd.f32 %v4846_v55, %v835_v33  ;;  %v1849_v33 = vrot.slane %v5987_v18, 6 }
  0xe6   : > { %v1945_v62 = vmul.f32 %v1876_v52, %v1465_v57  ;;  %v1878_v11 = vperm.slane %v1849_v33, 0 }
  0xea   : > { %4556 = vmatmul.msk.f32.gmra.mxu3 %vm707_vm0, %v2102_v15 }
  0xeb   : > { %v838_v12 = vpop.f32.mrf.mxu0 }
  0xec   : > { %v1466_v2 = vadd.f32 %v4849_v63, %v838_v12  ;;  %v2005_v3 = vperm.slane %v838_v12, 0  ;;  %v5249_v63 = vld [vmem:[%s5975_s16 + $0x40] sm:$0xff]  }
  0xee   : > { %4449 = vmatmul.msk.bf16.gmra.mxu0 %vm707_vm0, %v5857_v30  ;;  %v5102_v30 = vunpack.c.h.bf16 %v5307_v44  ;;  %v1946_v8 = vmul.f32 %v1877_v7, %v1466_v2  ;;  %v2042_v9 = vmul.f32 %v5105_v16, %v2005_v3  ;;  %v5248_v44 = vld [vmem:[%s5975_s16 + $0x38] sm:$0xff]   ;;  %v4861_v2 = vunpack.c.l.bf16 %v5249_v63  ;;  %v5311_v16 = vld [vmem:[%s5981_s25 + $0x40] sm:$0xff]  }
  0xef   : > { %v4857_v48 = vunpack.c.l.bf16 %v5248_v44 }
  0xf0   : > { %v2041_v61 = vmul.f32 %v5102_v30, %v2004_v23  ;;  %v2106_v19 = vadd.f32 %v2042_v9, %v1946_v8  ;;  %v5310_v23 = vld [vmem:[%s5981_s25 + $0x38] sm:$0xff]  }
  0xf1   : > { %v5113_v52 = vunpack.c.l.bf16 %v5310_v23 }
  0xf2   : > { %4557 = vmatmul.msk.f32.gmra.mxu3 %vm707_vm0, %v2103_v49  ;;  %v2105_v24 = vadd.f32 %v2041_v61, %v1945_v62  ;;  %v1850_v49 = vrot.slane %v5987_v18, 7 }
  0xf3   : > { %v840_v51 = vpop.f32.mrf.mxu0 }
  0xf4   : > { %v1467_v14 = vadd.f32 %v4850_v13, %v840_v51  ;;  %v1879_v30 = vperm.slane %v1850_v49, 0 }
  0xf6   : > { %v1947_v26 = vmul.f32 %v1877_v7, %v1467_v14 }
  0xfa   : > { %4558 = vmatmul.msk.f32.gmra.mxu3 %vm707_vm0, %v2104_v58 }
  0xfb   : > { %v843_v59 = vpop.f32.mrf.mxu0 }
  0xfc   : > { %v1468_v22 = vadd.f32 %v4853_v27, %v843_v59  ;;  %v2006_v6 = vperm.slane %v843_v59, 0  ;;  %v4858_v59 = vunpack.c.h.bf16 %v5248_v44  ;;  %v5250_v27 = vld [vmem:[%s5975_s16 + $0x48] sm:$0xff]  }
  0xfe   : > { %4450 = vmatmul.msk.bf16.gmra.mxu0 %vm707_vm0, %v5860_v31  ;;  %v5106_v31 = vunpack.c.h.bf16 %v5308_v0  ;;  %v1948_v15 = vmul.f32 %v1878_v11, %v1468_v22  ;;  %v2044_v12 = vmul.f32 %v5109_v34, %v2006_v6  ;;  %v4865_v22 = vunpack.c.l.bf16 %v5250_v27  ;;  %v5312_v34 = vld [vmem:[%s5981_s25 + $0x48] sm:$0xff]  }
 0x100   : > { %v2043_v25 = vmul.f32 %v5106_v31, %v2005_v3  ;;  %v2108_v42 = vadd.f32 %v2044_v12, %v1948_v15  ;;  %v6046_v3 = vpop.f32.mrf.mxu2 }
 0x101   : > { %v1880_v13 = vperm.slane %v6046_v3, 0 }
 0x102   : > { %4559 = vmatmul.msk.f32.gmra.mxu3 %vm707_vm0, %v2105_v24  ;;  %v2107_v10 = vadd.f32 %v2043_v25, %v1947_v26 }
 0x103   : > { %v845_v17 = vpop.f32.mrf.mxu0 }
 0x104   : > { %v1469_v41 = vadd.f32 %v4854_v40, %v845_v17  ;;  %v5117_v17 = vunpack.c.l.bf16 %v5311_v16 }
 0x106   : > { %v1949_v47 = vmul.f32 %v1878_v11, %v1469_v41  ;;  %v5121_v11 = vunpack.c.l.bf16 %v5312_v34 }
 0x10a   : > { %4560 = vmatmul.msk.f32.gmra.mxu3 %vm707_vm0, %v2106_v19 }
 0x10b   : > { %v848_v20 = vpop.f32.mrf.mxu0  ;;  %v6041_v18 = vpop.f32.mrf.mxu3 }
 0x10c   : > { %v1470_v51 = vadd.f32 %v4857_v48, %v848_v20  ;;  %v2007_v53 = vperm.slane %v848_v20, 0  ;;  %v5118_v20 = vunpack.c.h.bf16 %v5311_v16  ;;  %v5122_v48 = vunpack.c.h.bf16 %v5312_v34 }
 0x10e   : > { %4451 = vmatmul.msk.bf16.gmra.mxu0 %vm707_vm0, %v5865_v36  ;;  %v5110_v36 = vunpack.c.h.bf16 %v5309_v28  ;;  %v1950_v57 = vmul.f32 %v1879_v30, %v1470_v51  ;;  %v2046_v58 = vmul.f32 %v5113_v52, %v2007_v53  ;;  %v5251_v52 = vld [vmem:[%s5975_s16 + $0x50] sm:$0xff]  }
 0x110   : > { %v2045_v46 = vmul.f32 %v5110_v36, %v2006_v6  ;;  %v2110_v61 = vadd.f32 %v2046_v58, %v1950_v57  ;;  %v4869_v57 = vunpack.c.l.bf16 %v5251_v52  ;;  %v5313_v58 = vld [vmem:[%s5981_s25 + $0x50] sm:$0xff]  }
 0x112   : > { %4561 = vmatmul.msk.f32.gmra.mxu3 %vm707_vm0, %v2107_v10  ;;  %v2109_v54 = vadd.f32 %v2045_v46, %v1949_v47  ;;  %v1851_v10 = vrot.slane %v6046_v3, 1 }
 0x113   : > { %v850_v29 = vpop.f32.mrf.mxu0  ;;  %v6050_v19 = vpop.f32.mrf.mxu3 }
 0x114   : > { %v1471_v60 = vadd.f32 %v4858_v59, %v850_v29  ;;  %v1881_v36 = vperm.slane %v1851_v10, 0 }
 0x116   : > { %v1951_v1 = vmul.f32 %v1879_v30, %v1471_v60  ;;  %v1852_v60 = vrot.slane %v6046_v3, 2 }
 0x11a   : > { %4562 = vmatmul.msk.f32.gmra.mxu3 %vm707_vm0, %v2108_v42 }
 0x11b   : > { %v853_v43 = vpop.f32.mrf.mxu0 }
 0x11c   : > { %v1472_v24 = vadd.f32 %v4861_v2, %v853_v43  ;;  %v2008_v7 = vperm.slane %v853_v43, 0 }
 0x11e   : > { %4452 = vmatmul.msk.bf16.gmra.mxu0 %vm707_vm0, %v5907_v37  ;;  %v5114_v37 = vunpack.c.h.bf16 %v5310_v23  ;;  %v1952_v31 = vmul.f32 %v1880_v13, %v1472_v24  ;;  %v2048_v14 = vmul.f32 %v5117_v17, %v2008_v7  ;;  %v2049_v28 = vmul.f32 %v5118_v20, %v2008_v7  ;;  %v4694_v17 = vld [vmem:[%s7614_s6] sm:$0xff] }
 0x11f   : > { %v1882_v24 = vperm.slane %v1852_v60, 0 }
 0x120   : > { %v2047_v0 = vmul.f32 %v5114_v37, %v2007_v53  ;;  %v2112_v25 = vadd.f32 %v2048_v14, %v1952_v31 }
 0x122   : > { %4563 = vmatmul.msk.f32.gmra.mxu3 %vm707_vm0, %v2109_v54  ;;  %v2111_v8 = vadd.f32 %v2047_v0, %v1951_v1  ;;  %v5125_v0 = vunpack.c.l.bf16 %v5313_v58 }
 0x123   : > { %v855_v55 = vpop.f32.mrf.mxu0 }
 0x12a   : > { %4564 = vmatmul.msk.f32.gmra.mxu3 %vm707_vm0, %v2110_v61  ;;  %v4695_v61 = vld [vmem:[%s7614_s6 + $0x8] sm:$0xff] }
 0x12b   : > { %v858_v62 = vpop.f32.mrf.mxu0  ;;  %995 = vmatpush.bf16.msrb.mxu1 %v4695_v61 }
 0x12c   : > { %v1474_v29 = vadd.f32 %v4865_v22, %v858_v62  ;;  %v2009_v15 = vperm.slane %v858_v62, 0 }
 0x12e   : > { %4453 = vmatmul.msk.bf16.gmra.mxu0 %vm707_vm0, %v5898_v32  ;;  %v4862_v32 = vunpack.c.h.bf16 %v5249_v63  ;;  %v1954_v41 = vmul.f32 %v1881_v36, %v1474_v29  ;;  %v2050_v42 = vmul.f32 %v5121_v11, %v2009_v15  ;;  %v3430_v29 = vld [vmem:[%s7616_s8] sm:$0xf] }
 0x12f   : > { %996 = vmatpush.bf16.msrb.mxu1 %v4694_v17  ;;  %4614 = vmatpush.msk.msrb.mxu2 %vm3623_vm9, %v3430_v29 }
 0x130   : > { %v1473_v21 = vadd.f32 %v4862_v32, %v855_v55  ;;  %v2114_v49 = vadd.f32 %v2050_v42, %v1954_v41  ;;  %v2051_v55 = vmul.f32 %v5122_v48, %v2009_v15  ;;  %v1853_v42 = vrot.slane %v6046_v3, 3 }
 0x132   : > { %4565 = vmatmul.msk.f32.gmra.mxu3 %vm707_vm0, %v2111_v8  ;;  %v1953_v33 = vmul.f32 %v1880_v13, %v1473_v21  ;;  %v4870_v13 = vunpack.c.h.bf16 %v5251_v52  ;;  %4476 = vmatmul.msk.bf16.vlgmr.msrb.gmra.mxu1 %vm707_vm0, %v5807_v4 }
 0x133   : > { %v860_v9 = vpop.f32.mrf.mxu0 }
 0x134   : > { %v2113_v12 = vadd.f32 %v2049_v28, %v1953_v33  ;;  %v5126_v28 = vunpack.c.h.bf16 %v5313_v58 }
 0x13a   : > { %4566 = vmatmul.msk.f32.gmra.mxu3 %vm707_vm0, %v2112_v25 }
 0x13b   : > { %v6052_v26 = vpop.f32.mrf.mxu0 }
 0x13c   : > { %v1476_v63 = vadd.f32 %v4869_v57, %v6052_v26  ;;  %v2010_v1 = vperm.slane %v6052_v26, 0 }
 0x13d   : > { %v2373_v6 = vpop.f32.mrf.mxu3 }
 0x13e   : > { %4454 = vmatmul.msk.bf16.gmra.mxu0 %vm707_vm0, %v5903_v35  ;;  %v4866_v35 = vunpack.c.h.bf16 %v5250_v27  ;;  %v2566_v44 = vsel %vm2565_vm8, %v2373_v6, -inf  ;;  %v1956_v8 = vmul.f32 %v1882_v24, %v1476_v63  ;;  %v2053_v4 = vmul.f32 %v5126_v28, %v2010_v1 }
 0x13f   : > { %v1854_v28 = vrot.slane %v6046_v3, 4 }
 0x140   : > { %v1475_v23 = vadd.f32 %v4866_v35, %v860_v9  ;;  %v2052_v9 = vmul.f32 %v5125_v0, %v2010_v1 }
 0x142   : > { %4567 = vmatmul.msk.f32.gmra.mxu3 %vm707_vm0, %v2113_v12  ;;  %v1955_v30 = vmul.f32 %v1881_v36, %v1475_v23  ;;  %v2116_v22 = vadd.f32 %v2052_v9, %v1956_v8  ;;  %4477 = vmatmul.msk.bf16.gmra.mxu1 %vm707_vm0, %v5810_v5 }
 0x143   : > { %v865_v40 = vpop.f32.mrf.mxu0 }
 0x144   : > { %v1477_v33 = vadd.f32 %v4870_v13, %v865_v40  ;;  %v5314_v40 = vld [vmem:[%s5981_s25 + $0x58] sm:$0xff]   ;;  %v5253_v13 = vld [vmem:[%s5975_s16 + $0x60] sm:$0xff]  }
 0x145   : > { %v2376_v43 = vpop.f32.mrf.mxu3  ;;  %v5130_v0 = vunpack.c.h.bf16 %v5314_v40 }
 0x146   : > { %v2567_v46 = vsel %vm2565_vm8, %v2376_v43, -inf  ;;  %v1957_v15 = vmul.f32 %v1882_v24, %v1477_v33 }
 0x147   : > { %v2568_v47 = vmax.f32 %v2566_v44, %v2567_v46 }
 0x148   : > { %v2117_v23 = vadd.f32 %v2053_v4, %v1957_v15 }
 0x149   : > { %v2569_v53 = vrot.slane %v2568_v47, 4 }
 0x14a   : > { %4568 = vmatmul.msk.f32.gmra.mxu3 %vm707_vm0, %v2114_v49 }
 0x14b   : > { %v6063_v51 = vpop.f32.mrf.mxu0  ;;  %v2570_v54 = vmax.f32 %v2568_v47, %v2569_v53 }
 0x14c   : > { %v2011_v48 = vperm.slane %v6063_v51, 0 }
 0x14d   : > { %v2571_v59 = vrot.slane %v2570_v54, 2  ;;  %v6070_v37 = vpop.f32.mrf.mxu3 }
 0x14e   : > { %4455 = vmatmul.msk.bf16.gmra.mxu0 %vm707_vm0, %v5911_v38  ;;  %v2115_v38 = vadd.f32 %v2051_v55, %v1955_v30  ;;  %v2575_v20 = vsel %vm2565_vm8, %v6070_v37, -inf  ;;  %v1883_v55 = vperm.slane %v1853_v42, 0 }
 0x14f   : > { %v2572_v62 = vmax.f32 %v2570_v54, %v2571_v59 }
 0x151   : > { %v2573_v16 = vrot.slane %v2572_v62, 1 }
 0x152   : > { %4569 = vmatmul.msk.f32.gmra.mxu3 %vm707_vm0, %v2115_v38 }
 0x153   : > { %v6078_v2 = vpop.f32.mrf.mxu0  ;;  %v2574_v7 = vmax.f32 %v2572_v62, %v2573_v16 }
 0x155   : > { %v2854_v31 = vsub.f32 %v2373_v6, %v2574_v7  ;;  %v2855_v14 = vsub.f32 %v2376_v43, %v2574_v7  ;;  %v2382_v32 = vpop.f32.mrf.mxu3  ;;  %v5252_v6 = vld [vmem:[%s5975_s16 + $0x58] sm:$0xff]   ;;  %v5129_v43 = vunpack.c.l.bf16 %v5314_v40 }
 0x156   : > { %v2576_v21 = vsel %vm2565_vm8, %v2382_v32, -inf  ;;  %v4873_v12 = vunpack.c.l.bf16 %v5252_v6  ;;  %v4874_v57 = vunpack.c.h.bf16 %v5252_v6 }
 0x157   : > { %v2918_v25 = vmul.f32 1.442695, %v2854_v31  ;;  %v2920_v26 = vmul.f32 1.442695, %v2855_v14  ;;  %v2577_v27 = vmax.f32 %v2575_v20, %v2576_v21  ;;  %v2054_v60 = vmul.f32 %v5129_v43, %v2011_v48 }
 0x158   : > { %v1479_v17 = vadd.f32 %v4874_v57, %v6078_v2  ;;  %v4877_v2 = vunpack.c.l.bf16 %v5253_v13  ;;  %v1884_v43 = vperm.slane %v1854_v28, 0 }
 0x159   : > { %5381 = vpow2.f32 %v2918_v25  ;;  %v2578_v10 = vrot.slane %v2577_v27, 4  ;;  %v5315_v25 = vld [vmem:[%s5981_s25 + $0x60] sm:$0xff]  }
 0x15a   : > { %5383 = vpow2.f32 %v2920_v26  ;;  %4570 = vmatmul.msk.f32.gmra.mxu3 %vm707_vm0, %v2116_v22  ;;  %v1959_v20 = vmul.f32 %v1883_v55, %v1479_v17 }
 0x15b   : > { %v6089_v34 = vpop.f32.mrf.mxu0  ;;  %v2579_v11 = vmax.f32 %v2577_v27, %v2578_v10  ;;  %v5133_v10 = vunpack.c.l.bf16 %v5315_v25 }
 0x15c   : > { %v2012_v15 = vperm.slane %v6089_v34, 0 }
 0x15d   : > { %v2580_v36 = vrot.slane %v2579_v11, 2  ;;  %v6099_v41 = vpop.f32.mrf.mxu3 }
 0x15e   : > { %4456 = vmatmul.msk.bf16.gmra.mxu0 %vm707_vm0, %v5916_v39  ;;  %v1478_v39 = vadd.f32 %v4873_v12, %v6063_v51  ;;  %v2584_v1 = vsel %vm2565_vm8, %v6099_v41, -inf }
 0x15f   : > { %v6102_v35 = vpop.eup %5381  ;;  %v2581_v44 = vmax.f32 %v2579_v11, %v2580_v36 }
 0x160   : > { %v6104_v46 = vpop.eup %5383  ;;  %v3046_v47 = vsel %vm2565_vm8, %v6102_v35, 0.0  ;;  %v1958_v59 = vmul.f32 %v1883_v55, %v1478_v39 }
 0x161   : > { %v3047_v52 = vsel %vm2565_vm8, %v6104_v46, 0.0  ;;  %v2582_v53 = vrot.slane %v2581_v44, 1 }
 0x162   : > { %v3048_v54 = vadd.f32 %v3047_v52, %v3046_v47  ;;  %4571 = vmatmul.msk.f32.gmra.mxu3 %vm707_vm0, %v2117_v23  ;;  %v2118_v8 = vadd.f32 %v2054_v60, %v1958_v59  ;;  %v2056_v23 = vmul.f32 %v5133_v10, %v2012_v15  ;;  %v5134_v52 = vunpack.c.h.bf16 %v5315_v25 }
 0x163   : > { %v6110_v49 = vpop.f32.mrf.mxu0  ;;  %v2583_v30 = vmax.f32 %v2581_v44, %v2582_v53  ;;  %v4878_v44 = vunpack.c.h.bf16 %v5253_v13 }
 0x164   : > { %v3049_v58 = vrot.slane %v3048_v54, 4 }
 0x165   : > { %v2856_v61 = vsub.f32 %v6070_v37, %v2583_v30  ;;  %v2857_v51 = vsub.f32 %v2382_v32, %v2583_v30  ;;  %v2388_v62 = vpop.f32.mrf.mxu3  ;;  %v2055_v32 = vmul.f32 %v5130_v0, %v2011_v48  ;;  %v1481_v57 = vadd.f32 %v4878_v44, %v6110_v49  ;;  %v5254_v49 = vld [vmem:[%s5975_s16 + $0x68] sm:$0xff]  }
 0x166   : > { %v3050_v63 = vadd.f32 %v3049_v58, %v3048_v54  ;;  %v2585_v38 = vsel %vm2565_vm8, %v2388_v62, -inf }
 0x167   : > { %v2922_v16 = vmul.f32 1.442695, %v2856_v61  ;;  %v2924_v24 = vmul.f32 1.442695, %v2857_v51  ;;  %v2586_v7 = vmax.f32 %v2584_v1, %v2585_v38  ;;  %v2119_v6 = vadd.f32 %v2055_v32, %v1959_v20 }
 0x168   : > { %v3051_v37 = vrot.slane %v3050_v63, 2  ;;  %v1961_v17 = vmul.f32 %v1884_v43, %v1481_v57  ;;  %v5574_v57 = vld [vmem:[%s5804_s13 + $0x18] sm:$0xff]  }
 0x169   : > { %5385 = vpow2.f32 %v2922_v16  ;;  %v2587_v31 = vrot.slane %v2586_v7, 4 }
 0x16a   : > { %v3052_v14 = vadd.f32 %v3051_v37, %v3050_v63  ;;  %5387 = vpow2.f32 %v2924_v24  ;;  %4572 = vmatmul.msk.f32.gmra.mxu3 %vm707_vm0, %v2118_v8  ;;  %v2057_v24 = vmul.f32 %v5134_v52, %v2012_v15  ;;  %v5316_v37 = vld [vmem:[%s5981_s25 + $0x68] sm:$0xff]  }
 0x16b   : > { %v6122_v9 = vpop.f32.mrf.mxu0  ;;  %v2588_v21 = vmax.f32 %v2586_v7, %v2587_v31  ;;  %v4881_v7 = vunpack.c.l.bf16 %v5254_v49 }
 0x16c   : > { %v3053_v5 = vrot.slane %v3052_v14, 1 }
 0x16d   : > { %v2589_v26 = vrot.slane %v2588_v21, 2  ;;  %v6129_v27 = vpop.f32.mrf.mxu3  ;;  %v1482_v28 = vadd.f32 %v4881_v7, %v6122_v9 }
 0x16e   : > { %4457 = vmatmul.msk.bf16.gmra.mxu0 %vm707_vm0, %v5923_v45  ;;  %v3054_v33 = vadd.f32 %v3053_v5, %v3052_v14  ;;  %v1480_v45 = vadd.f32 %v4877_v2, %v6089_v34  ;;  %v2593_v58 = vsel %vm2565_vm8, %v6129_v27, -inf  ;;  %v1855_v14 = vrot.slane %v6046_v3, 5 }
 0x16f   : > { %v6132_v22 = vpop.eup %5385  ;;  %v2590_v29 = vmax.f32 %v2588_v21, %v2589_v26  ;;  %v2121_v21 = vadd.f32 %v2057_v24, %v1961_v17  ;;  %v5137_v2 = vunpack.c.l.bf16 %v5316_v37 }
 0x170   : > { %v6134_v11 = vpop.eup %5387  ;;  %v3055_v4 = vsel %vm2565_vm8, %v6132_v22, 0.0  ;;  %5389 = vrcp.f32 %v3054_v33  ;;  %v1960_v48 = vmul.f32 %v1884_v43, %v1480_v45  ;;  %v2013_v33 = vperm.slane %v6122_v9, 0 }
 0x171   : > { %v3056_v40 = vsel %vm2565_vm8, %v6134_v11, 0.0  ;;  %v2591_v36 = vrot.slane %v2590_v29, 1  ;;  %v4882_v45 = vunpack.c.h.bf16 %v5254_v49  ;;  %v5138_v9 = vunpack.c.h.bf16 %v5316_v37 }
 0x172   : > { %v3057_v42 = vadd.f32 %v3056_v40, %v3055_v4  ;;  %4573 = vmatmul.msk.f32.gmra.mxu3 %vm707_vm0, %v2119_v6 }
 0x173   : > { %v6140_v12 = vpop.f32.mrf.mxu0  ;;  %v2592_v47 = vmax.f32 %v2590_v29, %v2591_v36 }
 0x174   : > { %v3058_v39 = vrot.slane %v3057_v42, 4 }
 0x175   : > { %v2858_v34 = vsub.f32 %v6099_v41, %v2592_v47  ;;  %v2859_v53 = vsub.f32 %v2388_v62, %v2592_v47  ;;  %v6146_v54 = vpop.f32.mrf.mxu3  ;;  %v5573_v41 = vld [vmem:[%s5804_s13 + $0x10] sm:$0xff]   ;;  %v2120_v62 = vadd.f32 %v2056_v23, %v1960_v48  ;;  %v1483_v23 = vadd.f32 %v4882_v45, %v6140_v12 }
 0x176   : > { %v5390_v55 = vpop.eup %5389  ;;  %v3059_v30 = vadd.f32 %v3058_v39, %v3057_v42  ;;  %v2594_v59 = vsel %vm2565_vm8, %v6146_v54, -inf  ;;  %4478 = vmatmul.msk.bf16.gmra.mxu1 %vm707_vm0, %v5573_v41  ;;  %v2058_v42 = vmul.f32 %v5137_v2, %v2013_v33  ;;  %v5255_v12 = vld [vmem:[%s5975_s16 + $0x70] sm:$0xff]  }
 0x177   : > { %v2926_v60 = vmul.f32 1.442695, %v2858_v34  ;;  %v2928_v61 = vmul.f32 1.442695, %v2859_v53  ;;  %v2595_v51 = vmax.f32 %v2593_v58, %v2594_v59  ;;  %v3366_v63 = vmul.f32 %v5390_v55, %v6102_v35 }
 0x178   : > { %v3060_v1 = vrot.slane %v3059_v30, 2  ;;  %v3367_v5 = vmul.f32 %v5390_v55, %v6104_v46  ;;  %v1885_v46 = vperm.slane %v1855_v14, 0  ;;  %v4885_v41 = vunpack.c.l.bf16 %v5255_v12 }
 0x179   : > { %5391 = vpow2.f32 %v2926_v60  ;;  %v2596_v38 = vrot.slane %v2595_v51, 4  ;;  %4615 = vmatmul.msk.f32.vlgmr.msrb.gmra.mxu2 %vm2565_vm8, %v3366_v63 }
 0x17a   : > { %5393 = vpow2.f32 %v2928_v61  ;;  %4574 = vmatmul.msk.f32.gmra.mxu3 %vm707_vm0, %v2120_v62  ;;  %v3061_v16 = vadd.f32 %v3060_v1, %v3059_v30  ;;  %v1962_v36 = vmul.f32 %v1885_v46, %v1482_v28  ;;  %v1963_v63 = vmul.f32 %v1885_v46, %v1483_v23  ;;  %v5317_v62 = vld [vmem:[%s5981_s25 + $0x70] sm:$0xff]  }
 0x17b   : > { %v6156_v0 = vpop.f32.mrf.mxu0  ;;  %v2597_v35 = vmax.f32 %v2595_v51, %v2596_v38  ;;  %v2059_v51 = vmul.f32 %v5138_v9, %v2013_v33  ;;  %v5141_v7 = vunpack.c.l.bf16 %v5317_v62 }
 0x17c   : > { %v3062_v8 = vrot.slane %v3061_v16, 1  ;;  %v1484_v14 = vadd.f32 %v4885_v41, %v6156_v0 }
 0x17d   : > { %v2598_v13 = vrot.slane %v2597_v35, 2  ;;  %v6164_v31 = vpop.f32.mrf.mxu3 }
 0x17e   : > { %4458 = vmatmul.msk.bf16.gmra.mxu0 %vm707_vm0, %v5928_v50  ;;  %v3063_v32 = vadd.f32 %v3062_v8, %v3061_v16  ;;  %v2602_v52 = vsel %vm2565_vm8, %v6164_v31, -inf  ;;  %v1856_v16 = vrot.slane %v6046_v3, 6 }
 0x17f   : > { %v6167_v20 = vpop.eup %5391  ;;  %v2599_v25 = vmax.f32 %v2597_v35, %v2598_v13  ;;  %v2123_v35 = vadd.f32 %v2059_v51, %v1963_v63 }
 0x180   : > { %v6170_v26 = vpop.eup %5393  ;;  %v3064_v50 = vsel %vm2565_vm8, %v6167_v20, 0.0  ;;  %5395 = vrcp.f32 %v3063_v32  ;;  %v2014_v32 = vperm.slane %v6156_v0, 0  ;;  %v5142_v0 = vunpack.c.h.bf16 %v5317_v62 }
 0x181   : > { %v3065_v10 = vsel %vm2565_vm8, %v6170_v26, 0.0  ;;  %v2600_v29 = vrot.slane %v2599_v25, 1  ;;  %4616 = vmatmul.msk.f32.gmra.mxu2 %vm2565_vm8, %v3367_v5 }
 0x182   : > { %v3066_v4 = vadd.f32 %v3065_v10, %v3064_v50  ;;  %4575 = vmatmul.msk.f32.gmra.mxu3 %vm707_vm0, %v2121_v21  ;;  %v4886_v50 = vunpack.c.h.bf16 %v5255_v12 }
 0x183   : > { %v6176_v6 = vpop.f32.mrf.mxu0  ;;  %v2601_v15 = vmax.f32 %v2599_v25, %v2600_v29  ;;  %v2060_v29 = vmul.f32 %v5141_v7, %v2014_v32 }
 0x184   : > { %v3067_v40 = vrot.slane %v3066_v4, 4 }
 0x185   : > { %v2860_v43 = vsub.f32 %v6129_v27, %v2601_v15  ;;  %v2861_v44 = vsub.f32 %v6146_v54, %v2601_v15  ;;  %v6184_v47 = vpop.f32.mrf.mxu3  ;;  %v2122_v54 = vadd.f32 %v2058_v42, %v1962_v36  ;;  %v1485_v36 = vadd.f32 %v4886_v50, %v6176_v6 }
 0x186   : > { %v5396_v39 = vpop.eup %5395  ;;  %v3068_v48 = vadd.f32 %v3067_v40, %v3066_v4  ;;  %v2603_v34 = vsel %vm2565_vm8, %v6184_v47, -inf  ;;  %4479 = vmatmul.msk.bf16.gmra.mxu1 %vm707_vm0, %v5574_v57 }
 0x187   : > { %v2930_v53 = vmul.f32 1.442695, %v2860_v43  ;;  %v2932_v55 = vmul.f32 1.442695, %v2861_v44  ;;  %v2604_v30 = vmax.f32 %v2602_v52, %v2603_v34  ;;  %v3368_v27 = vmul.f32 %v5396_v39, %v6132_v22  ;;  %v5256_v52 = vld [vmem:[%s5975_s16 + $0x78] sm:$0xff]  }
 0x188   : > { %v3069_v59 = vrot.slane %v3068_v48, 2  ;;  %v3369_v8 = vmul.f32 %v5396_v39, %v6134_v11  ;;  %v1886_v11 = vperm.slane %v1856_v16, 0  ;;  %v4889_v57 = vunpack.c.l.bf16 %v5256_v52 }
 0x189   : > { %5397 = vpow2.f32 %v2930_v53  ;;  %v2605_v60 = vrot.slane %v2604_v30, 4  ;;  %4617 = vmatmul.msk.f32.gmra.mxu2 %vm2565_vm8, %v3368_v27  ;;  %v5576_v27 = vld [vmem:[%s5804_s13 + $0xc0] sm:$0xff]  }
 0x18a   : > { %5399 = vpow2.f32 %v2932_v55  ;;  %4576 = vmatmul.msk.f32.gmra.mxu3 %vm707_vm0, %v2122_v54  ;;  %v3070_v61 = vadd.f32 %v3069_v59, %v3068_v48  ;;  %v1964_v10 = vmul.f32 %v1886_v11, %v1484_v14  ;;  %v2061_v55 = vmul.f32 %v5142_v0, %v2014_v32  ;;  %v5318_v54 = vld [vmem:[%s5981_s25 + $0x78] sm:$0xff]  }
 0x18b   : > { %v6194_v58 = vpop.f32.mrf.mxu0  ;;  %v2606_v22 = vmax.f32 %v2604_v30, %v2605_v60  ;;  %v5145_v41 = vunpack.c.l.bf16 %v5318_v54 }
 0x18c   : > { %v3071_v1 = vrot.slane %v3070_v61, 1  ;;  %v2124_v48 = vadd.f32 %v2060_v29, %v1964_v10 }
 0x18d   : > { %v2607_v49 = vrot.slane %v2606_v22, 2  ;;  %v6202_v38 = vpop.f32.mrf.mxu3 }
 0x18e   : > { %4459 = vmatmul.msk.bf16.gmra.mxu0 %vm707_vm0, %v5933_v56  ;;  %v3072_v24 = vadd.f32 %v3071_v1, %v3070_v61  ;;  %v2611_v42 = vsel %vm2565_vm8, %v6202_v38, -inf  ;;  %v1857_v61 = vrot.slane %v6046_v3, 7 }
 0x18f   : > { %v6205_v17 = vpop.eup %5397  ;;  %v2608_v37 = vmax.f32 %v2606_v22, %v2607_v49 }
 0x190   : > { %v6208_v13 = vpop.eup %5399  ;;  %v3073_v56 = vsel %vm2565_vm8, %v6205_v17, 0.0  ;;  %5401 = vrcp.f32 %v3072_v24  ;;  %v1486_v24 = vadd.f32 %v4889_v57, %v6194_v58 }
 0x191   : > { %v3074_v2 = vsel %vm2565_vm8, %v6208_v13, 0.0  ;;  %v2609_v25 = vrot.slane %v2608_v37, 1  ;;  %4618 = vmatmul.msk.f32.gmra.mxu2 %vm2565_vm8, %v3369_v8 }
 0x192   : > { %v3075_v5 = vadd.f32 %v3074_v2, %v3073_v56  ;;  %4577 = vmatmul.msk.f32.gmra.mxu3 %vm707_vm0, %v2123_v35  ;;  %v2015_v35 = vperm.slane %v6194_v58, 0  ;;  %v4890_v56 = vunpack.c.h.bf16 %v5256_v52  ;;  %v5146_v58 = vunpack.c.h.bf16 %v5318_v54 }
 0x193   : > { %v6214_v21 = vpop.f32.mrf.mxu0  ;;  %v2610_v28 = vmax.f32 %v2608_v37, %v2609_v25 }
 0x194   : > { %v3076_v33 = vrot.slane %v3075_v5, 4  ;;  %v2062_v25 = vmul.f32 %v5145_v41, %v2015_v35  ;;  %v1487_v10 = vadd.f32 %v4890_v56, %v6214_v21 }
 0x195   : > { %v2862_v4 = vsub.f32 %v6164_v31, %v2610_v28  ;;  %v2863_v46 = vsub.f32 %v6184_v47, %v2610_v28  ;;  %v6222_v45 = vpop.f32.mrf.mxu3  ;;  %v5575_v47 = vld [vmem:[%s5804_s13 + $0x20] sm:$0xff]  }
 0x196   : > { %v5402_v15 = vpop.eup %5401  ;;  %v3077_v40 = vadd.f32 %v3076_v33, %v3075_v5  ;;  %v2612_v9 = vsel %vm2565_vm8, %v6222_v45, -inf  ;;  %4480 = vmatmul.msk.bf16.gmra.mxu1 %vm707_vm0, %v5575_v47 }
 0x197   : > { %v2934_v43 = vmul.f32 1.442695, %v2862_v4  ;;  %v2936_v44 = vmul.f32 1.442695, %v2863_v46  ;;  %v2613_v39 = vmax.f32 %v2611_v42, %v2612_v9  ;;  %v3370_v31 = vmul.f32 %v5402_v15, %v6167_v20  ;;  %v5257_v42 = vld [vmem:[%s5975_s16 + $0x80] sm:$0xff]  }
 0x198   : > { %v3078_v6 = vrot.slane %v3077_v40, 2  ;;  %v1965_v20 = vmul.f32 %v1886_v11, %v1485_v36  ;;  %v3371_v1 = vmul.f32 %v5402_v15, %v6170_v26  ;;  %v1887_v26 = vperm.slane %v1857_v61, 0 }
 0x199   : > { %5403 = vpow2.f32 %v2934_v43  ;;  %v2614_v34 = vrot.slane %v2613_v39, 4  ;;  %4619 = vmatmul.msk.f32.gmra.mxu2 %vm2565_vm8, %v3370_v31  ;;  %v5578_v31 = vld [vmem:[%s5804_s13 + $0xc8] sm:$0xff]   ;;  %v4893_v47 = vunpack.c.l.bf16 %v5257_v42 }
 0x19a   : > { %5405 = vpow2.f32 %v2936_v44  ;;  %4578 = vmatmul.msk.f32.gmra.mxu3 %vm707_vm0, %v2124_v48  ;;  %v3079_v53 = vadd.f32 %v3078_v6, %v3077_v40  ;;  %v2125_v22 = vadd.f32 %v2061_v55, %v1965_v20  ;;  %v1966_v2 = vmul.f32 %v1887_v26, %v1486_v24  ;;  %v5319_v48 = vld [vmem:[%s5981_s25 + $0x80] sm:$0xff]  }
 0x19b   : > { %v6232_v23 = vpop.f32.mrf.mxu0  ;;  %v2615_v30 = vmax.f32 %v2613_v39, %v2614_v34  ;;  %v2063_v44 = vmul.f32 %v5146_v58, %v2015_v35 }
 0x19c   : > { %v3080_v59 = vrot.slane %v3079_v53, 1  ;;  %v2126_v40 = vadd.f32 %v2062_v25, %v1966_v2  ;;  %v2016_v61 = vperm.slane %v6232_v23, 0 }
 0x19d   : > { %v2616_v12 = vrot.slane %v2615_v30, 2  ;;  %v6240_v60 = vpop.f32.mrf.mxu3 }
 0x19e   : > { %4460 = vmatmul.msk.bf16.gmra.mxu0 %vm707_vm0, %v5576_v27  ;;  %v3081_v51 = vadd.f32 %v3080_v59, %v3079_v53  ;;  %v2620_v29 = vsel %vm2565_vm8, %v6240_v60, -inf }
 0x19f   : > { %v6243_v63 = vpop.eup %5403  ;;  %v2617_v62 = vmax.f32 %v2615_v30, %v2616_v12  ;;  %v5149_v30 = vunpack.c.l.bf16 %v5319_v48  ;;  %v1488_v12 = vadd.f32 %v4893_v47, %v6232_v23 }
 0x1a0   : > { %v6246_v49 = vpop.eup %5405  ;;  %v3082_v16 = vsel %vm2565_vm8, %v6243_v63, 0.0  ;;  %5407 = vrcp.f32 %v3081_v51 }
 0x1a1   : > { %v3083_v3 = vsel %vm2565_vm8, %v6246_v49, 0.0  ;;  %v2618_v37 = vrot.slane %v2617_v62, 1  ;;  %4620 = vmatmul.msk.f32.gmra.mxu2 %vm2565_vm8, %v3371_v1  ;;  %v4894_v1 = vunpack.c.h.bf16 %v5257_v42  ;;  %v2064_v23 = vmul.f32 %v5149_v30, %v2016_v61 }
 0x1a2   : > { %v3084_v8 = vadd.f32 %v3083_v3, %v3082_v16  ;;  %4579 = vmatmul.msk.f32.gmra.mxu3 %vm707_vm0, %v2125_v22  ;;  %v5150_v3 = vunpack.c.h.bf16 %v5319_v48 }
 0x1a3   : > { %v6252_v7 = vpop.f32.mrf.mxu0  ;;  %v2619_v14 = vmax.f32 %v2617_v62, %v2618_v37 }
 0x1a4   : > { %v3085_v32 = vrot.slane %v3084_v8, 4 }
 0x1a5   : > { %v2864_v5 = vsub.f32 %v6202_v38, %v2619_v14  ;;  %v2865_v11 = vsub.f32 %v6222_v45, %v2619_v14  ;;  %v6260_v50 = vpop.f32.mrf.mxu3  ;;  %v5577_v45 = vld [vmem:[%s5804_s13 + $0x28] sm:$0xff]  }
 0x1a6   : > { %v5408_v28 = vpop.eup %5407  ;;  %v3086_v33 = vadd.f32 %v3085_v32, %v3084_v8  ;;  %v2621_v0 = vsel %vm2565_vm8, %v6260_v50, -inf  ;;  %4481 = vmatmul.msk.bf16.gmra.mxu1 %vm707_vm0, %v5577_v45  ;;  %v1489_v32 = vadd.f32 %v4894_v1, %v6252_v7  ;;  %v5320_v45 = vld [vmem:[%s5981_s25 + $0x88] sm:$0xff]  }
 0x1a7   : > { %v2938_v4 = vmul.f32 1.442695, %v2864_v5  ;;  %v2940_v46 = vmul.f32 1.442695, %v2865_v11  ;;  %v2622_v15 = vmax.f32 %v2620_v29, %v2621_v0  ;;  %v3372_v38 = vmul.f32 %v5408_v28, %v6205_v17 }
 0x1a8   : > { %v3087_v21 = vrot.slane %v3086_v33, 2  ;;  %v1967_v17 = vmul.f32 %v1887_v26, %v1487_v10  ;;  %v3373_v57 = vmul.f32 %v5408_v28, %v6208_v13  ;;  %v1888_v13 = vperm.slane %v6041_v18, 0  ;;  %v5258_v10 = vld [vmem:[%s5975_s16 + $0x88] sm:$0xff]  }
 0x1a9   : > { %5409 = vpow2.f32 %v2938_v4  ;;  %v2623_v9 = vrot.slane %v2622_v15, 4  ;;  %4621 = vmatmul.msk.f32.gmra.mxu2 %vm2565_vm8, %v3372_v38  ;;  %v2065_v4 = vmul.f32 %v5150_v3, %v2016_v61  ;;  %v4897_v38 = vunpack.c.l.bf16 %v5258_v10 }
 0x1aa   : > { %5411 = vpow2.f32 %v2940_v46  ;;  %4580 = vmatmul.msk.f32.gmra.mxu3 %vm707_vm0, %v2126_v40  ;;  %v3088_v43 = vadd.f32 %v3087_v21, %v3086_v33  ;;  %v2127_v20 = vadd.f32 %v2063_v44, %v1967_v17  ;;  %v1968_v35 = vmul.f32 %v1888_v13, %v1488_v12 }
 0x1ab   : > { %v6270_v36 = vpop.f32.mrf.mxu0  ;;  %v2624_v39 = vmax.f32 %v2622_v15, %v2623_v9  ;;  %v5580_v15 = vld [vmem:[%s5804_s13 + $0xd0] sm:$0xff]   ;;  %v1858_v9 = vrot.slane %v6041_v18, 1  ;;  %v4898_v12 = vunpack.c.h.bf16 %v5258_v10 }
 0x1ac   : > { %v3089_v6 = vrot.slane %v3088_v43, 1  ;;  %v2128_v28 = vadd.f32 %v2064_v23, %v1968_v35  ;;  %v5321_v10 = vld [vmem:[%s5981_s25 + $0x90] sm:$0xff]  }
 0x1ad   : > { %v2625_v52 = vrot.slane %v2624_v39, 2  ;;  %v6278_v34 = vpop.f32.mrf.mxu3 }
 0x1ae   : > { %4461 = vmatmul.msk.bf16.gmra.mxu0 %vm707_vm0, %v5578_v31  ;;  %v3090_v53 = vadd.f32 %v3089_v6, %v3088_v43  ;;  %v2629_v2 = vsel %vm2565_vm8, %v6278_v34, -inf }
 0x1af   : > { %v6280_v55 = vpop.eup %5409  ;;  %v2626_v27 = vmax.f32 %v2624_v39, %v2625_v52  ;;  %v5153_v39 = vunpack.c.l.bf16 %v5320_v45  ;;  %v1490_v52 = vadd.f32 %v4897_v38, %v6270_v36 }
 0x1b0   : > { %v6283_v54 = vpop.eup %5411  ;;  %v3091_v59 = vsel %vm2565_vm8, %v6280_v55, 0.0  ;;  %5413 = vrcp.f32 %v3090_v53  ;;  %v2017_v53 = vperm.slane %v6270_v36, 0 }
 0x1b1   : > { %v3092_v22 = vsel %vm2565_vm8, %v6283_v54, 0.0  ;;  %v2627_v41 = vrot.slane %v2626_v27, 1  ;;  %4622 = vmatmul.msk.f32.gmra.mxu2 %vm2565_vm8, %v3373_v57  ;;  %v6333_v57 = vpop.f32.mrf.mxu1 }
 0x1b2   : > { %v3093_v62 = vadd.f32 %v3092_v22, %v3091_v59  ;;  %4581 = vmatmul.msk.f32.gmra.mxu3 %vm707_vm0, %v2127_v20  ;;  %v1889_v59 = vperm.slane %v1858_v9, 0 }
 0x1b3   : > { %v6289_v51 = vpop.f32.mrf.mxu0  ;;  %v2628_v16 = vmax.f32 %v2626_v27, %v2627_v41  ;;  %v2066_v41 = vmul.f32 %v5153_v39, %v2017_v53 }
 0x1b4   : > { %v3094_v24 = vrot.slane %v3093_v62, 4  ;;  %v1970_v36 = vmul.f32 %v1889_v59, %v1490_v52  ;;  %v1491_v23 = vadd.f32 %v4898_v12, %v6289_v51  ;;  %v5158_v12 = vunpack.c.h.bf16 %v5321_v10 }
 0x1b5   : > { %v2866_v37 = vsub.f32 %v6240_v60, %v2628_v16  ;;  %v2867_v8 = vsub.f32 %v6260_v50, %v2628_v16  ;;  %v6298_v26 = vpop.f32.mrf.mxu3  ;;  %v5579_v50 = vld [vmem:[%s5804_s13 + $0x30] sm:$0xff]  }
 0x1b6   : > { %v5414_v56 = vpop.eup %5413  ;;  %v3095_v14 = vadd.f32 %v3094_v24, %v3093_v62  ;;  %v2630_v25 = vsel %vm2565_vm8, %v6298_v26, -inf  ;;  %4482 = vmatmul.msk.bf16.gmra.mxu1 %vm707_vm0, %v5579_v50  ;;  %v5154_v62 = vunpack.c.h.bf16 %v5320_v45  ;;  %v5582_v50 = vld [vmem:[%s5804_s13 + $0xd8] sm:$0xff]   ;;  %v5157_v45 = vunpack.c.l.bf16 %v5321_v10 }
 0x1b7   : > { %v2942_v58 = vmul.f32 1.442695, %v2866_v37  ;;  %v2944_v5 = vmul.f32 1.442695, %v2867_v8  ;;  %v2631_v11 = vmax.f32 %v2629_v2, %v2630_v25  ;;  %v3374_v60 = vmul.f32 %v5414_v56, %v6243_v63  ;;  %v5259_v25 = vld [vmem:[%s5975_s16 + $0x90] sm:$0xff]  }
 0x1b8   : > { %v3096_v7 = vrot.slane %v3095_v14, 2  ;;  %v1969_v63 = vmul.f32 %v1888_v13, %v1489_v32  ;;  %v3375_v47 = vmul.f32 %v5414_v56, %v6246_v49  ;;  %v2130_v32 = vadd.f32 %v2066_v41, %v1970_v36 }
 0x1b9   : > { %5415 = vpow2.f32 %v2942_v58  ;;  %v2632_v29 = vrot.slane %v2631_v11, 4  ;;  %4623 = vmatmul.msk.f32.gmra.mxu2 %vm2565_vm8, %v3374_v60 }
 0x1ba   : > { %5417 = vpow2.f32 %v2944_v5  ;;  %4582 = vmatmul.msk.f32.gmra.mxu3 %vm707_vm0, %v2128_v28  ;;  %v3097_v0 = vadd.f32 %v3096_v7, %v3095_v14  ;;  %v2129_v17 = vadd.f32 %v2065_v4, %v1969_v63  ;;  %v6355_v28 = vpop.f32.mrf.mxu1  ;;  %v4901_v7 = vunpack.c.l.bf16 %v5259_v25 }
 0x1bb   : > { %v6308_v33 = vpop.f32.mrf.mxu0  ;;  %v2633_v46 = vmax.f32 %v2631_v11, %v2632_v29  ;;  %v2067_v11 = vmul.f32 %v5154_v62, %v2017_v53  ;;  %v1859_v63 = vrot.slane %v6041_v18, 2  ;;  %v4902_v53 = vunpack.c.h.bf16 %v5259_v25 }
 0x1bc   : > { %v3098_v40 = vrot.slane %v3097_v0, 1  ;;  %v2018_v39 = vperm.slane %v6308_v33, 0 }
 0x1bd   : > { %v2634_v21 = vrot.slane %v2633_v46, 2  ;;  %v6316_v42 = vpop.f32.mrf.mxu3 }
 0x1be   : > { %4462 = vmatmul.msk.bf16.gmra.mxu0 %vm707_vm0, %v5580_v15  ;;  %v3099_v43 = vadd.f32 %v3098_v40, %v3097_v0  ;;  %v2638_v3 = vsel %vm2565_vm8, %v6316_v42, -inf }
 0x1bf   : > { %v6319_v44 = vpop.eup %5415  ;;  %v2635_v31 = vmax.f32 %v2633_v46, %v2634_v21 }
 0x1c0   : > { %v6322_v48 = vpop.eup %5417  ;;  %v3100_v6 = vsel %vm2565_vm8, %v6319_v44, 0.0  ;;  %5419 = vrcp.f32 %v3099_v43 }
 0x1c1   : > { %v3101_v30 = vsel %vm2565_vm8, %v6322_v48, 0.0  ;;  %v2636_v27 = vrot.slane %v2635_v31, 1  ;;  %4624 = vmatmul.msk.f32.gmra.mxu2 %vm2565_vm8, %v3375_v47 }
 0x1c2   : > { %v3102_v49 = vadd.f32 %v3101_v30, %v3100_v6  ;;  %4583 = vmatmul.msk.f32.gmra.mxu3 %vm707_vm0, %v2129_v17  ;;  %v1492_v17 = vadd.f32 %v4901_v7, %v6308_v33  ;;  %v6376_v33 = vpop.f32.mrf.mxu1 }
 0x1c3   : > { %v6328_v20 = vpop.f32.mrf.mxu0  ;;  %v2637_v61 = vmax.f32 %v2635_v31, %v2636_v27 }
 0x1c4   : > { %v3103_v22 = vrot.slane %v3102_v49, 4 }
 0x1c5   : > { %v2868_v13 = vsub.f32 %v6278_v34, %v2637_v61  ;;  %v2869_v1 = vsub.f32 %v6298_v26, %v2637_v61  ;;  %v6338_v16 = vpop.f32.mrf.mxu3  ;;  %v5581_v26 = vld [vmem:[%s5804_s13 + $0x38] sm:$0xff]  }
 0x1c6   : > { %v5420_v24 = vpop.eup %5419  ;;  %v3104_v35 = vadd.f32 %v3103_v22, %v3102_v49  ;;  %v2639_v37 = vsel %vm2565_vm8, %v6338_v16, -inf  ;;  %4483 = vmatmul.msk.bf16.gmra.mxu1 %vm707_vm0, %v5581_v26  ;;  %v2069_v26 = vmul.f32 %v5158_v12, %v2018_v39 }
 0x1c7   : > { %v2946_v8 = vmul.f32 1.442695, %v2868_v13  ;;  %v2948_v56 = vmul.f32 1.442695, %v2869_v1  ;;  %v2640_v14 = vmax.f32 %v2638_v3, %v2639_v37  ;;  %v3376_v34 = vmul.f32 %v5420_v24, %v6280_v55 }
 0x1c8   : > { %v3105_v51 = vrot.slane %v3104_v35, 2  ;;  %v1971_v55 = vmul.f32 %v1889_v59, %v1491_v23  ;;  %v3377_v21 = vmul.f32 %v5420_v24, %v6283_v54  ;;  %v1890_v54 = vperm.slane %v1859_v63, 0 }
 0x1c9   : > { %5421 = vpow2.f32 %v2946_v8  ;;  %v2641_v58 = vrot.slane %v2640_v14, 4  ;;  %4625 = vmatmul.msk.f32.gmra.mxu2 %vm2565_vm8, %v3376_v34  ;;  %v2068_v59 = vmul.f32 %v5157_v45, %v2018_v39  ;;  %v1493_v13 = vadd.f32 %v4902_v53, %v6328_v20 }
 0x1ca   : > { %5423 = vpow2.f32 %v2948_v56  ;;  %4584 = vmatmul.msk.f32.gmra.mxu3 %vm707_vm0, %v2130_v32  ;;  %v3106_v5 = vadd.f32 %v3105_v51, %v3104_v35  ;;  %v2131_v38 = vadd.f32 %v2067_v11, %v1971_v55  ;;  %v1972_v49 = vmul.f32 %v1890_v54, %v1492_v17  ;;  %v5260_v56 = vld [vmem:[%s5975_s16 + $0x98] sm:$0xff]   ;;  %v5584_v51 = vld [vmem:[%s5804_s13 + $0xe0] sm:$0xff]   ;;  %v6398_v11 = vpop.f32.mrf.mxu1 }
 0x1cb   : > { %v6348_v2 = vpop.f32.mrf.mxu0  ;;  %v2642_v60 = vmax.f32 %v2640_v14, %v2641_v58  ;;  %v4905_v25 = vunpack.c.l.bf16 %v5260_v56  ;;  %v5322_v58 = vld [vmem:[%s5981_s25 + $0x98] sm:$0xff]  }
 0x1cc   : > { %v3107_v29 = vrot.slane %v3106_v5, 1  ;;  %v2132_v37 = vadd.f32 %v2068_v59, %v1972_v49 }
 0x1cd   : > { %v2643_v0 = vrot.slane %v2642_v60, 2  ;;  %v6358_v4 = vpop.f32.mrf.mxu3 }
 0x1ce   : > { %4463 = vmatmul.msk.bf16.gmra.mxu0 %vm707_vm0, %v5582_v50  ;;  %v3108_v46 = vadd.f32 %v3107_v29, %v3106_v5  ;;  %v2647_v1 = vsel %vm2565_vm8, %v6358_v4, -inf  ;;  %v1860_v50 = vrot.slane %v6041_v18, 3 }
 0x1cf   : > { %v6361_v15 = vpop.eup %5421  ;;  %v2644_v40 = vmax.f32 %v2642_v60, %v2643_v0  ;;  %v5161_v0 = vunpack.c.l.bf16 %v5322_v58 }
 0x1d0   : > { %v6364_v9 = vpop.eup %5423  ;;  %v3109_v43 = vsel %vm2565_vm8, %v6361_v15, 0.0  ;;  %5425 = vrcp.f32 %v3108_v46 }
 0x1d1   : > { %v3110_v47 = vsel %vm2565_vm8, %v6364_v9, 0.0  ;;  %v2645_v6 = vrot.slane %v2644_v40, 1  ;;  %4626 = vmatmul.msk.f32.gmra.mxu2 %vm2565_vm8, %v3377_v21  ;;  %v2019_v21 = vperm.slane %v6348_v2, 0 }
 0x1d2   : > { %v3111_v52 = vadd.f32 %v3110_v47, %v3109_v43  ;;  %4585 = vmatmul.msk.f32.gmra.mxu3 %vm707_vm0, %v2131_v38 }
 0x1d3   : > { %v6370_v31 = vpop.f32.mrf.mxu0  ;;  %v2646_v30 = vmax.f32 %v2644_v40, %v2645_v6  ;;  %v1494_v40 = vadd.f32 %v4905_v25, %v6348_v2  ;;  %v4906_v6 = vunpack.c.h.bf16 %v5260_v56  ;;  %v6418_v2 = vpop.f32.mrf.mxu1 }
 0x1d4   : > { %v3112_v27 = vrot.slane %v3111_v52, 4 }
 0x1d5   : > { %v2870_v61 = vsub.f32 %v6316_v42, %v2646_v30  ;;  %v2871_v22 = vsub.f32 %v6338_v16, %v2646_v30  ;;  %v6380_v36 = vpop.f32.mrf.mxu3  ;;  %v5583_v16 = vld [vmem:[%s5804_s13 + $0x40] sm:$0xff]   ;;  %v2070_v30 = vmul.f32 %v5161_v0, %v2019_v21 }
 0x1d6   : > { %v5426_v41 = vpop.eup %5425  ;;  %v3113_v62 = vadd.f32 %v3112_v27, %v3111_v52  ;;  %v2648_v24 = vsel %vm2565_vm8, %v6380_v36, -inf  ;;  %4484 = vmatmul.msk.bf16.gmra.mxu1 %vm707_vm0, %v5583_v16  ;;  %v5162_v27 = vunpack.c.h.bf16 %v5322_v58  ;;  %v1861_v58 = vrot.slane %v6041_v18, 4 }
 0x1d7   : > { %v2950_v35 = vmul.f32 1.442695, %v2870_v61  ;;  %v2952_v23 = vmul.f32 1.442695, %v2871_v22  ;;  %v2649_v3 = vmax.f32 %v2647_v1, %v2648_v24  ;;  %v3378_v42 = vmul.f32 %v5426_v41, %v6319_v44 }
 0x1d8   : > { %v3114_v20 = vrot.slane %v3113_v62, 2  ;;  %v1973_v44 = vmul.f32 %v1890_v54, %v1493_v13  ;;  %v3379_v46 = vmul.f32 %v5426_v41, %v6322_v48  ;;  %v1891_v48 = vperm.slane %v1860_v50, 0 }
 0x1d9   : > { %5427 = vpow2.f32 %v2950_v35  ;;  %v2650_v14 = vrot.slane %v2649_v3, 4  ;;  %4627 = vmatmul.msk.f32.gmra.mxu2 %vm2565_vm8, %v3378_v42  ;;  %v1495_v41 = vadd.f32 %v4906_v6, %v6370_v31  ;;  %v5261_v42 = vld [vmem:[%s5975_s16 + $0xa0] sm:$0xff]  }
 0x1da   : > { %5429 = vpow2.f32 %v2952_v23  ;;  %4586 = vmatmul.msk.f32.gmra.mxu3 %vm707_vm0, %v2132_v37  ;;  %v3115_v34 = vadd.f32 %v3114_v20, %v3113_v62  ;;  %v2133_v29 = vadd.f32 %v2069_v26, %v1973_v44  ;;  %v1974_v53 = vmul.f32 %v1891_v48, %v1494_v40  ;;  %v5323_v26 = vld [vmem:[%s5981_s25 + $0xa0] sm:$0xff]  }
 0x1db   : > { %v6390_v8 = vpop.f32.mrf.mxu0  ;;  %v2651_v32 = vmax.f32 %v2649_v3, %v2650_v14  ;;  %v2071_v20 = vmul.f32 %v5162_v27, %v2019_v21  ;;  %v5586_v14 = vld [vmem:[%s5804_s13 + $0xe8] sm:$0xff]   ;;  %v6466_v6 = vld [vmem:[%s6452_s14] sm:$0xff]   ;;  %v5166_v27 = vunpack.c.h.bf16 %v5323_v26 }
 0x1dc   : > { %v3116_v5 = vrot.slane %v3115_v34, 1  ;;  %v2134_v23 = vadd.f32 %v2070_v30, %v1974_v53  ;;  %v2020_v40 = vperm.slane %v6390_v8, 0 }
 0x1dd   : > { %v2652_v55 = vrot.slane %v2651_v32, 2  ;;  %v6400_v60 = vpop.f32.mrf.mxu3 }
 0x1de   : > { %4464 = vmatmul.msk.bf16.gmra.mxu0 %vm707_vm0, %v5584_v51  ;;  %v3117_v7 = vadd.f32 %v3116_v5, %v3115_v34  ;;  %v2656_v62 = vsel %vm2565_vm8, %v6400_v60, -inf  ;;  %v4909_v34 = vunpack.c.l.bf16 %v5261_v42 }
 0x1df   : > { %v6403_v10 = vpop.eup %5427  ;;  %v2653_v63 = vmax.f32 %v2651_v32, %v2652_v55  ;;  %v6440_v32 = vpop.f32.mrf.mxu1 }
 0x1e0   : > { %v6406_v38 = vpop.eup %5429  ;;  %v3118_v45 = vsel %vm2565_vm8, %v6403_v10, 0.0  ;;  %5431 = vrcp.f32 %v3117_v7  ;;  %v5165_v7 = vunpack.c.l.bf16 %v5323_v26 }
 0x1e1   : > { %v3119_v17 = vsel %vm2565_vm8, %v6406_v38, 0.0  ;;  %v2654_v39 = vrot.slane %v2653_v63, 1  ;;  %4628 = vmatmul.msk.f32.gmra.mxu2 %vm2565_vm8, %v3379_v46 }
 0x1e2   : > { %v3120_v47 = vadd.f32 %v3119_v17, %v3118_v45  ;;  %4587 = vmatmul.msk.f32.gmra.mxu3 %vm707_vm0, %v2133_v29  ;;  %v1496_v45 = vadd.f32 %v4909_v34, %v6390_v8  ;;  %v2072_v8 = vmul.f32 %v5165_v7, %v2020_v40 }
 0x1e3   : > { %v6412_v43 = vpop.f32.mrf.mxu0  ;;  %v2655_v52 = vmax.f32 %v2653_v63, %v2654_v39 }
 0x1e4   : > { %v3121_v54 = vrot.slane %v3120_v47, 4 }
 0x1e5   : > { %v2872_v49 = vsub.f32 %v6358_v4, %v2655_v52  ;;  %v2873_v59 = vsub.f32 %v6380_v36, %v2655_v52  ;;  %v6422_v12 = vpop.f32.mrf.mxu3  ;;  %v5585_v36 = vld [vmem:[%s5804_s13 + $0x48] sm:$0xff]  }
 0x1e6   : > { %v5432_v61 = vpop.eup %5431  ;;  %v3122_v22 = vadd.f32 %v3121_v54, %v3120_v47  ;;  %v2657_v13 = vsel %vm2565_vm8, %v6422_v12, -inf  ;;  %4485 = vmatmul.msk.bf16.gmra.mxu1 %vm707_vm0, %v5585_v36  ;;  %v1892_v47 = vperm.slane %v1861_v58, 0  ;;  %v5587_v36 = vld [vmem:[%s5804_s13 + $0x50] sm:$0xff]  }
 0x1e7   : > { %v2954_v1 = vmul.f32 1.442695, %v2872_v49  ;;  %v2956_v24 = vmul.f32 1.442695, %v2873_v59  ;;  %v2658_v35 = vmax.f32 %v2656_v62, %v2657_v13  ;;  %v3380_v4 = vmul.f32 %v5432_v61, %v6361_v15 }
 0x1e8   : > { %v3123_v31 = vrot.slane %v3122_v22, 2  ;;  %v1975_v15 = vmul.f32 %v1891_v48, %v1495_v41  ;;  %v3381_v0 = vmul.f32 %v5432_v61, %v6364_v9  ;;  %v4910_v48 = vunpack.c.h.bf16 %v5261_v42 }
 0x1e9   : > { %5433 = vpow2.f32 %v2954_v1  ;;  %v2659_v16 = vrot.slane %v2658_v35, 4  ;;  %4629 = vmatmul.msk.f32.gmra.mxu2 %vm2565_vm8, %v3380_v4  ;;  %v1976_v53 = vmul.f32 %v1892_v47, %v1496_v45  ;;  %v4957_v61 = vunpack.c.l.bf16 %v6466_v6 }
 0x1ea   : > { %5435 = vpow2.f32 %v2956_v24  ;;  %4588 = vmatmul.msk.f32.gmra.mxu3 %vm707_vm0, %v2134_v23  ;;  %v3124_v37 = vadd.f32 %v3123_v31, %v3122_v22  ;;  %v2135_v50 = vadd.f32 %v2071_v20, %v1975_v15  ;;  %v1497_v13 = vadd.f32 %v4910_v48, %v6412_v43  ;;  %v5262_v43 = vld [vmem:[%s5975_s16 + $0xa8] sm:$0xff]  }
 0x1eb   : > { %v6432_v3 = vpop.f32.mrf.mxu0  ;;  %v2660_v56 = vmax.f32 %v2658_v35, %v2659_v16  ;;  %v2136_v23 = vadd.f32 %v2072_v8, %v1976_v53  ;;  %v1648_v16 = vadd.f32 %v4957_v61, %v6376_v33  ;;  %v2073_v15 = vmul.f32 %v5166_v27, %v2020_v40  ;;  %v5588_v33 = vld [vmem:[%s5804_s13 + $0xf0] sm:$0xff]  }
 0x1ec   : > { %v3125_v44 = vrot.slane %v3124_v37, 1  ;;  %v4913_v26 = vunpack.c.l.bf16 %v5262_v43 }
 0x1ed   : > { %v2661_v51 = vrot.slane %v2660_v56, 2  ;;  %v6442_v25 = vpop.f32.mrf.mxu3 }
 0x1ee   : > { %4465 = vmatmul.msk.bf16.gmra.mxu0 %vm707_vm0, %v5586_v14  ;;  %v3126_v5 = vadd.f32 %v3125_v44, %v3124_v37  ;;  %v2665_v1 = vsel %vm2565_vm8, %v6442_v25, -inf  ;;  %v6494_v14 = vld [vmem:[%s5981_s25 + $0xa8] sm:$0xff]  }
 0x1ef   : > { %v6445_v55 = vpop.eup %5433  ;;  %v2662_v29 = vmax.f32 %v2660_v56, %v2661_v51  ;;  %v1977_v56 = vmul.f32 %v1892_v47, %v1497_v13  ;;  %v5170_v61 = vunpack.c.h.bf16 %v6494_v14 }
 0x1f0   : > { %v6454_v63 = vpop.eup %5435  ;;  %v3127_v46 = vsel %vm2565_vm8, %v6445_v55, 0.0  ;;  %5437 = vrcp.f32 %v3126_v5 }
 0x1f1   : > { %v3128_v9 = vsel %vm2565_vm8, %v6454_v63, 0.0  ;;  %v2663_v17 = vrot.slane %v2662_v29, 1  ;;  %4630 = vmatmul.msk.f32.gmra.mxu2 %vm2565_vm8, %v3381_v0  ;;  %v1862_v0 = vrot.slane %v6041_v18, 5  ;;  %v2137_v40 = vadd.f32 %v2073_v15, %v1977_v56  ;;  %v5589_v56 = vld [vmem:[%s5804_s13 + $0x58] sm:$0xff]  }
 0x1f2   : > { %v3129_v39 = vadd.f32 %v3128_v9, %v3127_v46  ;;  %4589 = vmatmul.msk.f32.gmra.mxu3 %vm707_vm0, %v2135_v50 }
 0x1f3   : > { %v6460_v21 = vpop.f32.mrf.mxu0  ;;  %v2664_v52 = vmax.f32 %v2662_v29, %v2663_v17  ;;  %v6469_v30 = vpop.f32.mrf.mxu1  ;;  %v5169_v29 = vunpack.c.l.bf16 %v6494_v14  ;;  %v4958_v17 = vunpack.c.h.bf16 %v6466_v6  ;;  %v5263_v14 = vld [vmem:[%s5975_s16 + $0xb0] sm:$0xff]  }
 0x1f4   : > { %v3130_v54 = vrot.slane %v3129_v39, 4 }
 0x1f5   : > { %v2874_v49 = vsub.f32 %v6400_v60, %v2664_v52  ;;  %v2875_v59 = vsub.f32 %v6422_v12, %v2664_v52  ;;  %v6474_v22 = vpop.f32.mrf.mxu3  ;;  %v1498_v52 = vadd.f32 %v4913_v26, %v6432_v3 }
 0x1f6   : > { %v5438_v41 = vpop.eup %5437  ;;  %v3131_v62 = vadd.f32 %v3130_v54, %v3129_v39  ;;  %v2666_v24 = vsel %vm2565_vm8, %v6474_v22, -inf  ;;  %4486 = vmatmul.msk.bf16.gmra.mxu1 %vm707_vm0, %v5587_v36  ;;  %v2021_v54 = vperm.slane %v6432_v3, 0  ;;  %v1649_v3 = vadd.f32 %v4958_v17, %v6398_v11 }
 0x1f7   : > { %v2958_v35 = vmul.f32 1.442695, %v2874_v49  ;;  %v2960_v4 = vmul.f32 1.442695, %v2875_v59  ;;  %v2667_v60 = vmax.f32 %v2665_v1, %v2666_v24  ;;  %v3382_v12 = vmul.f32 %v5438_v41, %v6403_v10  ;;  %v4191_v10 = vld [vmem:[%s7617_s9 + $0x18] sm:$0xff] }
 0x1f8   : > { %v3132_v42 = vrot.slane %v3131_v62, 2  ;;  %4276 = vmatpush.msrb.mxu0 %v4191_v10  ;;  %v3383_v39 = vmul.f32 %v5438_v41, %v6406_v38  ;;  %v4914_v49 = vunpack.c.h.bf16 %v5262_v43  ;;  %v6520_v38 = vld [vmem:[%s6452_s14 + $0x8] sm:$0xff]   ;;  %v1893_v59 = vperm.slane %v1862_v0, 0 }
 0x1f9   : > { %5439 = vpow2.f32 %v2958_v35  ;;  %v2668_v37 = vrot.slane %v2667_v60, 4  ;;  %4631 = vmatmul.msk.f32.gmra.mxu2 %vm2565_vm8, %v3382_v12  ;;  %v2074_v1 = vmul.f32 %v5169_v29, %v2021_v54  ;;  %v4961_v24 = vunpack.c.l.bf16 %v6520_v38 }
 0x1fa   : > { %5441 = vpow2.f32 %v2960_v4  ;;  %4590 = vmatmul.msk.f32.gmra.mxu3 %vm707_vm0, %v2136_v23  ;;  %v3133_v20 = vadd.f32 %v3132_v42, %v3131_v62  ;;  %v1978_v13 = vmul.f32 %v1893_v59, %v1498_v52  ;;  %v1499_v36 = vadd.f32 %v4914_v49, %v6460_v21 }
 0x1fb   : > { %v6484_v31 = vpop.f32.mrf.mxu0  ;;  %v2669_v34 = vmax.f32 %v2667_v60, %v2668_v37  ;;  %v6498_v58 = vpop.f32.mrf.mxu1  ;;  %v2075_v29 = vmul.f32 %v5170_v61, %v2021_v54 }
 0x1fc   : > { %v3644_v44 = vpop.f32.mrf.mxu2  ;;  %v3134_v51 = vrot.slane %v3133_v20, 1  ;;  %v2138_v21 = vadd.f32 %v2074_v1, %v1978_v13  ;;  %v1979_v0 = vmul.f32 %v1893_v59, %v1499_v36 }
 0x1fd   : > { %v2670_v5 = vrot.slane %v2669_v34, 2  ;;  %v3836_v50 = vmul.f32 %v3644_v44, %v1648_v16  ;;  %v6500_v7 = vpop.f32.mrf.mxu3 }
 0x1fe   : > { %4466 = vmatmul.msk.bf16.gmra.mxu0 %vm707_vm0, %v5588_v33  ;;  %v3135_v46 = vadd.f32 %v3134_v51, %v3133_v20  ;;  %v2674_v37 = vsel %vm2565_vm8, %v6500_v7, -inf  ;;  %v1650_v51 = vadd.f32 %v4961_v24, %v6418_v2  ;;  %v2139_v61 = vadd.f32 %v2075_v29, %v1979_v0 }
 0x1ff   : > { %v6504_v45 = vpop.eup %5439  ;;  %v2671_v9 = vmax.f32 %v2669_v34, %v2670_v5  ;;  %v3900_v16 = vsel %vm707_vm0, %v3836_v50, 0.0  ;;  %v2022_v24 = vperm.slane %v6484_v31, 0 }
 0x200   : > { %v6508_v47 = vpop.eup %5441  ;;  %v3136_v48 = vsel %vm2565_vm8, %v6504_v45, 0.0  ;;  %5443 = vrcp.f32 %v3135_v46  ;;  %v4917_v46 = vunpack.c.l.bf16 %v5263_v14 }
 0x201   : > { %v3137_v8 = vsel %vm2565_vm8, %v6508_v47, 0.0  ;;  %v2672_v27 = vrot.slane %v2671_v9, 1  ;;  %4632 = vmatmul.msk.f32.gmra.mxu2 %vm2565_vm8, %v3383_v39 }
 0x202   : > { %v3138_v6 = vadd.f32 %v3137_v8, %v3136_v48  ;;  %4591 = vmatmul.msk.f32.gmra.mxu3 %vm707_vm0, %v2137_v40  ;;  %v6549_v40 = vld [vmem:[%s5981_s25 + $0xb0] sm:$0xff]   ;;  %v1863_v48 = vrot.slane %v6041_v18, 6 }
 0x203   : > { %v6514_v53 = vpop.f32.mrf.mxu0  ;;  %v2673_v41 = vmax.f32 %v2671_v9, %v2672_v27  ;;  %v6526_v4 = vpop.f32.mrf.mxu1  ;;  %v5173_v49 = vunpack.c.l.bf16 %v6549_v40 }
 0x204   : > { %v3139_v62 = vrot.slane %v3138_v6, 4  ;;  %v3647_v35 = vpop.f32.mrf.mxu2  ;;  %v1894_v36 = vperm.slane %v1863_v48, 0 }
 0x205   : > { %v2876_v60 = vsub.f32 %v6442_v25, %v2673_v41  ;;  %v2877_v12 = vsub.f32 %v6474_v22, %v2673_v41  ;;  %v3837_v23 = vmul.f32 %v3647_v35, %v1649_v3  ;;  %v6531_v42 = vpop.f32.mrf.mxu3  ;;  %v1500_v41 = vadd.f32 %v4917_v46, %v6484_v31 }
 0x206   : > { %v5444_v11 = vpop.eup %5443  ;;  %v3140_v43 = vadd.f32 %v3139_v62, %v3138_v6  ;;  %v2675_v10 = vsel %vm2565_vm8, %v6531_v42, -inf  ;;  %4487 = vmatmul.msk.bf16.gmra.mxu1 %vm707_vm0, %v5589_v56  ;;  %v4918_v6 = vunpack.c.h.bf16 %v5263_v14  ;;  %v4962_v62 = vunpack.c.h.bf16 %v6520_v38 }
 0x207   : > { %v2962_v20 = vmul.f32 1.442695, %v2876_v60  ;;  %v2964_v25 = vmul.f32 1.442695, %v2877_v12  ;;  %v3901_v22 = vsel %vm707_vm0, %v3837_v23, 0.0  ;;  %v2676_v15 = vmax.f32 %v2674_v37, %v2675_v10 }
 0x208   : > { %v3902_v34 = vadd.f32 %v3901_v22, %v3900_v16  ;;  %v3384_v26 = vmul.f32 %v5444_v11, %v6445_v55  ;;  %v3141_v33 = vrot.slane %v3140_v43, 2  ;;  %v3385_v35 = vmul.f32 %v5444_v11, %v6454_v63  ;;  %v6572_v16 = vld [vmem:[%s6452_s14 + $0x10] sm:$0xff]  }
 0x209   : > { %5445 = vpow2.f32 %v2962_v20  ;;  %v2677_v5 = vrot.slane %v2676_v15, 4  ;;  %v5174_v31 = vunpack.c.h.bf16 %v6549_v40  ;;  %v1980_v37 = vmul.f32 %v1894_v36, %v1500_v41 }
 0x20a   : > { %5447 = vpow2.f32 %v2964_v25  ;;  %4633 = vmatmul.msk.f32.gmra.mxu2 %vm2565_vm8, %v3384_v26  ;;  %4592 = vmatmul.msk.f32.gmra.mxu3 %vm707_vm0, %v2138_v21  ;;  %v3142_v50 = vadd.f32 %v3141_v33, %v3140_v43  ;;  %v3903_v2 = vrot.slane %v3902_v34, 4  ;;  %v1651_v11 = vadd.f32 %v4962_v62, %v6440_v32 }
 0x20b   : > { %v6543_v44 = vpop.f32.mrf.mxu0  ;;  %v2678_v9 = vmax.f32 %v2676_v15, %v2677_v5  ;;  %v6551_v39 = vpop.f32.mrf.mxu1  ;;  %v2076_v20 = vmul.f32 %v5173_v49, %v2022_v24  ;;  %v1501_v25 = vadd.f32 %v4918_v6, %v6514_v53  ;;  %v4965_v22 = vunpack.c.l.bf16 %v6572_v16 }
 0x20c   : > { %v3650_v55 = vpop.f32.mrf.mxu2  ;;  %v3143_v17 = vrot.slane %v3142_v50, 1  ;;  %v3904_v23 = vadd.f32 %v3903_v2, %v3902_v34 }
 0x20d   : > { %v2679_v52 = vrot.slane %v2678_v9, 2  ;;  %v3838_v8 = vmul.f32 %v3650_v55, %v1650_v51  ;;  %v6554_v27 = vpop.f32.mrf.mxu3  ;;  %v5264_v55 = vld [vmem:[%s5975_s16 + $0xb8] sm:$0xff]  }
 0x20e   : > { %v3144_v54 = vadd.f32 %v3143_v17, %v3142_v50  ;;  %v3905_v21 = vrot.slane %v3904_v23, 2  ;;  %v2683_v53 = vsel %vm2565_vm8, %v6554_v27, -inf  ;;  %v4921_v62 = vunpack.c.l.bf16 %v5264_v55 }
 0x20f   : > { %v6557_v59 = vpop.eup %5445  ;;  %v2680_v3 = vmax.f32 %v2678_v9, %v2679_v52  ;;  %v3909_v5 = vsel %vm707_vm0, %v3838_v8, 0.0  ;;  %v2140_v9 = vadd.f32 %v2076_v20, %v1980_v37  ;;  %v2077_v52 = vmul.f32 %v5174_v31, %v2022_v24 }
 0x210   : > { %v6561_v13 = vpop.eup %5447  ;;  %v3145_v1 = vsel %vm2565_vm8, %v6557_v59, 0.0  ;;  %5449 = vrcp.f32 %v3144_v54  ;;  %v1652_v8 = vadd.f32 %v4965_v22, %v6469_v30  ;;  %v1981_v54 = vmul.f32 %v1894_v36, %v1501_v25 }
 0x211   : > { %v3146_v12 = vsel %vm2565_vm8, %v6561_v13, 0.0  ;;  %v2681_v43 = vrot.slane %v2680_v3, 1  ;;  %v1502_v25 = vadd.f32 %v4921_v62, %v6543_v44  ;;  %v2023_v22 = vperm.slane %v6543_v44, 0 }
 0x212   : > { %v3147_v38 = vadd.f32 %v3146_v12, %v3145_v1  ;;  %4634 = vmatmul.msk.f32.gmra.mxu2 %vm2565_vm8, %v3385_v35  ;;  %4593 = vmatmul.msk.f32.gmra.mxu3 %vm707_vm0, %v2139_v61  ;;  %v6600_v61 = vld [vmem:[%s5981_s25 + $0xb8] sm:$0xff]   ;;  %v1864_v1 = vrot.slane %v6041_v18, 7 }
 0x213   : > { %v6567_v60 = vpop.f32.mrf.mxu0  ;;  %v2682_v63 = vmax.f32 %v2680_v3, %v2681_v43  ;;  %v6580_v56 = vpop.f32.mrf.mxu1  ;;  %v3906_v3 = vadd.f32 %v3905_v21, %v3904_v23  ;;  %v5177_v43 = vunpack.c.l.bf16 %v6600_v61  ;;  %v4966_v23 = vunpack.c.h.bf16 %v6572_v16 }
 0x214   : > { %v3148_v10 = vrot.slane %v3147_v38, 4  ;;  %v3653_v15 = vpop.f32.mrf.mxu2 }
 0x215   : > { %v2878_v14 = vsub.f32 %v6500_v7, %v2682_v63  ;;  %v2879_v34 = vsub.f32 %v6531_v42, %v2682_v63  ;;  %v3839_v26 = vmul.f32 %v3653_v15, %v1651_v11  ;;  %v6584_v33 = vpop.f32.mrf.mxu3  ;;  %v5590_v42 = vld [vmem:[%s5804_s13 + $0x60] sm:$0xff]   ;;  %v2141_v63 = vadd.f32 %v2077_v52, %v1981_v54 }
 0x216   : > { %v5450_v32 = vpop.eup %5449  ;;  %v3149_v51 = vadd.f32 %v3148_v10, %v3147_v38  ;;  %v2684_v50 = vsel %vm2565_vm8, %v6584_v33, -inf  ;;  %4488 = vmatmul.msk.bf16.gmra.mxu1 %vm707_vm0, %v5590_v42  ;;  %v4922_v38 = vunpack.c.h.bf16 %v5264_v55  ;;  %v3907_v18 = vrot.slane %v3906_v3, 1 }
 0x217   : > { %v2966_v29 = vmul.f32 1.442695, %v2878_v14  ;;  %v2968_v0 = vmul.f32 1.442695, %v2879_v34  ;;  %v3910_v7 = vsel %vm707_vm0, %v3839_v26, 0.0  ;;  %v2685_v46 = vmax.f32 %v2683_v53, %v2684_v50 }
 0x218   : > { %v3150_v40 = vrot.slane %v3149_v51, 2  ;;  %v3911_v17 = vadd.f32 %v3910_v7, %v3909_v5  ;;  %v3386_v48 = vmul.f32 %v5450_v32, %v6504_v45  ;;  %v3387_v26 = vmul.f32 %v5450_v32, %v6508_v47 }
 0x219   : > { %5451 = vpow2.f32 %v2966_v29  ;;  %v2686_v49 = vrot.slane %v2685_v46, 4  ;;  %v1895_v53 = vperm.slane %v1864_v1, 0  ;;  %v5178_v29 = vunpack.c.h.bf16 %v6600_v61 }
 0x21a   : > { %v3151_v6 = vadd.f32 %v3150_v40, %v3149_v51  ;;  %5453 = vpow2.f32 %v2968_v0  ;;  %v3912_v41 = vrot.slane %v3911_v17, 4  ;;  %4635 = vmatmul.msk.f32.gmra.mxu2 %vm2565_vm8, %v3386_v48  ;;  %4594 = vmatmul.msk.f32.gmra.mxu3 %vm707_vm0, %v2140_v9  ;;  %v6621_v51 = vld [vmem:[%s6452_s14 + $0x18] sm:$0xff]   ;;  %v1653_v7 = vadd.f32 %v4966_v23, %v6498_v58 }
 0x21b   : > { %v6596_v2 = vpop.f32.mrf.mxu0  ;;  %v2687_v45 = vmax.f32 %v2685_v46, %v2686_v49  ;;  %v6605_v30 = vpop.f32.mrf.mxu1  ;;  %v1982_v47 = vmul.f32 %v1895_v53, %v1502_v25  ;;  %v2078_v32 = vmul.f32 %v5177_v43, %v2023_v22  ;;  %v4969_v42 = vunpack.c.l.bf16 %v6621_v51  ;;  %v5265_v43 = vld [vmem:[%s5975_s16 + $0xc0] sm:$0xff]  }
 0x21c   : > { %v3913_v24 = vadd.f32 %v3912_v41, %v3911_v17  ;;  %v3656_v35 = vpop.f32.mrf.mxu2  ;;  %v3152_v12 = vrot.slane %v3151_v6, 1  ;;  %v3908_v40 = vadd.f32 %v3907_v18, %v3906_v3  ;;  %v1503_v17 = vadd.f32 %v4922_v38, %v6567_v60 }
 0x21d   : > { %v2688_v36 = vrot.slane %v2687_v45, 2  ;;  %v3840_v31 = vmul.f32 %v3656_v35, %v1652_v8  ;;  %v6608_v37 = vpop.f32.mrf.mxu3  ;;  %v2079_v25 = vmul.f32 %v5178_v29, %v2023_v22 }
 0x21e   : > { %v3914_v11 = vrot.slane %v3913_v24, 2  ;;  %v3153_v10 = vadd.f32 %v3152_v12, %v3151_v6  ;;  %v2692_v49 = vsel %vm2565_vm8, %v6608_v37, -inf  ;;  %v2142_v12 = vadd.f32 %v2078_v32, %v1982_v47 }
 0x21f   : > { %v6611_v20 = vpop.eup %5451  ;;  %v2689_v15 = vmax.f32 %v2687_v45, %v2688_v36  ;;  %v3918_v60 = vsel %vm707_vm0, %v3840_v31, 0.0  ;;  %v1654_v31 = vadd.f32 %v4969_v42, %v6526_v4  ;;  %v4926_v32 = vunpack.c.h.bf16 %v5265_v43 }
 0x220   : > { %v6615_v21 = vpop.eup %5453  ;;  %v3154_v14 = vsel %vm2565_vm8, %v6611_v20, 0.0  ;;  %v3915_v34 = vadd.f32 %v3914_v11, %v3913_v24  ;;  %5455 = vrcp.f32 %v3153_v10  ;;  %v5591_v24 = vld [vmem:[%s5804_s13 + $0x68] sm:$0xff]   ;;  %v6656_v10 = vld [vmem:[%s5981_s25 + $0xc0] sm:$0xff]  }
 0x221   : > { %v3155_v5 = vsel %vm2565_vm8, %v6615_v21, 0.0  ;;  %v2690_v50 = vrot.slane %v2689_v15, 1  ;;  %v5181_v4 = vunpack.c.l.bf16 %v6656_v10 }
 0x222   : > { %v3156_v44 = vadd.f32 %v3155_v5, %v3154_v14  ;;  %v3916_v0 = vrot.slane %v3915_v34, 1  ;;  %4636 = vmatmul.msk.f32.gmra.mxu2 %vm2565_vm8, %v3387_v26  ;;  %4595 = vmatmul.msk.f32.gmra.mxu3 %vm707_vm0, %v2141_v63  ;;  %v4925_v14 = vunpack.c.l.bf16 %v5265_v43 }
 0x223   : > { %v6623_v16 = vpop.f32.mrf.mxu0  ;;  %v2691_v46 = vmax.f32 %v2689_v15, %v2690_v50  ;;  %v6633_v52 = vpop.f32.mrf.mxu1  ;;  %v1983_v15 = vmul.f32 %v1895_v53, %v1503_v17 }
 0x224   : > { %v3157_v9 = vrot.slane %v3156_v44, 4  ;;  %v3917_v55 = vadd.f32 %v3916_v0, %v3915_v34  ;;  %v3659_v48 = vpop.f32.mrf.mxu2  ;;  %v1504_v29 = vadd.f32 %v4925_v14, %v6596_v2 }
 0x225   : > { %v2880_v58 = vsub.f32 %v6554_v27, %v2691_v46  ;;  %v2881_v8 = vsub.f32 %v6584_v33, %v2691_v46  ;;  %v3841_v6 = vmul.f32 %v3659_v48, %v1653_v7  ;;  %v6639_v54 = vpop.f32.mrf.mxu3  ;;  %v4970_v46 = vunpack.c.h.bf16 %v6621_v51 }
 0x226   : > { %v5456_v61 = vpop.eup %5455  ;;  %v3158_v41 = vadd.f32 %v3157_v9, %v3156_v44  ;;  %v6642_v3 = vsel %vm1227_vm1, %v3917_v55, %v3908_v40  ;;  %v2693_v62 = vsel %vm2565_vm8, %v6639_v54, -inf  ;;  %4489 = vmatmul.msk.bf16.gmra.mxu1 %vm707_vm0, %v5591_v24  ;;  %v2143_v53 = vadd.f32 %v2079_v25, %v1983_v15  ;;  %v5592_v15 = vld [vmem:[%s5804_s13 + $0x70] sm:$0xff]  }
 0x227   : > { %v2970_v27 = vmul.f32 1.442695, %v2880_v58  ;;  %v2972_v45 = vmul.f32 1.442695, %v2881_v8  ;;  %v3919_v33 = vsel %vm707_vm0, %v3841_v6, 0.0  ;;  %v2694_v1 = vmax.f32 %v2692_v49, %v2693_v62 }
 0x228   : > { %v3159_v35 = vrot.slane %v3158_v41, 2  ;;  %v3920_v36 = vadd.f32 %v3919_v33, %v3918_v60  ;;  %v3388_v38 = vmul.f32 %v5456_v61, %v6557_v59  ;;  %v2024_v40 = vperm.slane %v6596_v2, 0 }
 0x229   : > { %5457 = vpow2.f32 %v2970_v27  ;;  %v2695_v11 = vrot.slane %v2694_v1, 4  ;;  %v3389_v58 = vmul.f32 %v5456_v61, %v6561_v13  ;;  %v1896_v49 = vperm.slane %v6050_v19, 0 }
 0x22a   : > { %v3160_v23 = vadd.f32 %v3159_v35, %v3158_v41  ;;  %5459 = vpow2.f32 %v2972_v45  ;;  %v3921_v18 = vrot.slane %v3920_v36, 4  ;;  %4637 = vmatmul.msk.f32.gmra.mxu2 %vm2565_vm8, %v3388_v38  ;;  %4596 = vmatmul.msk.f32.gmra.mxu3 %vm707_vm0, %v2142_v12  ;;  %v5182_v60 = vunpack.c.h.bf16 %v6656_v10 }
 0x22b   : > { %v6652_v63 = vpop.f32.mrf.mxu0  ;;  %v2696_v34 = vmax.f32 %v2694_v1, %v2695_v11  ;;  %v6660_v50 = vpop.f32.mrf.mxu1  ;;  %v1984_v62 = vmul.f32 %v1896_v49, %v1504_v29  ;;  %v1655_v13 = vadd.f32 %v4970_v46, %v6551_v39  ;;  %v2080_v45 = vmul.f32 %v5181_v4, %v2024_v40 }
 0x22c   : > { %v3922_v59 = vadd.f32 %v3921_v18, %v3920_v36  ;;  %v3662_v26 = vpop.f32.mrf.mxu2  ;;  %v3161_v5 = vrot.slane %v3160_v23, 1  ;;  %v1505_v1 = vadd.f32 %v4926_v32, %v6623_v16 }
 0x22d   : > { %v2697_v44 = vrot.slane %v2696_v34, 2  ;;  %v3842_v0 = vmul.f32 %v3662_v26, %v1654_v31  ;;  %v6663_v7 = vpop.f32.mrf.mxu3 }
 0x22e   : > { %v3923_v47 = vrot.slane %v3922_v59, 2  ;;  %v3162_v42 = vadd.f32 %v3161_v5, %v3160_v23  ;;  %v2701_v36 = vsel %vm2565_vm8, %v6663_v7, -inf  ;;  %v1985_v32 = vmul.f32 %v1896_v49, %v1505_v1 }
 0x22f   : > { %v6666_v22 = vpop.eup %5457  ;;  %v2698_v9 = vmax.f32 %v2696_v34, %v2697_v44  ;;  %v3927_v23 = vsel %vm707_vm0, %v3842_v0, 0.0  ;;  %v2144_v34 = vadd.f32 %v2080_v45, %v1984_v62  ;;  %v2025_v62 = vperm.slane %v6652_v63, 0 }
 0x230   : > { %v6670_v55 = vpop.eup %5459  ;;  %v3163_v17 = vsel %vm2565_vm8, %v6666_v22, 0.0  ;;  %v3924_v48 = vadd.f32 %v3923_v47, %v3922_v59  ;;  %5461 = vrcp.f32 %v3162_v42  ;;  %v6704_v59 = vld [vmem:[%s5975_s16 + $0xc8] sm:$0xff]   ;;  %v2081_v47 = vmul.f32 %v5182_v60, %v2024_v40 }
 0x231   : > { %v3164_v51 = vsel %vm2565_vm8, %v6670_v55, 0.0  ;;  %v2699_v6 = vrot.slane %v2698_v9, 1  ;;  %v4929_v46 = vunpack.c.l.bf16 %v6704_v59  ;;  %v6713_v42 = vld [vmem:[%s5981_s25 + $0xc8] sm:$0xff]  }
 0x232   : > { %v3165_v41 = vadd.f32 %v3164_v51, %v3163_v17  ;;  %v3925_v2 = vrot.slane %v3924_v48, 1  ;;  %4638 = vmatmul.msk.f32.gmra.mxu2 %vm2565_vm8, %v3389_v58  ;;  %4597 = vmatmul.msk.f32.gmra.mxu3 %vm707_vm0, %v2143_v53  ;;  %v5185_v51 = vunpack.c.l.bf16 %v6713_v42 }
 0x233   : > { %v6675_v8 = vpop.f32.mrf.mxu0  ;;  %v2700_v27 = vmax.f32 %v2698_v9, %v2699_v6  ;;  %v6685_v35 = vpop.f32.mrf.mxu1  ;;  %v1865_v6 = vrot.slane %v6050_v19, 1  ;;  %v1506_v60 = vadd.f32 %v4929_v46, %v6652_v63 }
 0x234   : > { %v3166_v61 = vrot.slane %v3165_v41, 4  ;;  %v3926_v33 = vadd.f32 %v3925_v2, %v3924_v48  ;;  %v3665_v24 = vpop.f32.mrf.mxu2  ;;  %v2145_v2 = vadd.f32 %v2081_v47, %v1985_v32  ;;  %v5593_v32 = vld [vmem:[%s5804_s13 + $0x78] sm:$0xff]  }
 0x235   : > { %v2882_v12 = vsub.f32 %v6608_v37, %v2700_v27  ;;  %v2883_v43 = vsub.f32 %v6639_v54, %v2700_v27  ;;  %v3843_v38 = vmul.f32 %v3665_v24, %v1655_v13  ;;  %v6691_v31 = vpop.f32.mrf.mxu3 }
 0x236   : > { %v5462_v39 = vpop.eup %5461  ;;  %v3167_v11 = vadd.f32 %v3166_v61, %v3165_v41  ;;  %v6695_v16 = vsel %vm1230_vm2, %v3926_v33, %v6642_v3  ;;  %v2702_v37 = vsel %vm2565_vm8, %v6691_v31, -inf  ;;  %4490 = vmatmul.msk.bf16.gmra.mxu1 %vm707_vm0, %v5592_v15 }
 0x237   : > { %v2974_v10 = vmul.f32 1.442695, %v2882_v12  ;;  %v2976_v54 = vmul.f32 1.442695, %v2883_v43  ;;  %v3928_v18 = vsel %vm707_vm0, %v3843_v38, 0.0  ;;  %v2703_v25 = vmax.f32 %v2701_v36, %v2702_v37 }
 0x238   : > { %v3168_v14 = vrot.slane %v3167_v11, 2  ;;  %v3929_v3 = vadd.f32 %v3928_v18, %v3927_v23  ;;  %v3390_v26 = vmul.f32 %v5462_v39, %v6611_v20  ;;  %v3391_v33 = vmul.f32 %v5462_v39, %v6615_v21 }
 0x239   : > { %5463 = vpow2.f32 %v2974_v10  ;;  %v2704_v5 = vrot.slane %v2703_v25, 4  ;;  %v1897_v43 = vperm.slane %v1865_v6, 0  ;;  %v4930_v38 = vunpack.c.h.bf16 %v6704_v59 }
 0x23a   : > { %v3169_v44 = vadd.f32 %v3168_v14, %v3167_v11  ;;  %5465 = vpow2.f32 %v2976_v54  ;;  %v3930_v0 = vrot.slane %v3929_v3, 4  ;;  %4639 = vmatmul.msk.f32.gmra.mxu2 %vm2565_vm8, %v3390_v26  ;;  %4598 = vmatmul.msk.f32.gmra.mxu3 %vm707_vm0, %v2144_v34  ;;  %v2082_v39 = vmul.f32 %v5185_v51, %v2025_v62 }
 0x23b   : > { %v6707_v4 = vpop.f32.mrf.mxu0  ;;  %v2705_v53 = vmax.f32 %v2703_v25, %v2704_v5  ;;  %v6717_v17 = vpop.f32.mrf.mxu1  ;;  %v1986_v21 = vmul.f32 %v1897_v43, %v1506_v60  ;;  %v5186_v18 = vunpack.c.h.bf16 %v6713_v42  ;;  %v6769_v60 = vld [vmem:[%s6452_s14 + $0x28] sm:$0xff]  }
 0x23c   : > { %v3931_v29 = vadd.f32 %v3930_v0, %v3929_v3  ;;  %v6715_v20 = vpop.f32.mrf.mxu2  ;;  %v3170_v9 = vrot.slane %v3169_v44, 1 }
 0x23d   : > { %v2706_v48 = vrot.slane %v2705_v53, 2  ;;  %v6719_v58 = vpop.f32.mrf.mxu3  ;;  %v2146_v42 = vadd.f32 %v2082_v39, %v1986_v21  ;;  %v4977_v21 = vunpack.c.l.bf16 %v6769_v60 }
 0x23e   : > { %v3932_v40 = vrot.slane %v3931_v29, 2  ;;  %v3171_v49 = vadd.f32 %v3170_v9, %v3169_v44  ;;  %v2710_v3 = vsel %vm2565_vm8, %v6719_v58, -inf  ;;  %v5276_v44 = vld [vmem:[%s6452_s14 + $0x20] sm:$0xff]  }
 0x23f   : > { %v6723_v41 = vpop.eup %5463  ;;  %v2707_v27 = vmax.f32 %v2705_v53, %v2706_v48  ;;  %v6759_v53 = vld [vmem:[%s5975_s16 + $0xd0] sm:$0xff]   ;;  %v4973_v48 = vunpack.c.l.bf16 %v5276_v44  ;;  %v4974_v51 = vunpack.c.h.bf16 %v5276_v44 }
 0x240   : > { %v6727_v13 = vpop.eup %5465  ;;  %v3172_v61 = vsel %vm2565_vm8, %v6723_v41, 0.0  ;;  %v3933_v45 = vadd.f32 %v3932_v40, %v3931_v29  ;;  %5467 = vrcp.f32 %v3171_v49  ;;  %v4933_v40 = vunpack.c.l.bf16 %v6759_v53  ;;  %v6766_v49 = vld [vmem:[%s5981_s25 + $0xd0] sm:$0xff]  }
 0x241   : > { %v3173_v1 = vsel %vm2565_vm8, %v6727_v13, 0.0  ;;  %v2708_v24 = vrot.slane %v2707_v27, 1  ;;  %v4934_v44 = vunpack.c.h.bf16 %v6759_v53 }
 0x242   : > { %v3174_v12 = vadd.f32 %v3173_v1, %v3172_v61  ;;  %v3934_v36 = vrot.slane %v3933_v45, 1  ;;  %4640 = vmatmul.msk.f32.gmra.mxu2 %vm2565_vm8, %v3391_v33  ;;  %4599 = vmatmul.msk.f32.gmra.mxu3 %vm707_vm0, %v2145_v2 }
 0x243   : > { %v2709_v63 = vmax.f32 %v2707_v27, %v2708_v24  ;;  %v6737_v11 = vpop.f32.mrf.mxu0  ;;  %v6739_v54 = vpop.f32.mrf.mxu1 }
 0x244   : > { %v3175_v23 = vrot.slane %v3174_v12, 4  ;;  %v3935_v37 = vadd.f32 %v3934_v36, %v3933_v45  ;;  %v3671_v10 = vpop.f32.mrf.mxu2  ;;  %v1866_v45 = vrot.slane %v6050_v19, 2 }
 0x245   : > { %v2884_v25 = vsub.f32 %v6663_v7, %v2709_v63  ;;  %v2885_v15 = vsub.f32 %v6691_v31, %v2709_v63  ;;  %v6744_v14 = vpop.f32.mrf.mxu3  ;;  %v1507_v31 = vadd.f32 %v4930_v38, %v6675_v8  ;;  %v2083_v8 = vmul.f32 %v5186_v18, %v2025_v62 }
 0x246   : > { %v5468_v34 = vpop.eup %5467  ;;  %v3176_v59 = vadd.f32 %v3175_v23, %v3174_v12  ;;  %v2711_v26 = vsel %vm2565_vm8, %v6744_v14, -inf  ;;  %v6752_v5 = vsel %vm1233_vm3, %v3935_v37, %v6695_v16  ;;  %4491 = vmatmul.msk.bf16.gmra.mxu1 %vm707_vm0, %v5593_v32  ;;  %v1656_v62 = vadd.f32 %v4973_v48, %v6580_v56 }
 0x247   : > { %v2978_v0 = vmul.f32 1.442695, %v2884_v25  ;;  %v2980_v7 = vmul.f32 1.442695, %v2885_v15  ;;  %v2712_v47 = vmax.f32 %v2710_v3, %v2711_v26  ;;  %v3392_v29 = vmul.f32 %v5468_v34, %v6666_v22 }
 0x248   : > { %v3177_v46 = vrot.slane %v3176_v59, 2  ;;  %v1987_v6 = vmul.f32 %v1897_v43, %v1507_v31  ;;  %v1657_v12 = vadd.f32 %v4974_v51, %v6605_v30  ;;  %v5189_v43 = vunpack.c.l.bf16 %v6766_v49 }
 0x249   : > { %5469 = vpow2.f32 %v2978_v0  ;;  %v2713_v16 = vrot.slane %v2712_v47, 4  ;;  %v1508_v23 = vadd.f32 %v4933_v40, %v6707_v4  ;;  %v2026_v56 = vperm.slane %v6707_v4, 0  ;;  %v6797_v0 = vld [vmem:[%s5975_s16 + $0xd8] sm:$0xff]  }
 0x24a   : > { %v3178_v9 = vadd.f32 %v3177_v46, %v3176_v59  ;;  %5471 = vpow2.f32 %v2980_v7  ;;  %4641 = vmatmul.msk.f32.gmra.mxu2 %vm2565_vm8, %v3392_v29  ;;  %4600 = vmatmul.msk.f32.gmra.mxu3 %vm707_vm0, %v2146_v42  ;;  %v2147_v38 = vadd.f32 %v2083_v8, %v1987_v6  ;;  %v3393_v30 = vmul.f32 %v5468_v34, %v6670_v55 }
 0x24b   : > { %v2714_v2 = vmax.f32 %v2712_v47, %v2713_v16  ;;  %v6773_v61 = vpop.f32.mrf.mxu1  ;;  %v6778_v24 = vpop.f32.mrf.mxu0  ;;  %v3845_v15 = vmul.f32 %v3671_v10, %v1657_v12  ;;  %v1898_v26 = vperm.slane %v1866_v45, 0  ;;  %v1867_v7 = vrot.slane %v6050_v19, 3  ;;  %v5594_v45 = vld [vmem:[%s5804_s13 + $0x80] sm:$0xff]   ;;  %v6826_v12 = vld [vmem:[%s5981_s25 + $0xd8] sm:$0xff]  }
 0x24c   : > { %v6771_v22 = vpop.f32.mrf.mxu2  ;;  %v3179_v27 = vrot.slane %v3178_v9, 1  ;;  %v3844_v55 = vmul.f32 %v6715_v20, %v1656_v62  ;;  %v5190_v4 = vunpack.c.h.bf16 %v6766_v49  ;;  %v4978_v10 = vunpack.c.h.bf16 %v6769_v60 }
 0x24d   : > { %v2715_v33 = vrot.slane %v2714_v2, 2  ;;  %v6776_v1 = vpop.f32.mrf.mxu3  ;;  %v1988_v47 = vmul.f32 %v1898_v26, %v1508_v23  ;;  %v2084_v32 = vmul.f32 %v5189_v43, %v2026_v56  ;;  %v1658_v46 = vadd.f32 %v4977_v21, %v6633_v52 }
 0x24e   : > { %v3180_v36 = vadd.f32 %v3179_v27, %v3178_v9  ;;  %v3937_v29 = vsel %vm707_vm0, %v3845_v15, 0.0  ;;  %v4937_v9 = vunpack.c.l.bf16 %v6797_v0  ;;  %v1509_v52 = vadd.f32 %v4934_v44, %v6737_v11 }
 0x24f   : > { %v6783_v63 = vpop.eup %5469  ;;  %v2716_v39 = vmax.f32 %v2714_v2, %v2715_v33  ;;  %v2719_v6 = vsel %vm2565_vm8, %v6776_v1, -inf  ;;  %v3936_v49 = vsel %vm707_vm0, %v3844_v55, 0.0  ;;  %v2148_v62 = vadd.f32 %v2084_v32, %v1988_v47 }
 0x250   : > { %v6787_v37 = vpop.eup %5471  ;;  %v3181_v18 = vsel %vm2565_vm8, %v6783_v63, 0.0  ;;  %5473 = vrcp.f32 %v3180_v36  ;;  %v3938_v11 = vadd.f32 %v3937_v29, %v3936_v49  ;;  %v2085_v36 = vmul.f32 %v5190_v4, %v2026_v56 }
 0x251   : > { %v3182_v25 = vsel %vm2565_vm8, %v6787_v37, 0.0  ;;  %v2717_v59 = vrot.slane %v2716_v39, 1  ;;  %v2027_v15 = vperm.slane %v6778_v24, 0  ;;  %v6837_v44 = vperm.slane %v1867_v7, 0 }
 0x252   : > { %v3183_v3 = vadd.f32 %v3182_v25, %v3181_v18  ;;  %4642 = vmatmul.msk.f32.gmra.mxu2 %vm2565_vm8, %v3393_v30  ;;  %4601 = vmatmul.msk.f32.gmra.mxu3 %vm707_vm0, %v2147_v38  ;;  %v1659_v38 = vadd.f32 %v4978_v10, %v6660_v50  ;;  %v1510_v30 = vadd.f32 %v4937_v9, %v6778_v24  ;;  %v5193_v25 = vunpack.c.l.bf16 %v6826_v12 }
 0x253   : > { %v2718_v34 = vmax.f32 %v2716_v39, %v2717_v59  ;;  %v6806_v53 = vpop.f32.mrf.mxu1  ;;  %v6821_v27 = vpop.f32.mrf.mxu0  ;;  %v1989_v39 = vmul.f32 %v1898_v26, %v1509_v52  ;;  %v3939_v56 = vrot.slane %v3938_v11, 4  ;;  %v3846_v29 = vmul.f32 %v6771_v22, %v1658_v46 }
 0x254   : > { %v3184_v31 = vrot.slane %v3183_v3, 4  ;;  %v3677_v42 = vpop.f32.mrf.mxu2 }
 0x255   : > { %v2886_v16 = vsub.f32 %v6719_v58, %v2718_v34  ;;  %v2887_v20 = vsub.f32 %v6744_v14, %v2718_v34  ;;  %v6812_v48 = vpop.f32.mrf.mxu3  ;;  %v5278_v14 = vld [vmem:[%s6452_s14 + $0x30] sm:$0xff]   ;;  %v3847_v26 = vmul.f32 %v3677_v42, %v1659_v38  ;;  %v2149_v34 = vadd.f32 %v2085_v36, %v1989_v39 }
 0x256   : > { %v5474_v51 = vpop.eup %5473  ;;  %v3185_v8 = vadd.f32 %v3184_v31, %v3183_v3  ;;  %v2720_v40 = vsel %vm2565_vm8, %v6812_v48, -inf  ;;  %4492 = vmatmul.msk.bf16.gmra.mxu1 %vm707_vm0, %v5594_v45  ;;  %v4981_v18 = vunpack.c.l.bf16 %v5278_v14  ;;  %v4982_v31 = vunpack.c.h.bf16 %v5278_v14 }
 0x257   : > { %v2982_v58 = vmul.f32 1.442695, %v2886_v16  ;;  %v2984_v2 = vmul.f32 1.442695, %v2887_v20  ;;  %v2721_v60 = vmax.f32 %v2719_v6, %v2720_v40  ;;  %v3394_v43 = vmul.f32 %v5474_v51, %v6723_v41 }
 0x258   : > { %v3186_v33 = vrot.slane %v3185_v8, 2  ;;  %v1660_v10 = vadd.f32 %v4981_v18, %v6685_v35  ;;  %v1990_v16 = vmul.f32 %v6837_v44, %v1510_v30  ;;  %v2086_v20 = vmul.f32 %v5193_v25, %v2027_v15  ;;  %v5279_v25 = vld [vmem:[%s6452_s14 + $0x38] sm:$0xff]  }
 0x259   : > { %5475 = vpow2.f32 %v2982_v58  ;;  %v2722_v23 = vrot.slane %v2721_v60, 4  ;;  %v3940_v42 = vadd.f32 %v3939_v56, %v3938_v11  ;;  %v3395_v35 = vmul.f32 %v5474_v51, %v6727_v13 }
 0x25a   : > { %v3187_v21 = vadd.f32 %v3186_v33, %v3185_v8  ;;  %5477 = vpow2.f32 %v2984_v2  ;;  %4643 = vmatmul.msk.f32.gmra.mxu2 %vm2565_vm8, %v3394_v43  ;;  %4602 = vmatmul.msk.f32.gmra.mxu3 %vm707_vm0, %v2148_v62  ;;  %v3946_v22 = vsel %vm707_vm0, %v3847_v26, 0.0  ;;  %v4938_v6 = vunpack.c.h.bf16 %v6797_v0  ;;  %v4188_v26 = vld [vmem:[%s7617_s9] sm:$0xff] }
 0x25b   : > { %v2723_v41 = vmax.f32 %v2721_v60, %v2722_v23  ;;  %v6835_v50 = vpop.f32.mrf.mxu1  ;;  %v6857_v40 = vpop.f32.mrf.mxu0  ;;  %v3945_v2 = vsel %vm707_vm0, %v3846_v29, 0.0  ;;  %v5194_v13 = vunpack.c.h.bf16 %v6826_v12  ;;  %v1661_v14 = vadd.f32 %v4982_v31, %v6717_v17  ;;  %v4190_v60 = vld [vmem:[%s7617_s9 + $0x10] sm:$0xff]  ;;  %v5331_v29 = vld [vmem:[%s5981_s25 + $0xe0] sm:$0xff]  }
 0x25c   : > { %v3680_v59 = vpop.f32.mrf.mxu2  ;;  %v3188_v3 = vrot.slane %v3187_v21, 1  ;;  %v3941_v0 = vrot.slane %v3940_v42, 2  ;;  %v2150_v33 = vadd.f32 %v2086_v20, %v1990_v16  ;;  %v3947_v62 = vadd.f32 %v3946_v22, %v3945_v2  ;;  %4277 = vmatpush.msrb.mxu0 %v4190_v60 }
 0x25d   : > { %v2724_v55 = vrot.slane %v2723_v41, 2  ;;  %v6839_v4 = vpop.f32.mrf.mxu3  ;;  %v3848_v58 = vmul.f32 %v3680_v59, %v1660_v10  ;;  %v1511_v17 = vadd.f32 %v4938_v6, %v6821_v27  ;;  %v6890_v10 = vld [vmem:[%s5975_s16 + $0xe0] sm:$0xff]   ;;  %v1868_v16 = vrot.slane %v6050_v19, 4 }
 0x25e   : > { %v3189_v47 = vadd.f32 %v3188_v3, %v3187_v21  ;;  %v4189_v21 = vld [vmem:[%s7617_s9 + $0x8] sm:$0xff]  ;;  %v4985_v20 = vunpack.c.l.bf16 %v5279_v25  ;;  %v2087_v22 = vmul.f32 %v5194_v13, %v2027_v15  ;;  %v5197_v2 = vunpack.c.l.bf16 %v5331_v29 }
 0x25f   : > { %v6842_v32 = vpop.eup %5475  ;;  %v2725_v7 = vmax.f32 %v2723_v41, %v2724_v55  ;;  %v3954_v30 = vsel %vm707_vm0, %v3848_v58, 0.0  ;;  %4278 = vmatpush.msrb.mxu0 %v4189_v21  ;;  %v5595_v3 = vld [vmem:[%s5804_s13 + $0x88] sm:$0xff]   ;;  %v4986_v24 = vunpack.c.h.bf16 %v5279_v25 }
 0x260   : > { %v6848_v9 = vpop.eup %5477  ;;  %v3190_v8 = vsel %vm2565_vm8, %v6842_v32, 0.0  ;;  %5479 = vrcp.f32 %v3189_v47  ;;  %v1662_v13 = vadd.f32 %v4985_v20, %v6739_v54 }
 0x261   : > { %v3191_v52 = vsel %vm2565_vm8, %v6848_v9, 0.0  ;;  %v2726_v46 = vrot.slane %v2725_v7, 1  ;;  %4279 = vmatpush.msrb.mxu0 %v4188_v26 }
 0x262   : > { %v3192_v49 = vadd.f32 %v3191_v52, %v3190_v8  ;;  %4644 = vmatmul.msk.f32.gmra.mxu2 %vm2565_vm8, %v3395_v35  ;;  %4603 = vmatmul.msk.f32.gmra.mxu3 %vm707_vm0, %v2149_v34  ;;  %v3948_v34 = vrot.slane %v3947_v62, 4  ;;  %v3942_v8 = vadd.f32 %v3941_v0, %v3940_v42  ;;  %v1869_v42 = vrot.slane %v6050_v19, 5 }
 0x263   : > { %v2727_v51 = vmax.f32 %v2725_v7, %v2726_v46  ;;  %v6867_v43 = vpop.f32.mrf.mxu1  ;;  %v4941_v46 = vunpack.c.l.bf16 %v6890_v10  ;;  %v5198_v0 = vunpack.c.h.bf16 %v5331_v29 }
 0x264   : > { %v3193_v45 = vrot.slane %v3192_v49, 4  ;;  %v3683_v11 = vpop.f32.mrf.mxu2  ;;  %v3949_v58 = vadd.f32 %v3948_v34, %v3947_v62 }
 0x265   : > { %v2888_v36 = vsub.f32 %v6776_v1, %v2727_v51  ;;  %v2889_v12 = vsub.f32 %v6812_v48, %v2727_v51  ;;  %v3849_v38 = vmul.f32 %v3683_v11, %v1661_v14  ;;  %v6872_v23 = vpop.f32.mrf.mxu3  ;;  %v2728_v1 = vsel %vm2565_vm8, %v6839_v4, -inf }
 0x266   : > { %v5480_v39 = vpop.eup %5479  ;;  %v3194_v18 = vadd.f32 %v3193_v45, %v3192_v49  ;;  %v2729_v48 = vsel %vm2565_vm8, %v6872_v23, -inf  ;;  %4493 = vmatmul.msk.bf16.gmra.mxu1 %vm707_vm0, %v5595_v3  ;;  %v955_v49 = vpop.f32.mrf.mxu0 }
 0x267   : > { %v2986_v27 = vmul.f32 1.442695, %v2888_v36  ;;  %v2988_v41 = vmul.f32 1.442695, %v2889_v12  ;;  %v3955_v56 = vsel %vm707_vm0, %v3849_v38, 0.0  ;;  %v2730_v59 = vmax.f32 %v2728_v1, %v2729_v48 }
 0x268   : > { %v3195_v55 = vrot.slane %v3194_v18, 2  ;;  %v3956_v31 = vadd.f32 %v3955_v56, %v3954_v30  ;;  %v3396_v47 = vmul.f32 %v5480_v39, %v6783_v63  ;;  %v1991_v63 = vmul.f32 %v6837_v44, %v1511_v17  ;;  %v6921_v56 = vld [vmem:[%s6452_s14 + $0x40] sm:$0xff]  }
 0x269   : > { %5481 = vpow2.f32 %v2986_v27  ;;  %v2731_v7 = vrot.slane %v2730_v59, 4  ;;  %v3943_v44 = vrot.slane %v3942_v8, 1  ;;  %v1512_v17 = vadd.f32 %v4941_v46, %v6857_v40 }
 0x26a   : > { %v3196_v35 = vadd.f32 %v3195_v55, %v3194_v18  ;;  %5483 = vpow2.f32 %v2988_v41  ;;  %v3957_v52 = vrot.slane %v3956_v31, 4  ;;  %4645 = vmatmul.msk.f32.gmra.mxu2 %vm2565_vm8, %v3396_v47  ;;  %4604 = vmatmul.msk.f32.gmra.mxu3 %vm707_vm0, %v2150_v33  ;;  %v4942_v33 = vunpack.c.h.bf16 %v6890_v10 }
 0x26b   : > { %v2732_v6 = vmax.f32 %v2730_v59, %v2731_v7  ;;  %v6902_v60 = vpop.f32.mrf.mxu1  ;;  %v2151_v12 = vadd.f32 %v2087_v22, %v1991_v63  ;;  %v2028_v38 = vperm.slane %v6857_v40, 0  ;;  %v3950_v30 = vrot.slane %v3949_v58, 2 }
 0x26c   : > { %v3686_v51 = vpop.f32.mrf.mxu2  ;;  %v3197_v14 = vrot.slane %v3196_v35, 1  ;;  %v3958_v11 = vadd.f32 %v3957_v52, %v3956_v31  ;;  %v3397_v25 = vmul.f32 %v5480_v39, %v6787_v37  ;;  %v1900_v48 = vperm.slane %v1868_v16, 0 }
 0x26d   : > { %v2733_v45 = vrot.slane %v2732_v6, 2  ;;  %v6905_v15 = vpop.f32.mrf.mxu3  ;;  %v1663_v41 = vadd.f32 %v4986_v24, %v6773_v61  ;;  %v3944_v40 = vadd.f32 %v3943_v44, %v3942_v8  ;;  %v3850_v26 = vmul.f32 %v3686_v51, %v1662_v13 }
 0x26e   : > { %v3198_v62 = vadd.f32 %v3197_v14, %v3196_v35  ;;  %v3959_v3 = vrot.slane %v3958_v11, 2  ;;  %v1992_v55 = vmul.f32 %v1900_v48, %v1512_v17  ;;  %v2088_v37 = vmul.f32 %v5197_v2, %v2028_v38  ;;  %v6932_v35 = vpop.f32.mrf.mxu0  ;;  %v5596_v14 = vld [vmem:[%s5804_s13 + $0x90] sm:$0xff]  }
 0x26f   : > { %v6908_v36 = vpop.eup %5481  ;;  %v2734_v21 = vmax.f32 %v2732_v6, %v2733_v45  ;;  %v2089_v39 = vmul.f32 %v5198_v0, %v2028_v38  ;;  %v3951_v10 = vadd.f32 %v3950_v30, %v3949_v58  ;;  %v1513_v47 = vadd.f32 %v4942_v33, %v955_v49  ;;  %v5270_v33 = vld [vmem:[%s5975_s16 + $0xe8] sm:$0xff]  }
 0x270   : > { %v6912_v18 = vpop.eup %5483  ;;  %v3199_v1 = vsel %vm2565_vm8, %v6908_v36, 0.0  ;;  %5485 = vrcp.f32 %v3198_v62  ;;  %v4989_v29 = vunpack.c.l.bf16 %v6921_v56  ;;  %v2737_v8 = vsel %vm2565_vm8, %v6905_v15, -inf }
 0x271   : > { %v3200_v54 = vsel %vm2565_vm8, %v6912_v18, 0.0  ;;  %v2735_v27 = vrot.slane %v2734_v21, 1  ;;  %v3960_v6 = vadd.f32 %v3959_v3, %v3958_v11  ;;  %v3963_v49 = vsel %vm707_vm0, %v3850_v26, 0.0  ;;  %v6945_v11 = vld [vmem:[%s5981_s25 + $0xe8] sm:$0xff]  }
 0x272   : > { %v3201_v59 = vadd.f32 %v3200_v54, %v3199_v1  ;;  %4646 = vmatmul.msk.f32.gmra.mxu2 %vm2565_vm8, %v3397_v25  ;;  %4605 = vmatmul.msk.f32.gmra.mxu3 %vm707_vm0, %v2151_v12  ;;  %v2152_v45 = vadd.f32 %v2088_v37, %v1992_v55  ;;  %v3952_v13 = vrot.slane %v3951_v10, 1  ;;  %v1664_v62 = vadd.f32 %v4989_v29, %v6806_v53 }
 0x273   : > { %v2736_v34 = vmax.f32 %v2734_v21, %v2735_v27  ;;  %v6926_v16 = vpop.f32.mrf.mxu1  ;;  %v1993_v38 = vmul.f32 %v1900_v48, %v1513_v47  ;;  %v3961_v30 = vrot.slane %v3960_v6, 1  ;;  %v4945_v1 = vunpack.c.l.bf16 %v5270_v33 }
 0x274   : > { %v3202_v31 = vrot.slane %v3201_v59, 4  ;;  %v3689_v61 = vpop.f32.mrf.mxu2  ;;  %v5201_v54 = vunpack.c.l.bf16 %v6945_v11  ;;  %v4946_v26 = vunpack.c.h.bf16 %v5270_v33  ;;  %v4990_v55 = vunpack.c.h.bf16 %v6921_v56 }
 0x275   : > { %v2890_v20 = vsub.f32 %v6839_v4, %v2736_v34  ;;  %v2891_v7 = vsub.f32 %v6872_v23, %v2736_v34  ;;  %v3851_v52 = vmul.f32 %v3689_v61, %v1663_v41  ;;  %v6934_v22 = vpop.f32.mrf.mxu3  ;;  %v4231_v41 = vsel %vm1236_vm4, %v3944_v40, %v6752_v5 }
 0x276   : > { %v5486_v63 = vpop.eup %5485  ;;  %v3203_v46 = vadd.f32 %v3202_v31, %v3201_v59  ;;  %v2738_v4 = vsel %vm2565_vm8, %v6934_v22, -inf  ;;  %4494 = vmatmul.msk.bf16.gmra.mxu1 %vm707_vm0, %v5596_v14  ;;  %v2153_v31 = vadd.f32 %v2089_v39, %v1993_v38  ;;  %v1514_v5 = vadd.f32 %v4945_v1, %v6932_v35 }
 0x277   : > { %v2990_v58 = vmul.f32 1.442695, %v2890_v20  ;;  %v2992_v23 = vmul.f32 1.442695, %v2891_v7  ;;  %v3964_v2 = vsel %vm707_vm0, %v3851_v52, 0.0  ;;  %v2739_v51 = vmax.f32 %v2737_v8, %v2738_v4  ;;  %v960_v8 = vpop.f32.mrf.mxu0  ;;  %v6967_v52 = vld [vmem:[%s5975_s16 + $0xf0] sm:$0xff]  }
 0x278   : > { %v3204_v0 = vrot.slane %v3203_v46, 2  ;;  %v3965_v24 = vadd.f32 %v3964_v2, %v3963_v49  ;;  %v3398_v44 = vmul.f32 %v5486_v63, %v6842_v32  ;;  %v6952_v32 = vperm.slane %v1869_v42, 0  ;;  %v6975_v49 = vld [vmem:[%s6452_s14 + $0x48] sm:$0xff]  }
 0x279   : > { %5487 = vpow2.f32 %v2990_v58  ;;  %v2740_v12 = vrot.slane %v2739_v51, 4  ;;  %v3953_v42 = vadd.f32 %v3952_v13, %v3951_v10  ;;  %v3962_v20 = vadd.f32 %v3961_v30, %v3960_v6 }
 0x27a   : > { %v3205_v17 = vadd.f32 %v3204_v0, %v3203_v46  ;;  %5489 = vpow2.f32 %v2992_v23  ;;  %v3966_v21 = vrot.slane %v3965_v24, 4  ;;  %4647 = vmatmul.msk.f32.gmra.mxu2 %vm2565_vm8, %v3398_v44  ;;  %4606 = vmatmul.msk.f32.gmra.mxu3 %vm707_vm0, %v2152_v45  ;;  %v2029_v40 = vperm.slane %v6932_v35, 0 }
 0x27b   : > { %v2741_v25 = vmax.f32 %v2739_v51, %v2740_v12  ;;  %v6957_v59 = vpop.f32.mrf.mxu1  ;;  %v3399_v39 = vmul.f32 %v5486_v63, %v6848_v9  ;;  %v5202_v35 = vunpack.c.h.bf16 %v6945_v11  ;;  %v1665_v58 = vadd.f32 %v4990_v55, %v6835_v50 }
 0x27c   : > { %v3967_v27 = vadd.f32 %v3966_v21, %v3965_v24  ;;  %v3692_v53 = vpop.f32.mrf.mxu2  ;;  %v3206_v48 = vrot.slane %v3205_v17, 1  ;;  %v4949_v51 = vunpack.c.l.bf16 %v6967_v52  ;;  %v4232_v9 = vsel %vm1239_vm5, %v3953_v42, %v4231_v41 }
 0x27d   : > { %v2742_v3 = vrot.slane %v2741_v25, 2  ;;  %v3852_v37 = vmul.f32 %v3692_v53, %v1664_v62  ;;  %v6960_v34 = vpop.f32.mrf.mxu3  ;;  %v1994_v63 = vmul.f32 %v6952_v32, %v1514_v5  ;;  %v2090_v14 = vmul.f32 %v5201_v54, %v2029_v40 }
 0x27e   : > { %v3968_v47 = vrot.slane %v3967_v27, 2  ;;  %v3207_v29 = vadd.f32 %v3206_v48, %v3205_v17  ;;  %v4993_v45 = vunpack.c.l.bf16 %v6975_v49  ;;  %v1515_v24 = vadd.f32 %v4946_v26, %v960_v8  ;;  %v5597_v48 = vld [vmem:[%s5804_s13 + $0x98] sm:$0xff]  }
 0x27f   : > { %v6962_v61 = vpop.eup %5487  ;;  %v2743_v7 = vmax.f32 %v2741_v25, %v2742_v3  ;;  %v4233_v13 = vsel %vm1242_vm6, %v3962_v20, %v4232_v9  ;;  %v2746_v17 = vsel %vm2565_vm8, %v6960_v34, -inf  ;;  %v3972_v25 = vsel %vm707_vm0, %v3852_v37, 0.0  ;;  %v7005_v42 = vpop.f32.mrf.mxu0 }
 0x280   : > { %v6969_v56 = vpop.eup %5489  ;;  %v3208_v46 = vsel %vm2565_vm8, %v6962_v61, 0.0  ;;  %v3969_v10 = vadd.f32 %v3968_v47, %v3967_v27  ;;  %5491 = vrcp.f32 %v3207_v29  ;;  %v2154_v26 = vadd.f32 %v2090_v14, %v1994_v63  ;;  %v7008_v29 = vld [vmem:[%s5981_s25 + $0xf0] sm:$0xff]  }
 0x281   : > { %v3209_v6 = vsel %vm2565_vm8, %v6969_v56, 0.0  ;;  %v2744_v4 = vrot.slane %v2743_v7, 1  ;;  %v1870_v20 = vrot.slane %v6050_v19, 6  ;;  %v1666_v5 = vadd.f32 %v4993_v45, %v6867_v43  ;;  %v7033_v45 = vld [vmem:[%s5981_s25 + $0xf8] sm:$0xff]  }
 0x282   : > { %v3210_v23 = vadd.f32 %v3209_v6, %v3208_v46  ;;  %v3970_v2 = vrot.slane %v3969_v10, 1  ;;  %4648 = vmatmul.msk.f32.gmra.mxu2 %vm2565_vm8, %v3399_v39  ;;  %4607 = vmatmul.msk.f32.gmra.mxu3 %vm707_vm0, %v2153_v31  ;;  %v1516_v46 = vadd.f32 %v4949_v51, %v7005_v42  ;;  %v5205_v6 = vunpack.c.l.bf16 %v7008_v29  ;;  %v7027_v51 = vld [vmem:[%s5975_s16 + $0xf8] sm:$0xff]   ;;  %s434_s16 = sand.u32 1, %s5665_s18  }
 0x283   : > { %v2745_v0 = vmax.f32 %v2743_v7, %v2744_v4  ;;  %v6988_v11 = vpop.f32.mrf.mxu1  ;;  %v2091_v7 = vmul.f32 %v5202_v35, %v2029_v40  ;;  %v2030_v4 = vperm.slane %v7005_v42, 0  ;;  %v4994_v14 = vunpack.c.h.bf16 %v6975_v49  ;;  %s4415_s25 = sshll.u32 %s434_s16, 5  ;;  %s4298_s24 = scalar_lea.sflag [#allocation3], %s434_s16 }
 0x284   : > { %v3211_v33 = vrot.slane %v3210_v23, 4  ;;  %v3695_v44 = vpop.f32.mrf.mxu2  ;;  %v3971_v50 = vadd.f32 %v3970_v2, %v3969_v10  ;;  %v7022_v2 = vperm.slane %v1870_v20, 0  ;;  %s7350_s29 = scalar_lea.vmem [#allocation2], %s4415_s25 }
 0x285   : > { %v2892_v62 = vsub.f32 %v6905_v15, %v2745_v0  ;;  %v2893_v12 = vsub.f32 %v6934_v22, %v2745_v0  ;;  %v3853_v38 = vmul.f32 %v3695_v44, %v1665_v58  ;;  %v6994_v21 = vpop.f32.mrf.mxu3  ;;  %s4310_s25 = sshll.u32 %s7350_s29, 4  ;;  %s4311_s25 = int_to_ptr.vmem [resolvable:$true] %s4310_s25 }
 0x286   : > { %v5492_v30 = vpop.eup %5491  ;;  %v3212_v1 = vadd.f32 %v3211_v33, %v3210_v23  ;;  %v2747_v54 = vsel %vm2565_vm8, %v6994_v21, -inf  ;;  %v4234_v27 = vsel %vm1245_vm7, %v3971_v50, %v4233_v13  ;;  %4495 = vmatmul.msk.bf16.gmra.mxu1 %vm707_vm0, %v5597_v48  ;;  %v2092_v13 = vmul.f32 %v5205_v6, %v2030_v4 }
 0x287   : > { %v2994_v53 = vmul.f32 1.442695, %v2892_v62  ;;  %v2996_v15 = vmul.f32 1.442695, %v2893_v12  ;;  %v3973_v22 = vsel %vm707_vm0, %v3853_v38, 0.0  ;;  %v2748_v41 = vmax.f32 %v2746_v17, %v2747_v54  ;;  %4679 = vmatmul.msk.f32.vlgmr.msrb.gmra.mxu0 %vm707_vm0, %v4234_v27  ;;  %v7044_v12 = vld [vmem:[%s6452_s14 + $0x50] sm:$0xff]  }
 0x288   : > { %v3213_v3 = vrot.slane %v3212_v1, 2  ;;  %v3974_v55 = vadd.f32 %v3973_v22, %v3972_v25  ;;  %v3400_v37 = vmul.f32 %v5492_v30, %v6908_v36  ;;  %v1995_v36 = vmul.f32 %v6952_v32, %v1515_v24 }
 0x289   : > { %5493 = vpow2.f32 %v2994_v53  ;;  %v2749_v31 = vrot.slane %v2748_v41, 4  ;;  %v1996_v24 = vmul.f32 %v7022_v2, %v1516_v46  ;;  %v3401_v44 = vmul.f32 %v5492_v30, %v6912_v18  ;;  %v965_v53 = vpop.f32.mrf.mxu0 }
 0x28a   : > { %v3214_v47 = vadd.f32 %v3213_v3, %v3212_v1  ;;  %5495 = vpow2.f32 %v2996_v15  ;;  %4649 = vmatmul.msk.f32.gmra.mxu2 %vm2565_vm8, %v3400_v37  ;;  %4608 = vmatmul.msk.f32.gmra.mxu3 %vm707_vm0, %v2154_v26  ;;  %v2155_v9 = vadd.f32 %v2091_v7, %v1995_v36  ;;  %v3975_v62 = vrot.slane %v3974_v55, 4 }
 0x28b   : > { %v2750_v8 = vmax.f32 %v2748_v41, %v2749_v31  ;;  %v7016_v39 = vpop.f32.mrf.mxu1  ;;  %v4953_v17 = vunpack.c.l.bf16 %v7027_v51  ;;  %v5209_v18 = vunpack.c.l.bf16 %v7033_v45  ;;  %v1871_v30 = vrot.slane %v6050_v19, 7 }
 0x28c   : > { %v3215_v10 = vrot.slane %v3214_v47, 1  ;;  %v4950_v25 = vunpack.c.h.bf16 %v6967_v52  ;;  %v5206_v27 = vunpack.c.h.bf16 %v7008_v29  ;;  %v1667_v15 = vadd.f32 %v4994_v14, %v6902_v60 }
 0x28d   : > { %v2751_v43 = vrot.slane %v2750_v8, 2  ;;  %v3698_v58 = vpop.f32.mrf.mxu2  ;;  %v7020_v23 = vpop.f32.mrf.mxu3  ;;  %v4997_v22 = vunpack.c.l.bf16 %v7044_v12  ;;  %v2156_v48 = vadd.f32 %v2092_v13, %v1996_v24  ;;  %v3976_v3 = vadd.f32 %v3975_v62, %v3974_v55 }
 0x28e   : > { %v3854_v40 = vmul.f32 %v3698_v58, %v1666_v5  ;;  %v3216_v35 = vadd.f32 %v3215_v10, %v3214_v47  ;;  %v2755_v29 = vsel %vm2565_vm8, %v7020_v23, -inf  ;;  %v7075_v14 = vperm.slane %v1871_v30, 0 }
 0x28f   : > { %v7024_v32 = vpop.eup %5493  ;;  %v2752_v63 = vmax.f32 %v2750_v8, %v2751_v43  ;;  %v1517_v8 = vadd.f32 %v4950_v25, %v965_v53  ;;  %v3977_v6 = vrot.slane %v3976_v3, 2  ;;  %v2093_v24 = vmul.f32 %v5206_v27, %v2030_v4 }
 0x290   : > { %v7030_v0 = vpop.eup %5495  ;;  %v3217_v33 = vsel %vm2565_vm8, %v7024_v32, 0.0  ;;  %5497 = vrcp.f32 %v3216_v35  ;;  %v3981_v46 = vsel %vm707_vm0, %v3854_v40, 0.0  ;;  %v2031_v35 = vperm.slane %v6333_v57, 0 }
 0x291   : > { %v3218_v50 = vsel %vm2565_vm8, %v7030_v0, 0.0  ;;  %v2753_v49 = vrot.slane %v2752_v63, 1  ;;  %v3978_v62 = vadd.f32 %v3977_v6, %v3976_v3  ;;  %v4954_v30 = vunpack.c.h.bf16 %v7027_v51 }
 0x292   : > { %v3219_v38 = vadd.f32 %v3218_v50, %v3217_v33  ;;  %4650 = vmatmul.msk.f32.gmra.mxu2 %vm2565_vm8, %v3401_v44  ;;  %4609 = vmatmul.msk.f32.gmra.mxu3 %vm707_vm0, %v2155_v9  ;;  %v1997_v44 = vmul.f32 %v7022_v2, %v1517_v8  ;;  %v4998_v53 = vunpack.c.h.bf16 %v7044_v12  ;;  %v5210_v12 = vunpack.c.h.bf16 %v7033_v45 }
 0x293   : > { %v2754_v1 = vmax.f32 %v2752_v63, %v2753_v49  ;;  %v7055_v41 = vpop.f32.mrf.mxu1  ;;  %v1668_v63 = vadd.f32 %v4997_v22, %v6926_v16  ;;  %v3979_v51 = vrot.slane %v3978_v62, 1 }
 0x294   : > { %v3220_v54 = vrot.slane %v3219_v38, 4 }
 0x295   : > { %v2894_v26 = vsub.f32 %v6960_v34, %v2754_v1  ;;  %v2895_v19 = vsub.f32 %v6994_v21, %v2754_v1  ;;  %v3701_v37 = vpop.f32.mrf.mxu2  ;;  %v7059_v31 = vpop.f32.mrf.mxu3  ;;  %v5598_v34 = vld [vmem:[%s5804_s13 + $0xa0] sm:$0xff]  }
 0x296   : > { %v5498_v52 = vpop.eup %5497  ;;  %v3221_v47 = vadd.f32 %v3220_v54, %v3219_v38  ;;  %v3855_v60 = vmul.f32 %v3701_v37, %v1667_v15  ;;  %v2756_v20 = vsel %vm2565_vm8, %v7059_v31, -inf  ;;  %4496 = vmatmul.msk.bf16.gmra.mxu1 %vm707_vm0, %v5598_v34  ;;  %v7099_v37 = vld [vmem:[%s6452_s14 + $0x58] sm:$0xff]  }
 0x297   : > { %v2998_v5 = vmul.f32 1.442695, %v2894_v26  ;;  %v3000_v7 = vmul.f32 1.442695, %v2895_v19  ;;  %v2757_v36 = vmax.f32 %v2755_v29, %v2756_v20  ;;  %v3402_v55 = vmul.f32 %v5498_v52, %v6962_v61 }
 0x298   : > { %v3222_v21 = vrot.slane %v3221_v47, 2  ;;  %v3982_v10 = vsel %vm707_vm0, %v3855_v60, 0.0  ;;  %v1518_v61 = vadd.f32 %v4953_v17, %v6333_v57  ;;  %v2094_v17 = vmul.f32 %v5209_v18, %v2031_v35 }
 0x299   : > { %5499 = vpow2.f32 %v2998_v5  ;;  %v3983_v43 = vadd.f32 %v3982_v10, %v3981_v46  ;;  %v2758_v58 = vrot.slane %v2757_v36, 4  ;;  %v3403_v18 = vmul.f32 %v5498_v52, %v6969_v56 }
 0x29a   : > { %v3223_v9 = vadd.f32 %v3222_v21, %v3221_v47  ;;  %5501 = vpow2.f32 %v3000_v7  ;;  %4651 = vmatmul.msk.f32.gmra.mxu2 %vm2565_vm8, %v3402_v55  ;;  %4610 = vmatmul.msk.f32.gmra.mxu3 %vm707_vm0, %v2156_v48  ;;  %v1998_v2 = vmul.f32 %v7075_v14, %v1518_v61  ;;  %v2157_v48 = vadd.f32 %v2093_v24, %v1997_v44  ;;  %v5599_v61 = vld [vmem:[%s5804_s13 + $0xa8] sm:$0xff]  }
 0x29b   : > { %v3984_v40 = vrot.slane %v3983_v43, 4  ;;  %v2759_v33 = vmax.f32 %v2757_v36, %v2758_v58  ;;  %v7080_v13 = vpop.f32.mrf.mxu1  ;;  %v1519_v29 = vadd.f32 %v4954_v30, %v6355_v28  ;;  %v1669_v20 = vadd.f32 %v4998_v53, %v6957_v59 }
 0x29c   : > { %v3224_v50 = vrot.slane %v3223_v9, 1  ;;  %v5001_v5 = vunpack.c.l.bf16 %v7099_v37  ;;  %v2158_v7 = vadd.f32 %v2094_v17, %v1998_v2  ;;  %v3980_v55 = vadd.f32 %v3979_v51, %v3978_v62 }
 0x29d   : > { %v3985_v16 = vadd.f32 %v3984_v40, %v3983_v43  ;;  %v2760_v49 = vrot.slane %v2759_v33, 2  ;;  %v3704_v38 = vpop.f32.mrf.mxu2  ;;  %v7082_v1 = vpop.f32.mrf.mxu3  ;;  %v5002_v51 = vunpack.c.h.bf16 %v7099_v37 }
 0x29e   : > { %v3856_v25 = vmul.f32 %v3704_v38, %v1668_v63  ;;  %v3225_v42 = vadd.f32 %v3224_v50, %v3223_v9  ;;  %v2764_v59 = vsel %vm2565_vm8, %v7082_v1, -inf  ;;  %v1999_v38 = vmul.f32 %v7075_v14, %v1519_v29 }
 0x29f   : > { %v7087_v4 = vpop.eup %5499  ;;  %v3986_v54 = vrot.slane %v3985_v16, 2  ;;  %v2761_v27 = vmax.f32 %v2759_v33, %v2760_v49  ;;  %v2095_v49 = vmul.f32 %v5210_v12, %v2031_v35 }
 0x2a0   : > { %v7091_v15 = vpop.eup %5501  ;;  %v3226_v22 = vsel %vm2565_vm8, %v7087_v4, 0.0  ;;  %5503 = vrcp.f32 %v3225_v42  ;;  %v3990_v40 = vsel %vm707_vm0, %v3856_v25, 0.0 }
 0x2a1   : > { %v3227_v3 = vsel %vm2565_vm8, %v7091_v15, 0.0  ;;  %v3987_v26 = vadd.f32 %v3986_v54, %v3985_v16  ;;  %v2762_v19 = vrot.slane %v2761_v27, 1  ;;  %v1670_v16 = vadd.f32 %v5001_v5, %v6988_v11 }
 0x2a2   : > { %v3228_v47 = vadd.f32 %v3227_v3, %v3226_v22  ;;  %4652 = vmatmul.msk.f32.gmra.mxu2 %vm2565_vm8, %v3403_v18  ;;  %4611 = vmatmul.msk.f32.gmra.mxu3 %vm707_vm0, %v2157_v48  ;;  %v2159_v48 = vadd.f32 %v2095_v49, %v1999_v38 }
 0x2a3   : > { %v3988_v60 = vrot.slane %v3987_v26, 1  ;;  %v2763_v56 = vmax.f32 %v2761_v27, %v2762_v19  ;;  %v7107_v36 = vpop.f32.mrf.mxu1 }
 0x2a4   : > { %v3229_v52 = vrot.slane %v3228_v47, 4 }
 0x2a5   : > { %v3989_v34 = vadd.f32 %v3988_v60, %v3987_v26  ;;  %v2896_v21 = vsub.f32 %v7020_v23, %v2763_v56  ;;  %v2897_v8 = vsub.f32 %v7059_v31, %v2763_v56  ;;  %v3707_v45 = vpop.f32.mrf.mxu2  ;;  %v7111_v46 = vpop.f32.mrf.mxu3 }
 0x2a6   : > { %v5504_v28 = vpop.eup %5503  ;;  %v3230_v10 = vadd.f32 %v3229_v52, %v3228_v47  ;;  %v3857_v6 = vmul.f32 %v3707_v45, %v1669_v20  ;;  %v2765_v43 = vsel %vm2565_vm8, %v7111_v46, -inf  ;;  %4497 = vmatmul.msk.bf16.gmra.mxu1 %vm707_vm0, %v5599_v61  ;;  %v1671_v52 = vadd.f32 %v5002_v51, %v7016_v39 }
 0x2a7   : > { %v7118_v58 = vsel %vm1227_vm1, %v3989_v34, %v3980_v55  ;;  %v3002_v9 = vmul.f32 1.442695, %v2896_v21  ;;  %v3004_v63 = vmul.f32 1.442695, %v2897_v8  ;;  %v2766_v23 = vmax.f32 %v2764_v59, %v2765_v43  ;;  %v5600_v43 = vld [vmem:[%s5804_s13 + $0xb0] sm:$0xff]  }
 0x2a8   : > { %v3231_v31 = vrot.slane %v3230_v10, 2  ;;  %v3991_v33 = vsel %vm707_vm0, %v3857_v6, 0.0  ;;  %v3404_v24 = vmul.f32 %v5504_v28, %v7024_v32  ;;  %v3405_v3 = vmul.f32 %v5504_v28, %v7030_v0 }
 0x2a9   : > { %5505 = vpow2.f32 %v3002_v9  ;;  %v3992_v44 = vadd.f32 %v3991_v33, %v3990_v40  ;;  %v2767_v50 = vrot.slane %v2766_v23, 4 }
 0x2aa   : > { %v3232_v62 = vadd.f32 %v3231_v31, %v3230_v10  ;;  %5507 = vpow2.f32 %v3004_v63  ;;  %4653 = vmatmul.msk.f32.gmra.mxu2 %vm2565_vm8, %v3404_v24  ;;  %4612 = vmatmul.msk.f32.gmra.mxu3 %vm707_vm0, %v2158_v7 }
 0x2ab   : > { %v3993_v17 = vrot.slane %v3992_v44, 4  ;;  %v2768_v30 = vmax.f32 %v2766_v23, %v2767_v50  ;;  %v7131_v32 = vpop.f32.mrf.mxu1 }
 0x2ac   : > { %v3233_v25 = vrot.slane %v3232_v62, 1 }
 0x2ad   : > { %v3994_v42 = vadd.f32 %v3993_v17, %v3992_v44  ;;  %v2769_v2 = vrot.slane %v2768_v30, 2  ;;  %v3710_v54 = vpop.f32.mrf.mxu2  ;;  %v7133_v27 = vpop.f32.mrf.mxu3 }
 0x2ae   : > { %v3858_v11 = vmul.f32 %v3710_v54, %v1670_v16  ;;  %v3234_v53 = vadd.f32 %v3233_v25, %v3232_v62  ;;  %v2773_v8 = vsel %vm2565_vm8, %v7133_v27, -inf }
 0x2af   : > { %v7135_v22 = vpop.eup %5505  ;;  %v3995_v18 = vrot.slane %v3994_v42, 2  ;;  %v2770_v57 = vmax.f32 %v2768_v30, %v2769_v2 }
 0x2b0   : > { %v7137_v35 = vpop.eup %5507  ;;  %v3235_v14 = vsel %vm2565_vm8, %v7135_v22, 0.0  ;;  %5509 = vrcp.f32 %v3234_v53 }
 0x2b1   : > { %v3236_v26 = vsel %vm2565_vm8, %v7137_v35, 0.0  ;;  %v3996_v19 = vadd.f32 %v3995_v18, %v3994_v42  ;;  %v2771_v47 = vrot.slane %v2770_v57, 1 }
 0x2b2   : > { %v3237_v12 = vadd.f32 %v3236_v26, %v3235_v14  ;;  %4654 = vmatmul.msk.f32.gmra.mxu2 %vm2565_vm8, %v3405_v3  ;;  %4613 = vmatmul.msk.f32.gmra.mxu3 %vm707_vm0, %v2159_v48 }
 0x2b3   : > { %v3997_v29 = vrot.slane %v3996_v19, 1  ;;  %v2772_v60 = vmax.f32 %v2770_v57, %v2771_v47  ;;  %v7148_v37 = vpop.f32.mrf.mxu1 }
 0x2b4   : > { %v3238_v56 = vrot.slane %v3237_v12, 4 }
 0x2b5   : > { %v3998_v0 = vadd.f32 %v3997_v29, %v3996_v19  ;;  %v2898_v20 = vsub.f32 %v7082_v1, %v2772_v60  ;;  %v2899_v5 = vsub.f32 %v7111_v46, %v2772_v60  ;;  %v3713_v7 = vpop.f32.mrf.mxu2  ;;  %v2514_v55 = vpop.f32.mrf.mxu3  ;;  %v3999_v46 = vsel %vm707_vm0, %v3858_v11, 0.0 }
 0x2b6   : > { %v5510_v34 = vpop.eup %5509  ;;  %v3239_v21 = vadd.f32 %v3238_v56, %v3237_v12  ;;  %v3859_v45 = vmul.f32 %v3713_v7, %v1671_v52  ;;  %v2774_v28 = vsel %vm2565_vm8, %v2514_v55, -inf  ;;  %4498 = vmatmul.msk.bf16.gmra.mxu1 %vm707_vm0, %v5600_v43 }
 0x2b7   : > { %v3006_v10 = vmul.f32 1.442695, %v2898_v20  ;;  %v3008_v39 = vmul.f32 1.442695, %v2899_v5  ;;  %v2775_v59 = vmax.f32 %v2773_v8, %v2774_v28  ;;  %v3406_v6 = vmul.f32 %v5510_v34, %v7087_v4  ;;  %v5601_v5 = vld [vmem:[%s5804_s13 + $0xb8] sm:$0xff]  }
 0x2b8   : > { %v3240_v1 = vrot.slane %v3239_v21, 2  ;;  %v4000_v9 = vsel %vm707_vm0, %v3859_v45, 0.0  ;;  %v4236_v63 = vsel %vm1230_vm2, %v3998_v0, %v7118_v58  ;;  %v3407_v42 = vmul.f32 %v5510_v34, %v7091_v15 }
 0x2b9   : > { %5511 = vpow2.f32 %v3006_v10  ;;  %v4001_v23 = vadd.f32 %v4000_v9, %v3999_v46  ;;  %v2776_v61 = vrot.slane %v2775_v59, 4 }
 0x2ba   : > { %v3241_v31 = vadd.f32 %v3240_v1, %v3239_v21  ;;  %5513 = vpow2.f32 %v3008_v39  ;;  %4655 = vmatmul.msk.f32.gmra.mxu2 %vm2565_vm8, %v3406_v6  ;;  %v5284_v6 = vld [vmem:[%s6452_s14 + $0x60] sm:$0xff]  }
 0x2bb   : > { %v4002_v40 = vrot.slane %v4001_v23, 4  ;;  %v2777_v4 = vmax.f32 %v2775_v59, %v2776_v61  ;;  %v7163_v24 = vpop.f32.mrf.mxu1  ;;  %v5005_v61 = vunpack.c.l.bf16 %v5284_v6 }
 0x2bc   : > { %v3242_v33 = vrot.slane %v3241_v31, 1 }
 0x2bd   : > { %v4003_v44 = vadd.f32 %v4002_v40, %v4001_v23  ;;  %v2778_v50 = vrot.slane %v2777_v4, 2  ;;  %v7165_v62 = vpop.f32.mrf.mxu2  ;;  %v7167_v16 = vpop.f32.mrf.mxu3 }
 0x2be   : > { %v3243_v49 = vadd.f32 %v3242_v33, %v3241_v31  ;;  %v2782_v29 = vsel %vm2565_vm8, %v7167_v16, -inf  ;;  %v5006_v33 = vunpack.c.h.bf16 %v5284_v6 }
 0x2bf   : > { %v7169_v58 = vpop.eup %5511  ;;  %v4004_v38 = vrot.slane %v4003_v44, 2  ;;  %v2779_v17 = vmax.f32 %v2777_v4, %v2778_v50  ;;  %v5285_v50 = vld [vmem:[%s6452_s14 + $0x68] sm:$0xff]  }
 0x2c0   : > { %v7171_v30 = vpop.eup %5513  ;;  %v3244_v25 = vsel %vm2565_vm8, %v7169_v58, 0.0  ;;  %5515 = vrcp.f32 %v3243_v49 }
 0x2c1   : > { %v3245_v2 = vsel %vm2565_vm8, %v7171_v30, 0.0  ;;  %v4005_v54 = vadd.f32 %v4004_v38, %v4003_v44  ;;  %v2780_v11 = vrot.slane %v2779_v17, 1 }
 0x2c2   : > { %v3246_v53 = vadd.f32 %v3245_v2, %v3244_v25  ;;  %4656 = vmatmul.msk.f32.gmra.mxu2 %vm2565_vm8, %v3407_v42  ;;  %v1672_v42 = vadd.f32 %v5005_v61, %v7055_v41  ;;  %v5010_v41 = vunpack.c.h.bf16 %v5285_v50 }
 0x2c3   : > { %v4006_v48 = vrot.slane %v4005_v54, 1  ;;  %v2781_v18 = vmax.f32 %v2779_v17, %v2780_v11  ;;  %v7179_v14 = vpop.f32.mrf.mxu1 }
 0x2c4   : > { %v3247_v57 = vrot.slane %v3246_v53, 4 }
 0x2c5   : > { %v4007_v51 = vadd.f32 %v4006_v48, %v4005_v54  ;;  %v2900_v3 = vsub.f32 %v7133_v27, %v2781_v18  ;;  %v2901_v26 = vsub.f32 %v2514_v55, %v2781_v18  ;;  %v7182_v15 = vpop.f32.mrf.mxu2  ;;  %v2520_v19 = vpop.f32.mrf.mxu3 }
 0x2c6   : > { %v5516_v47 = vpop.eup %5515  ;;  %v3248_v12 = vadd.f32 %v3247_v57, %v3246_v53  ;;  %v2783_v60 = vsel %vm2565_vm8, %v2520_v19, -inf  ;;  %4499 = vmatmul.msk.bf16.gmra.mxu1 %vm707_vm0, %v5601_v5  ;;  %v5602_v57 = vld [vmem:[%s5804_s13 + $0xc0] sm:$0xff]  }
 0x2c7   : > { %v3010_v56 = vmul.f32 1.442695, %v2900_v3  ;;  %v3012_v52 = vmul.f32 1.442695, %v2901_v26  ;;  %v2784_v0 = vmax.f32 %v2782_v29, %v2783_v60  ;;  %v3408_v20 = vmul.f32 %v5516_v47, %v7135_v22 }
 0x2c8   : > { %v3249_v27 = vrot.slane %v3248_v12, 2  ;;  %v7191_v7 = vsel %vm1233_vm3, %v4007_v51, %v4236_v63  ;;  %v3409_v9 = vmul.f32 %v5516_v47, %v7137_v35  ;;  %v1673_v3 = vadd.f32 %v5006_v33, %v7080_v13 }
 0x2c9   : > { %5517 = vpow2.f32 %v3010_v56  ;;  %v2785_v55 = vrot.slane %v2784_v0, 4  ;;  %v5009_v26 = vunpack.c.l.bf16 %v5285_v50  ;;  %v3860_v60 = vmul.f32 %v7165_v62, %v1672_v42 }
 0x2ca   : > { %v3250_v34 = vadd.f32 %v3249_v27, %v3248_v12  ;;  %5519 = vpow2.f32 %v3012_v52  ;;  %4657 = vmatmul.msk.f32.gmra.mxu2 %vm2565_vm8, %v3408_v20  ;;  %v3861_v29 = vmul.f32 %v7182_v15, %v1673_v3  ;;  %v1675_v13 = vadd.f32 %v5010_v41, %v7131_v32  ;;  %v5287_v3 = vld [vmem:[%s6452_s14 + $0x78] sm:$0xff]  }
 0x2cb   : > { %v2786_v21 = vmax.f32 %v2784_v0, %v2785_v55  ;;  %v7194_v45 = vpop.f32.mrf.mxu1  ;;  %v1674_v0 = vadd.f32 %v5009_v26, %v7107_v36  ;;  %v4008_v62 = vsel %vm707_vm0, %v3860_v60, 0.0  ;;  %v5017_v60 = vunpack.c.l.bf16 %v5287_v3 }
 0x2cc   : > { %v3251_v8 = vrot.slane %v3250_v34, 1  ;;  %v4009_v15 = vsel %vm707_vm0, %v3861_v29, 0.0 }
 0x2cd   : > { %v2787_v28 = vrot.slane %v2786_v21, 2  ;;  %v7196_v22 = vpop.f32.mrf.mxu2  ;;  %v7198_v10 = vpop.f32.mrf.mxu3 }
 0x2ce   : > { %v3252_v39 = vadd.f32 %v3251_v8, %v3250_v34  ;;  %v2791_v54 = vsel %vm2565_vm8, %v7198_v10, -inf }
 0x2cf   : > { %v7200_v59 = vpop.eup %5517  ;;  %v2788_v43 = vmax.f32 %v2786_v21, %v2787_v28 }
 0x2d0   : > { %v7203_v1 = vpop.eup %5519  ;;  %v3253_v46 = vsel %vm2565_vm8, %v7200_v59, 0.0  ;;  %5521 = vrcp.f32 %v3252_v39 }
 0x2d1   : > { %v3254_v63 = vsel %vm2565_vm8, %v7203_v1, 0.0  ;;  %v2789_v23 = vrot.slane %v2788_v43, 1 }
 0x2d2   : > { %v3255_v31 = vadd.f32 %v3254_v63, %v3253_v46  ;;  %4658 = vmatmul.msk.f32.gmra.mxu2 %vm2565_vm8, %v3409_v9  ;;  %v4010_v9 = vadd.f32 %v4009_v15, %v4008_v62  ;;  %v1678_v62 = vadd.f32 %v5017_v60, %v7179_v14  ;;  %v7286_v14 = vld [vmem:[%s6452_s14 + $0x80] sm:$0xff]  }
 0x2d3   : > { %v2790_v40 = vmax.f32 %v2788_v43, %v2789_v23  ;;  %v7211_v44 = vpop.f32.mrf.mxu1  ;;  %v3862_v43 = vmul.f32 %v7196_v22, %v1674_v0 }
 0x2d4   : > { %v3256_v4 = vrot.slane %v3255_v31, 4 }
 0x2d5   : > { %v2902_v49 = vsub.f32 %v7167_v16, %v2790_v40  ;;  %v2903_v38 = vsub.f32 %v2520_v19, %v2790_v40  ;;  %v3725_v35 = vpop.f32.mrf.mxu2  ;;  %v7215_v17 = vpop.f32.mrf.mxu3  ;;  %v5286_v19 = vld [vmem:[%s6452_s14 + $0x70] sm:$0xff]  }
 0x2d6   : > { %v5522_v25 = vpop.eup %5521  ;;  %v3257_v2 = vadd.f32 %v3256_v4, %v3255_v31  ;;  %v2792_v11 = vsel %vm2565_vm8, %v7215_v17, -inf  ;;  %4500 = vmatmul.msk.bf16.gmra.mxu1 %vm707_vm0, %v5602_v57  ;;  %v3863_v34 = vmul.f32 %v3725_v35, %v1675_v13  ;;  %v5014_v36 = vunpack.c.h.bf16 %v5286_v19  ;;  %v5603_v57 = vld [vmem:[%s5804_s13 + $0xc8] sm:$0xff]  }
 0x2d7   : > { %v3014_v53 = vmul.f32 1.442695, %v2902_v49  ;;  %v3016_v48 = vmul.f32 1.442695, %v2903_v38  ;;  %v2793_v18 = vmax.f32 %v2791_v54, %v2792_v11  ;;  %v3410_v16 = vmul.f32 %v5522_v25, %v7169_v58 }
 0x2d8   : > { %v3258_v51 = vrot.slane %v3257_v2, 2  ;;  %v5013_v58 = vunpack.c.l.bf16 %v5286_v19  ;;  %v3411_v46 = vmul.f32 %v5522_v25, %v7171_v30  ;;  %v4017_v4 = vsel %vm707_vm0, %v3862_v43, 0.0 }
 0x2d9   : > { %5523 = vpow2.f32 %v3014_v53  ;;  %v2794_v47 = vrot.slane %v2793_v18, 4  ;;  %v1677_v33 = vadd.f32 %v5014_v36, %v7163_v24  ;;  %v4011_v30 = vrot.slane %v4010_v9, 4 }
 0x2da   : > { %v3259_v12 = vadd.f32 %v3258_v51, %v3257_v2  ;;  %5525 = vpow2.f32 %v3016_v48  ;;  %4659 = vmatmul.msk.f32.gmra.mxu2 %vm2565_vm8, %v3410_v16  ;;  %v1676_v28 = vadd.f32 %v5013_v58, %v7148_v37  ;;  %v4018_v37 = vsel %vm707_vm0, %v3863_v34, 0.0 }
 0x2db   : > { %v2795_v56 = vmax.f32 %v2793_v18, %v2794_v47  ;;  %v7232_v20 = vpop.f32.mrf.mxu1  ;;  %v4019_v49 = vadd.f32 %v4018_v37, %v4017_v4  ;;  %v4012_v29 = vadd.f32 %v4011_v30, %v4010_v9 }
 0x2dc   : > { %v3260_v52 = vrot.slane %v3259_v12, 1 }
 0x2dd   : > { %v2796_v5 = vrot.slane %v2795_v56, 2  ;;  %v3728_v27 = vpop.f32.mrf.mxu2  ;;  %v7234_v55 = vpop.f32.mrf.mxu3  ;;  %v4020_v41 = vrot.slane %v4019_v49, 4 }
 0x2de   : > { %v3261_v21 = vadd.f32 %v3260_v52, %v3259_v12  ;;  %v3864_v22 = vmul.f32 %v3728_v27, %v1676_v28  ;;  %v2800_v11 = vsel %vm2565_vm8, %v7234_v55, -inf }
 0x2df   : > { %v7237_v8 = vpop.eup %5523  ;;  %v2797_v39 = vmax.f32 %v2795_v56, %v2796_v5  ;;  %v4021_v0 = vadd.f32 %v4020_v41, %v4019_v49 }
 0x2e0   : > { %v7241_v6 = vpop.eup %5525  ;;  %v3262_v32 = vsel %vm2565_vm8, %v7237_v8, 0.0  ;;  %5527 = vrcp.f32 %v3261_v21  ;;  %v4026_v51 = vsel %vm707_vm0, %v3864_v22, 0.0  ;;  %v4013_v21 = vrot.slane %v4012_v29, 2 }
 0x2e1   : > { %v3263_v63 = vsel %vm2565_vm8, %v7241_v6, 0.0  ;;  %v2798_v23 = vrot.slane %v2797_v39, 1  ;;  %v4022_v9 = vrot.slane %v4021_v0, 2 }
 0x2e2   : > { %v3264_v61 = vadd.f32 %v3263_v63, %v3262_v32  ;;  %4660 = vmatmul.msk.f32.gmra.mxu2 %vm2565_vm8, %v3411_v46 }
 0x2e3   : > { %v2799_v31 = vmax.f32 %v2797_v39, %v2798_v23  ;;  %v7253_v50 = vpop.f32.mrf.mxu1  ;;  %v5018_v39 = vunpack.c.h.bf16 %v5287_v3 }
 0x2e4   : > { %v3265_v40 = vrot.slane %v3264_v61, 4 }
 0x2e5   : > { %v2904_v38 = vsub.f32 %v7198_v10, %v2799_v31  ;;  %v2905_v35 = vsub.f32 %v7215_v17, %v2799_v31  ;;  %v3731_v25 = vpop.f32.mrf.mxu2  ;;  %v7257_v42 = vpop.f32.mrf.mxu3  ;;  %v1679_v31 = vadd.f32 %v5018_v39, %v7194_v45 }
 0x2e6   : > { %v5528_v2 = vpop.eup %5527  ;;  %v3266_v54 = vadd.f32 %v3265_v40, %v3264_v61  ;;  %v3865_v24 = vmul.f32 %v3731_v25, %v1677_v33  ;;  %v2801_v53 = vsel %vm2565_vm8, %v7257_v42, -inf  ;;  %4501 = vmatmul.msk.bf16.gmra.mxu1 %vm707_vm0, %v5603_v57  ;;  %v4014_v40 = vadd.f32 %v4013_v21, %v4012_v29 }
 0x2e7   : > { %v3018_v48 = vmul.f32 1.442695, %v2904_v38  ;;  %v3020_v18 = vmul.f32 1.442695, %v2905_v35  ;;  %v2802_v16 = vmax.f32 %v2800_v11, %v2801_v53  ;;  %v3412_v10 = vmul.f32 %v5528_v2, %v7200_v59 }
 0x2e8   : > { %v3267_v17 = vrot.slane %v3266_v54, 2  ;;  %v4027_v26 = vsel %vm707_vm0, %v3865_v24, 0.0  ;;  %v3413_v46 = vmul.f32 %v5528_v2, %v7203_v1  ;;  %v4023_v1 = vadd.f32 %v4022_v9, %v4021_v0 }
 0x2e9   : > { %5529 = vpow2.f32 %v3018_v48  ;;  %v4028_v19 = vadd.f32 %v4027_v26, %v4026_v51  ;;  %v2803_v47 = vrot.slane %v2802_v16, 4  ;;  %v5021_v35 = vunpack.c.l.bf16 %v7286_v14 }
 0x2ea   : > { %v3268_v12 = vadd.f32 %v3267_v17, %v3266_v54  ;;  %5531 = vpow2.f32 %v3020_v18  ;;  %4661 = vmatmul.msk.f32.gmra.mxu2 %vm2565_vm8, %v3412_v10  ;;  %v4015_v41 = vrot.slane %v4014_v40, 1 }
 0x2eb   : > { %v2804_v59 = vmax.f32 %v2802_v16, %v2803_v47  ;;  %v4029_v56 = vrot.slane %v4028_v19, 4  ;;  %v7270_v52 = vpop.f32.mrf.mxu1  ;;  %v1680_v47 = vadd.f32 %v5021_v35, %v7211_v44 }
 0x2ec   : > { %v3269_v58 = vrot.slane %v3268_v12, 1 }
 0x2ed   : > { %v2805_v13 = vrot.slane %v2804_v59, 2  ;;  %v3734_v5 = vpop.f32.mrf.mxu2  ;;  %v7272_v27 = vpop.f32.mrf.mxu3  ;;  %v4030_v43 = vadd.f32 %v4029_v56, %v4028_v19 }
 0x2ee   : > { %v3270_v15 = vadd.f32 %v3269_v58, %v3268_v12  ;;  %v3866_v22 = vmul.f32 %v3734_v5, %v1678_v62  ;;  %v2809_v45 = vsel %vm2565_vm8, %v7272_v27, -inf }
 0x2ef   : > { %v7274_v34 = vpop.eup %5529  ;;  %v2806_v28 = vmax.f32 %v2804_v59, %v2805_v13  ;;  %v4031_v33 = vrot.slane %v4030_v43, 2 }
 0x2f0   : > { %v7277_v36 = vpop.eup %5531  ;;  %v3271_v32 = vsel %vm2565_vm8, %v7274_v34, 0.0  ;;  %5533 = vrcp.f32 %v3270_v15  ;;  %v4035_v17 = vsel %vm707_vm0, %v3866_v22, 0.0  ;;  %v4016_v15 = vadd.f32 %v4015_v41, %v4014_v40  ;;  %v7323_v40 = vld [vmem:[%s6452_s14 + $0x88] sm:$0xff]  }
 0x2f1   : > { %v3272_v63 = vsel %vm2565_vm8, %v7277_v36, 0.0  ;;  %v2807_v23 = vrot.slane %v2806_v28, 1  ;;  %v4032_v57 = vadd.f32 %v4031_v33, %v4030_v43  ;;  %v5022_v43 = vunpack.c.h.bf16 %v7286_v14  ;;  %v7330_v14 = vld [vmem:[%s7618_s10] ss:$0 sm:$0xff] }
 0x2f2   : > { %v3273_v61 = vadd.f32 %v3272_v63, %v3271_v32  ;;  %4662 = vmatmul.msk.f32.gmra.mxu2 %vm2565_vm8, %v3413_v46  ;;  %v5025_v35 = vunpack.c.l.bf16 %v7323_v40 }
 0x2f3   : > { %v2808_v37 = vmax.f32 %v2806_v28, %v2807_v23  ;;  %v7289_v30 = vpop.f32.mrf.mxu1  ;;  %v4033_v59 = vrot.slane %v4032_v57, 1 }
 0x2f4   : > { %v3274_v4 = vrot.slane %v3273_v61, 4 }
 0x2f5   : > { %v2906_v49 = vsub.f32 %v7234_v55, %v2808_v37  ;;  %v2907_v38 = vsub.f32 %v7257_v42, %v2808_v37  ;;  %v3737_v25 = vpop.f32.mrf.mxu2  ;;  %v7294_v2 = vpop.f32.mrf.mxu3  ;;  %v5604_v42 = vld [vmem:[%s5804_s13 + $0xd0] sm:$0xff]   ;;  %v4034_v23 = vadd.f32 %v4033_v59, %v4032_v57 }
 0x2f6   : > { %v5534_v54 = vpop.eup %5533  ;;  %v3275_v11 = vadd.f32 %v3274_v4, %v3273_v61  ;;  %v3867_v24 = vmul.f32 %v3737_v25, %v1679_v31  ;;  %v2810_v53 = vsel %vm2565_vm8, %v7294_v2, -inf  ;;  %4502 = vmatmul.msk.bf16.gmra.mxu1 %vm707_vm0, %v5604_v42 }
 0x2f7   : > { %v3022_v48 = vmul.f32 1.442695, %v2906_v49  ;;  %v3024_v18 = vmul.f32 1.442695, %v2907_v38  ;;  %v2811_v16 = vmax.f32 %v2809_v45, %v2810_v53  ;;  %v3414_v55 = vmul.f32 %v5534_v54, %v7237_v8 }
 0x2f8   : > { %v3276_v10 = vrot.slane %v3275_v11, 2  ;;  %v4036_v51 = vsel %vm707_vm0, %v3867_v24, 0.0  ;;  %v4024_v8 = vrot.slane %v4023_v1, 1  ;;  %v3415_v63 = vmul.f32 %v5534_v54, %v7241_v6 }
 0x2f9   : > { %5535 = vpow2.f32 %v3022_v48  ;;  %v4037_v3 = vadd.f32 %v4036_v51, %v4035_v17  ;;  %v2812_v26 = vrot.slane %v2811_v16, 4  ;;  %v4238_v6 = vsel %vm1236_vm4, %v4016_v15, %v7191_v7  ;;  %v5605_v51 = vld [vmem:[%s5804_s13 + $0xd8] sm:$0xff]  }
 0x2fa   : > { %v3277_v19 = vadd.f32 %v3276_v10, %v3275_v11  ;;  %5537 = vpow2.f32 %v3024_v18  ;;  %4663 = vmatmul.msk.f32.gmra.mxu2 %vm2565_vm8, %v3414_v55  ;;  %v4025_v28 = vadd.f32 %v4024_v8, %v4023_v1  ;;  %v1681_v38 = vadd.f32 %v5022_v43, %v7232_v20 }
 0x2fb   : > { %v4038_v12 = vrot.slane %v4037_v3, 4  ;;  %v2813_v29 = vmax.f32 %v2811_v16, %v2812_v26  ;;  %v7307_v58 = vpop.f32.mrf.mxu1 }
 0x2fc   : > { %v3278_v60 = vrot.slane %v3277_v19, 1  ;;  %v4239_v1 = vsel %vm1239_vm5, %v4025_v28, %v4238_v6 }
 0x2fd   : > { %v4039_v56 = vadd.f32 %v4038_v12, %v4037_v3  ;;  %v2814_v0 = vrot.slane %v2813_v29, 2  ;;  %v3740_v13 = vpop.f32.mrf.mxu2  ;;  %v7309_v5 = vpop.f32.mrf.mxu3  ;;  %v4240_v54 = vsel %vm1242_vm6, %v4034_v23, %v4239_v1 }
 0x2fe   : > { %v3868_v21 = vmul.f32 %v3740_v13, %v1680_v47  ;;  %v3279_v44 = vadd.f32 %v3278_v60, %v3277_v19  ;;  %v2818_v55 = vsel %vm2565_vm8, %v7309_v5, -inf }
 0x2ff   : > { %v7312_v62 = vpop.eup %5535  ;;  %v4040_v39 = vrot.slane %v4039_v56, 2  ;;  %v2815_v32 = vmax.f32 %v2813_v29, %v2814_v0  ;;  %v1682_v29 = vadd.f32 %v5025_v35, %v7253_v50 }
 0x300   : > { %v7315_v46 = vpop.eup %5537  ;;  %v3280_v9 = vsel %vm2565_vm8, %v7312_v62, 0.0  ;;  %5539 = vrcp.f32 %v3279_v44  ;;  %v4044_v26 = vsel %vm707_vm0, %v3868_v21, 0.0 }
 0x301   : > { %v3281_v61 = vsel %vm2565_vm8, %v7315_v46, 0.0  ;;  %v4041_v37 = vadd.f32 %v4040_v39, %v4039_v56  ;;  %v2816_v31 = vrot.slane %v2815_v32, 1 }
 0x302   : > { %v3282_v4 = vadd.f32 %v3281_v61, %v3280_v9  ;;  %4664 = vmatmul.msk.f32.gmra.mxu2 %vm2565_vm8, %v3415_v63 }
 0x303   : > { %v2817_v33 = vmax.f32 %v2815_v32, %v2816_v31  ;;  %v4042_v22 = vrot.slane %v4041_v37, 1  ;;  %v7339_v11 = vpop.f32.mrf.mxu1  ;;  %v5026_v32 = vunpack.c.h.bf16 %v7323_v40 }
 0x304   : > { %v3283_v49 = vrot.slane %v3282_v4, 4  ;;  %v4281_v25 = vpop.f32.mrf.mxu0 }
 0x305   : > { %v2908_v45 = vsub.f32 %v7272_v27, %v2817_v33  ;;  %v2909_v24 = vsub.f32 %v7294_v2, %v2817_v33  ;;  %v3743_v7 = vpop.f32.mrf.mxu2  ;;  %v4282_v53 = vadd.f32 %v7330_v14, %v4281_v25  ;;  %v7344_v48 = vpop.f32.mrf.mxu3  ;;  %v4043_v18 = vadd.f32 %v4042_v22, %v4041_v37  ;;  %v7378_v37 = vld [vmem:[%s6452_s14 + $0x90] sm:$0xff]  }
 0x306   : > { %v5540_v16 = vpop.eup %5539  ;;  %v3284_v20 = vadd.f32 %v3283_v49, %v3282_v4  ;;  %v3869_v42 = vmul.f32 %v3743_v7, %v1681_v38  ;;  %v2819_v10 = vsel %vm2565_vm8, %v7344_v48, -inf  ;;  %4503 = vmatmul.msk.bf16.gmra.mxu1 %vm707_vm0, %v5605_v51  ;;  %v1683_v6 = vadd.f32 %v5026_v32, %v7270_v52 }
 0x307   : > { %v3026_v57 = vmul.f32 1.442695, %v2908_v45  ;;  %v3028_v27 = vmul.f32 1.442695, %v2909_v24  ;;  %4293 = vst [vmem:[%s7350_s29] sm:$0xff] %v4282_v53  ;;  %v2820_v2 = vmax.f32 %v2818_v55, %v2819_v10  ;;  %v4241_v17 = vsel %vm1245_vm7, %v4043_v18, %v4240_v54 }
 0x308   : > { %v3285_v3 = vrot.slane %v3284_v20, 2  ;;  %v4045_v41 = vsel %vm707_vm0, %v3869_v42, 0.0  ;;  %4680 = vmatmul.msk.f32.gmra.mxu0 %vm707_vm0, %v4241_v17  ;;  %v3416_v19 = vmul.f32 %v5540_v16, %v7274_v34  ;;  %v3417_v43 = vmul.f32 %v5540_v16, %v7277_v36 }
 0x309   : > { %5541 = vpow2.f32 %v3026_v57  ;;  %v4046_v47 = vadd.f32 %v4045_v41, %v4044_v26  ;;  %v2821_v8 = vrot.slane %v2820_v2, 4  ;;  %v5029_v1 = vunpack.c.l.bf16 %v7378_v37 }
 0x30a   : > { %v3286_v12 = vadd.f32 %v3285_v3, %v3284_v20  ;;  %5543 = vpow2.f32 %v3028_v27  ;;  %4665 = vmatmul.msk.f32.gmra.mxu2 %vm2565_vm8, %v3416_v19 }
 0x30b   : > { %v2822_v60 = vmax.f32 %v2820_v2, %v2821_v8  ;;  %v7362_v56 = vpop.f32.mrf.mxu1  ;;  %v4047_v63 = vrot.slane %v4046_v47, 4  ;;  %v1684_v27 = vadd.f32 %v5029_v1, %v7289_v30 }
 0x30c   : > { %v3287_v59 = vrot.slane %v3286_v12, 1 }
 0x30d   : > { %v2823_v0 = vrot.slane %v2822_v60, 2  ;;  %v3746_v13 = vpop.f32.mrf.mxu2  ;;  %v7364_v15 = vpop.f32.mrf.mxu3  ;;  %v4048_v40 = vadd.f32 %v4047_v63, %v4046_v47 }
 0x30e   : > { %v3870_v21 = vmul.f32 %v3746_v13, %v1682_v29  ;;  %v3288_v34 = vadd.f32 %v3287_v59, %v3286_v12  ;;  %v2827_v54 = vsel %vm2565_vm8, %v7364_v15, -inf  ;;  %v5030_v13 = vunpack.c.h.bf16 %v7378_v37 }
 0x30f   : > { %v7366_v44 = vpop.eup %5541  ;;  %v2824_v28 = vmax.f32 %v2822_v60, %v2823_v0  ;;  %v4049_v55 = vrot.slane %v4048_v40, 2 }
 0x310   : > { %v7368_v39 = vpop.eup %5543  ;;  %v3289_v50 = vsel %vm2565_vm8, %v7366_v44, 0.0  ;;  %5545 = vrcp.f32 %v3288_v34  ;;  %v4053_v16 = vsel %vm707_vm0, %v3870_v21, 0.0 }
 0x311   : > { %v3290_v9 = vsel %vm2565_vm8, %v7368_v39, 0.0  ;;  %v2825_v23 = vrot.slane %v2824_v28, 1  ;;  %v4050_v3 = vadd.f32 %v4049_v55, %v4048_v40 }
 0x312   : > { %v3291_v61 = vadd.f32 %v3290_v9, %v3289_v50  ;;  %4666 = vmatmul.msk.f32.gmra.mxu2 %vm2565_vm8, %v3417_v43  ;;  %v7414_v43 = vld [vmem:[%s6452_s14 + $0x98] sm:$0xff]  }
 0x313   : > { %v2826_v31 = vmax.f32 %v2824_v28, %v2825_v23  ;;  %v7381_v33 = vpop.f32.mrf.mxu1  ;;  %v4051_v34 = vrot.slane %v4050_v3, 1  ;;  %v5033_v37 = vunpack.c.l.bf16 %v7414_v43 }
 0x314   : > { %v3292_v4 = vrot.slane %v3291_v61, 4 }
 0x315   : > { %v2910_v36 = vsub.f32 %v7309_v5, %v2826_v31  ;;  %v2911_v22 = vsub.f32 %v7344_v48, %v2826_v31  ;;  %v3749_v49 = vpop.f32.mrf.mxu2  ;;  %v7386_v38 = vpop.f32.mrf.mxu3  ;;  %v5606_v48 = vld [vmem:[%s5804_s13 + $0xe0] sm:$0xff]   ;;  %v1685_v31 = vadd.f32 %v5030_v13, %v7307_v58  ;;  %v1686_v55 = vadd.f32 %v5033_v37, %v7339_v11 }
 0x316   : > { %v5546_v35 = vpop.eup %5545  ;;  %v3293_v25 = vadd.f32 %v3292_v4, %v3291_v61  ;;  %v3871_v45 = vmul.f32 %v3749_v49, %v1683_v6  ;;  %v2828_v52 = vsel %vm2565_vm8, %v7386_v38, -inf  ;;  %4504 = vmatmul.msk.bf16.gmra.mxu1 %vm707_vm0, %v5606_v48  ;;  %v4052_v4 = vadd.f32 %v4051_v34, %v4050_v3 }
 0x317   : > { %v3030_v24 = vmul.f32 1.442695, %v2910_v36  ;;  %v3032_v7 = vmul.f32 1.442695, %v2911_v22  ;;  %v2829_v53 = vmax.f32 %v2827_v54, %v2828_v52  ;;  %v3418_v5 = vmul.f32 %v5546_v35, %v7312_v62 }
 0x318   : > { %v3294_v18 = vrot.slane %v3293_v25, 2  ;;  %v4054_v20 = vsel %vm707_vm0, %v3871_v45, 0.0  ;;  %v3419_v21 = vmul.f32 %v5546_v35, %v7315_v46 }
 0x319   : > { %5547 = vpow2.f32 %v3030_v24  ;;  %v4055_v42 = vadd.f32 %v4054_v20, %v4053_v16  ;;  %v2830_v10 = vrot.slane %v2829_v53, 4 }
 0x31a   : > { %v3295_v57 = vadd.f32 %v3294_v18, %v3293_v25  ;;  %5549 = vpow2.f32 %v3032_v7  ;;  %4667 = vmatmul.msk.f32.gmra.mxu2 %vm2565_vm8, %v3418_v5 }
 0x31b   : > { %v4056_v2 = vrot.slane %v4055_v42, 4  ;;  %v2831_v62 = vmax.f32 %v2829_v53, %v2830_v10  ;;  %v7399_v51 = vpop.f32.mrf.mxu1  ;;  %v5607_v53 = vld [vmem:[%s5804_s13 + $0xe8] sm:$0xff]  }
 0x31c   : > { %v3296_v17 = vrot.slane %v3295_v57, 1 }
 0x31d   : > { %v4057_v26 = vadd.f32 %v4056_v2, %v4055_v42  ;;  %v2832_v41 = vrot.slane %v2831_v62, 2  ;;  %v3752_v19 = vpop.f32.mrf.mxu2  ;;  %v7401_v47 = vpop.f32.mrf.mxu3 }
 0x31e   : > { %v3872_v8 = vmul.f32 %v3752_v19, %v1684_v27  ;;  %v3297_v12 = vadd.f32 %v3296_v17, %v3295_v57  ;;  %v2836_v25 = vsel %vm2565_vm8, %v7401_v47, -inf }
 0x31f   : > { %v7403_v29 = vpop.eup %5547  ;;  %v4058_v60 = vrot.slane %v4057_v26, 2  ;;  %v2833_v30 = vmax.f32 %v2831_v62, %v2832_v41 }
 0x320   : > { %v7405_v59 = vpop.eup %5549  ;;  %v3298_v0 = vsel %vm2565_vm8, %v7403_v29, 0.0  ;;  %5551 = vrcp.f32 %v3297_v12 }
 0x321   : > { %v3299_v28 = vsel %vm2565_vm8, %v7405_v59, 0.0  ;;  %v4059_v50 = vadd.f32 %v4058_v60, %v4057_v26  ;;  %v2834_v32 = vrot.slane %v2833_v30, 1  ;;  %v5034_v60 = vunpack.c.h.bf16 %v7414_v43 }
 0x322   : > { %v3300_v9 = vadd.f32 %v3299_v28, %v3298_v0  ;;  %4668 = vmatmul.msk.f32.gmra.mxu2 %vm2565_vm8, %v3419_v21 }
 0x323   : > { %v4060_v63 = vrot.slane %v4059_v50, 1  ;;  %v2835_v23 = vmax.f32 %v2833_v30, %v2834_v32  ;;  %v7419_v46 = vpop.f32.mrf.mxu1 }
 0x324   : > { %v3301_v61 = vrot.slane %v3300_v9, 4 }
 0x325   : > { %v4061_v6 = vadd.f32 %v4060_v63, %v4059_v50  ;;  %v2912_v40 = vsub.f32 %v7364_v15, %v2835_v23  ;;  %v2913_v36 = vsub.f32 %v7386_v38, %v2835_v23  ;;  %v3755_v22 = vpop.f32.mrf.mxu2  ;;  %v2556_v1 = vpop.f32.mrf.mxu3  ;;  %v4062_v38 = vsel %vm707_vm0, %v3872_v8, 0.0 }
 0x326   : > { %v5552_v49 = vpop.eup %5551  ;;  %v3302_v35 = vadd.f32 %v3301_v61, %v3300_v9  ;;  %v3873_v54 = vmul.f32 %v3755_v22, %v1685_v31  ;;  %v2837_v58 = vsel %vm2565_vm8, %v2556_v1, -inf  ;;  %4505 = vmatmul.msk.bf16.gmra.mxu1 %vm707_vm0, %v5607_v53  ;;  %v1687_v9 = vadd.f32 %v5034_v60, %v7362_v56 }
 0x327   : > { %v7427_v45 = vsel %vm1227_vm1, %v4061_v6, %v4052_v4  ;;  %v3034_v52 = vmul.f32 1.442695, %v2912_v40  ;;  %v3036_v24 = vmul.f32 1.442695, %v2913_v36  ;;  %v2838_v7 = vmax.f32 %v2836_v25, %v2837_v58  ;;  %v5608_v25 = vld [vmem:[%s5804_s13 + $0xf0] sm:$0xff]  }
 0x328   : > { %v3303_v15 = vrot.slane %v3302_v35, 2  ;;  %v4063_v5 = vsel %vm707_vm0, %v3873_v54, 0.0  ;;  %v3420_v48 = vmul.f32 %v5552_v49, %v7366_v44  ;;  %v3421_v30 = vmul.f32 %v5552_v49, %v7368_v39 }
 0x329   : > { %5553 = vpow2.f32 %v3034_v52  ;;  %v4064_v18 = vadd.f32 %v4063_v5, %v4062_v38  ;;  %v2839_v16 = vrot.slane %v2838_v7, 4 }
 0x32a   : > { %v3304_v20 = vadd.f32 %v3303_v15, %v3302_v35  ;;  %5555 = vpow2.f32 %v3036_v24  ;;  %4669 = vmatmul.msk.f32.gmra.mxu2 %vm2565_vm8, %v3420_v48 }
 0x32b   : > { %v4065_v42 = vrot.slane %v4064_v18, 4  ;;  %v2840_v10 = vmax.f32 %v2838_v7, %v2839_v16  ;;  %v7436_v27 = vpop.f32.mrf.mxu1 }
 0x32c   : > { %v3305_v57 = vrot.slane %v3304_v20, 1 }
 0x32d   : > { %v4066_v2 = vadd.f32 %v4065_v42, %v4064_v18  ;;  %v2841_v62 = vrot.slane %v2840_v10, 2  ;;  %v3758_v17 = vpop.f32.mrf.mxu2  ;;  %v7438_v3 = vpop.f32.mrf.mxu3 }
 0x32e   : > { %v3874_v44 = vmul.f32 %v3758_v17, %v1686_v55  ;;  %v3306_v26 = vadd.f32 %v3305_v57, %v3304_v20  ;;  %v2845_v6 = vsel %vm2565_vm8, %v7438_v3, -inf }
 0x32f   : > { %v7440_v41 = vpop.eup %5553  ;;  %v4067_v19 = vrot.slane %v4066_v2, 2  ;;  %v2842_v8 = vmax.f32 %v2840_v10, %v2841_v62 }
 0x330   : > { %v7442_v12 = vpop.eup %5555  ;;  %v3307_v11 = vsel %vm2565_vm8, %v7440_v41, 0.0  ;;  %5557 = vrcp.f32 %v3306_v26 }
 0x331   : > { %v3308_v0 = vsel %vm2565_vm8, %v7442_v12, 0.0  ;;  %v4068_v13 = vadd.f32 %v4067_v19, %v4066_v2  ;;  %v2843_v21 = vrot.slane %v2842_v8, 1 }
 0x332   : > { %v3309_v34 = vadd.f32 %v3308_v0, %v3307_v11  ;;  %4670 = vmatmul.msk.f32.gmra.mxu2 %vm2565_vm8, %v3421_v30 }
 0x333   : > { %v4069_v28 = vrot.slane %v4068_v13, 1  ;;  %v2844_v50 = vmax.f32 %v2842_v8, %v2843_v21  ;;  %v7452_v63 = vpop.f32.mrf.mxu1 }
 0x334   : > { %v3310_v32 = vrot.slane %v3309_v34, 4 }
 0x335   : > { %v4070_v43 = vadd.f32 %v4069_v28, %v4068_v13  ;;  %v2914_v39 = vsub.f32 %v7401_v47, %v2844_v50  ;;  %v2915_v23 = vsub.f32 %v2556_v1, %v2844_v50  ;;  %v3761_v61 = vpop.f32.mrf.mxu2  ;;  %v2562_v31 = vpop.f32.mrf.mxu3  ;;  %v4071_v1 = vsel %vm707_vm0, %v3874_v44, 0.0 }
 0x336   : > { %v5558_v37 = vpop.eup %5557  ;;  %v3311_v4 = vadd.f32 %v3310_v32, %v3309_v34  ;;  %v3875_v40 = vmul.f32 %v3761_v61, %v1687_v9  ;;  %v2846_v36 = vsel %vm2565_vm8, %v2562_v31, -inf  ;;  %4506 = vmatmul.msk.bf16.gmra.mxu1 %vm707_vm0, %v5608_v25  ;;  %v5609_v32 = vld [vmem:[%s5804_s13 + $0xf8] sm:$0xff]   ;;  %s5625_s13 = sshra.s32 %s4313_s22, 4  ;;  %s5626_s13 = int_to_ptr.hbm [resolvable:$true] %s5625_s13 }
 0x337   : > { %v3038_v22 = vmul.f32 1.442695, %v2914_v39  ;;  %v3040_v49 = vmul.f32 1.442695, %v2915_v23  ;;  %v2847_v56 = vmax.f32 %v2845_v6, %v2846_v36  ;;  %v3422_v35 = vmul.f32 %v5558_v37, %v7403_v29  ;;  %p5632_p0 = scmp.lt.s32.totalorder %s5626_s13, %s7619_s11 }
 0x338   : > { %v3312_v47 = vrot.slane %v3311_v4, 2  ;;  %v4072_v54 = vsel %vm707_vm0, %v3875_v40, 0.0  ;;  %v4243_v58 = vsel %vm1230_vm2, %v4070_v43, %v7427_v45  ;;  %v3423_v57 = vmul.f32 %v5558_v37, %v7405_v59 }
 0x339   : > { %5559 = vpow2.f32 %v3038_v22  ;;  %v4073_v52 = vadd.f32 %v4072_v54, %v4071_v1  ;;  %v2848_v24 = vrot.slane %v2847_v56, 4  ;;  %v5293_v54 = vld [vmem:[%s6452_s14 + $0xa8] sm:$0xff]  }
 0x33a   : > { %v3313_v7 = vadd.f32 %v3312_v47, %v3311_v4  ;;  %5561 = vpow2.f32 %v3040_v49  ;;  %4671 = vmatmul.msk.f32.gmra.mxu2 %vm2565_vm8, %v3422_v35  ;;  %v5292_v47 = vld [vmem:[%s6452_s14 + $0xa0] sm:$0xff]  }
 0x33b   : > { %v4074_v53 = vrot.slane %v4073_v52, 4  ;;  %v2849_v29 = vmax.f32 %v2847_v56, %v2848_v24  ;;  %v7468_v18 = vpop.f32.mrf.mxu1  ;;  %v5038_v24 = vunpack.c.h.bf16 %v5292_v47 }
 0x33c   : > { %v3314_v15 = vrot.slane %v3313_v7, 1 }
 0x33d   : > { %v4075_v38 = vadd.f32 %v4074_v53, %v4073_v52  ;;  %v2850_v5 = vrot.slane %v2849_v29, 2  ;;  %v7466_v48 = vpop.f32.mrf.mxu2  ;;  %v5294_v52 = vld [vmem:[%s6452_s14 + $0xb0] sm:$0xff]  }
 0x33e   : > { %v3315_v16 = vadd.f32 %v3314_v15, %v3313_v7  ;;  %v5041_v7 = vunpack.c.l.bf16 %v5293_v54  ;;  %v5042_v15 = vunpack.c.h.bf16 %v5293_v54 }
 0x33f   : > { %v5560_v20 = vpop.eup %5559  ;;  %v4076_v55 = vrot.slane %v4075_v38, 2  ;;  %v2851_v45 = vmax.f32 %v2849_v29, %v2850_v5 }
 0x340   : > { %v7470_v42 = vpop.eup %5561  ;;  %v3316_v10 = vsel %vm2565_vm8, %v5560_v20, 0.0  ;;  %5563 = vrcp.f32 %v3315_v16 }
 0x341   : > { %v3317_v2 = vsel %vm2565_vm8, %v7470_v42, 0.0  ;;  %v4077_v62 = vadd.f32 %v4076_v55, %v4075_v38  ;;  %v2852_v17 = vrot.slane %v2851_v45, 1  ;;  %v5045_v38 = vunpack.c.l.bf16 %v5294_v52 }
 0x342   : > { %v3318_v44 = vadd.f32 %v3317_v2, %v3316_v10  ;;  %4672 = vmatmul.msk.f32.gmra.mxu2 %vm2565_vm8, %v3423_v57  ;;  %v1691_v10 = vadd.f32 %v5042_v15, %v7436_v27  ;;  %v5046_v57 = vunpack.c.h.bf16 %v5294_v52 }
 0x343   : > { %v4078_v26 = vrot.slane %v4077_v62, 1  ;;  %v2853_v19 = vmax.f32 %v2851_v45, %v2852_v17  ;;  %v7479_v50 = vpop.f32.mrf.mxu1  ;;  %v1690_v45 = vadd.f32 %v5041_v7, %v7419_v46  ;;  %v1692_v17 = vadd.f32 %v5045_v38, %v7452_v63 }
 0x344   : > { %v3319_v8 = vrot.slane %v3318_v44, 4 }
 0x345   : > { %v4079_v11 = vadd.f32 %v4078_v26, %v4077_v62  ;;  %v2916_v60 = vsub.f32 %v7438_v3, %v2853_v19  ;;  %v2917_v30 = vsub.f32 %v2562_v31, %v2853_v19  ;;  %v3767_v0 = vpop.f32.mrf.mxu2 }
 0x346   : > { %v5564_v13 = vpop.eup %5563  ;;  %v3320_v59 = vadd.f32 %v3319_v8, %v3318_v44  ;;  %4507 = vmatmul.msk.bf16.gmra.mxu1 %vm707_vm0, %v5609_v32 }
 0x347   : > { %v3042_v21 = vmul.f32 1.442695, %v2916_v60  ;;  %v3044_v34 = vmul.f32 1.442695, %v2917_v30  ;;  %v3424_v28 = vmul.f32 %v5564_v13, %v7440_v41  ;;  %v7484_v43 = vsel %vm1233_vm3, %v4079_v11, %v4243_v58 }
 0x348   : > { %v3321_v9 = vrot.slane %v3320_v59, 2  ;;  %v3425_v4 = vmul.f32 %v5564_v13, %v7442_v12  ;;  %v5037_v12 = vunpack.c.l.bf16 %v5292_v47 }
 0x349   : > { %5565 = vpow2.f32 %v3042_v21  ;;  %v5295_v21 = vld [vmem:[%s6452_s14 + $0xb8] sm:$0xff]  }
 0x34a   : > { %v3322_v39 = vadd.f32 %v3321_v9, %v3320_v59  ;;  %5567 = vpow2.f32 %v3044_v34  ;;  %4673 = vmatmul.msk.f32.gmra.mxu2 %vm2565_vm8, %v3424_v28  ;;  %v1688_v55 = vadd.f32 %v5037_v12, %v7381_v33  ;;  %v1693_v33 = vadd.f32 %v5046_v57, %v7468_v18 }
 0x34b   : > { %v7493_v40 = vpop.f32.mrf.mxu1  ;;  %v5049_v32 = vunpack.c.l.bf16 %v5295_v21 }
 0x34c   : > { %v3323_v3 = vrot.slane %v3322_v39, 1  ;;  %v3876_v26 = vmul.f32 %v7466_v48, %v1688_v55 }
 0x34d   : > { %v3770_v23 = vpop.f32.mrf.mxu2 }
 0x34e   : > { %v3324_v61 = vadd.f32 %v3323_v3, %v3322_v39  ;;  %v3878_v19 = vmul.f32 %v3770_v23, %v1690_v45  ;;  %v4080_v63 = vsel %vm707_vm0, %v3876_v26, 0.0 }
 0x34f   : > { %v5566_v31 = vpop.eup %5565 }
 0x350   : > { %v7487_v41 = vpop.eup %5567  ;;  %v3325_v37 = vsel %vm2565_vm8, %v5566_v31, 0.0  ;;  %5569 = vrcp.f32 %v3324_v61  ;;  %v4089_v13 = vsel %vm707_vm0, %v3878_v19, 0.0  ;;  %v5297_v19 = vld [vmem:[%s6452_s14 + $0xc8] sm:$0xff]  }
 0x351   : > { %v3326_v6 = vsel %vm2565_vm8, %v7487_v41, 0.0 }
 0x352   : > { %v3327_v36 = vadd.f32 %v3326_v6, %v3325_v37  ;;  %4674 = vmatmul.msk.f32.gmra.mxu2 %vm2565_vm8, %v3425_v4  ;;  %v5050_v37 = vunpack.c.h.bf16 %v5295_v21 }
 0x353   : > { %v7500_v53 = vpop.f32.mrf.mxu1 }
 0x354   : > { %v3328_v22 = vrot.slane %v3327_v36, 4 }
 0x355   : > { %v3773_v49 = vpop.f32.mrf.mxu2 }
 0x356   : > { %v5570_v56 = vpop.eup %5569  ;;  %v3329_v35 = vadd.f32 %v3328_v22, %v3327_v36  ;;  %v3879_v44 = vmul.f32 %v3773_v49, %v1691_v10  ;;  %v5296_v22 = vld [vmem:[%s6452_s14 + $0xc0] sm:$0xff]  }
 0x357   : > { %v3426_v25 = vmul.f32 %v5570_v56, %v5560_v20  ;;  %v1689_v20 = vadd.f32 %v5038_v24, %v7399_v51  ;;  %v3427_v2 = vmul.f32 %v5570_v56, %v7470_v42  ;;  %v1695_v56 = vadd.f32 %v5050_v37, %v7493_v40 }
 0x358   : > { %v3330_v1 = vrot.slane %v3329_v35, 2  ;;  %v4090_v42 = vsel %vm707_vm0, %v3879_v44, 0.0  ;;  %v5053_v54 = vunpack.c.l.bf16 %v5296_v22 }
 0x359   : > { %v3877_v62 = vmul.f32 %v3767_v0, %v1689_v20  ;;  %v4091_v59 = vadd.f32 %v4090_v42, %v4089_v13 }
 0x35a   : > { %v3331_v58 = vadd.f32 %v3330_v1, %v3329_v35  ;;  %4675 = vmatmul.msk.f32.gmra.mxu2 %vm2565_vm8, %v3426_v25  ;;  %v1696_v15 = vadd.f32 %v5053_v54, %v7500_v53 }
 0x35b   : > { %v4081_v51 = vsel %vm707_vm0, %v3877_v62, 0.0  ;;  %v1120_v8 = vpop.f32.mrf.mxu1  ;;  %v4092_v9 = vrot.slane %v4091_v59, 4 }
 0x35c   : > { %v3332_v29 = vrot.slane %v3331_v58, 1  ;;  %v4082_v0 = vadd.f32 %v4081_v51, %v4080_v63 }
 0x35d   : > { %v3776_v5 = vpop.f32.mrf.mxu2  ;;  %v4093_v6 = vadd.f32 %v4092_v9, %v4091_v59  ;;  %v5298_v9 = vld [vmem:[%s6452_s14 + $0xd0] sm:$0xff]  }
 0x35e   : > { %v3333_v16 = vadd.f32 %v3332_v29, %v3331_v58  ;;  %v3880_v46 = vmul.f32 %v3776_v5, %v1692_v17  ;;  %v4083_v28 = vrot.slane %v4082_v0, 4  ;;  %v5062_v54 = vunpack.c.h.bf16 %v5298_v9 }
 0x35f   : > { %v4094_v25 = vrot.slane %v4093_v6, 2 }
 0x360   : > { %5571 = vrcp.f32 %v3333_v16  ;;  %v4098_v18 = vsel %vm707_vm0, %v3880_v46, 0.0  ;;  %v4084_v61 = vadd.f32 %v4083_v28, %v4082_v0  ;;  %v5058_v28 = vunpack.c.h.bf16 %v5297_v19 }
 0x362   : > { %4676 = vmatmul.msk.f32.gmra.mxu2 %vm2565_vm8, %v3427_v2  ;;  %v4085_v49 = vrot.slane %v4084_v61, 2  ;;  %v5054_v2 = vunpack.c.h.bf16 %v5296_v22 }
 0x363   : > { %v1123_v23 = vpop.f32.mrf.mxu1 }
 0x364   : > { %v4086_v52 = vadd.f32 %v4085_v49, %v4084_v61  ;;  %v1697_v51 = vadd.f32 %v5054_v2, %v1120_v8  ;;  %v5061_v61 = vunpack.c.l.bf16 %v5298_v9 }
 0x365   : > { %v3779_v27 = vpop.f32.mrf.mxu2 }
 0x366   : > { %v5572_v11 = vpop.eup %5571  ;;  %v3881_v60 = vmul.f32 %v3779_v27, %v1693_v33  ;;  %v4087_v40 = vrot.slane %v4086_v52, 1 }
 0x367   : > { %v3428_v30 = vmul.f32 %v5572_v11, %v5566_v31  ;;  %v1694_v31 = vadd.f32 %v5049_v32, %v7479_v50  ;;  %v3429_v4 = vmul.f32 %v5572_v11, %v7487_v41  ;;  %v4095_v41 = vadd.f32 %v4094_v25, %v4093_v6 }
 0x368   : > { %v4099_v48 = vsel %vm707_vm0, %v3881_v60, 0.0  ;;  %v4088_v57 = vadd.f32 %v4087_v40, %v4086_v52  ;;  %v5057_v60 = vunpack.c.l.bf16 %v5297_v19 }
 0x369   : > { %v4100_v34 = vadd.f32 %v4099_v48, %v4098_v18  ;;  %v4096_v5 = vrot.slane %v4095_v41, 1 }
 0x36a   : > { %4677 = vmatmul.msk.f32.gmra.mxu2 %vm2565_vm8, %v3428_v30  ;;  %v4245_v53 = vsel %vm1236_vm4, %v4088_v57, %v7484_v43  ;;  %v1698_v59 = vadd.f32 %v5057_v60, %v1123_v23 }
 0x36b   : > { %v4101_v3 = vrot.slane %v4100_v34, 4  ;;  %v1125_v7 = vpop.f32.mrf.mxu1  ;;  %v4097_v62 = vadd.f32 %v4096_v5, %v4095_v41  ;;  %v5299_v41 = vld [vmem:[%s6452_s14 + $0xd8] sm:$0xff]  }
 0x36d   : > { %v3782_v39 = vpop.f32.mrf.mxu2  ;;  %v4102_v36 = vadd.f32 %v4101_v3, %v4100_v34  ;;  %v4246_v42 = vsel %vm1239_vm5, %v4097_v62, %v4245_v53 }
 0x36e   : > { %v3882_v35 = vmul.f32 %v3782_v39, %v1694_v31 }
 0x36f   : > { %v4103_v1 = vrot.slane %v4102_v36, 2 }
 0x370   : > { %v4107_v50 = vsel %vm707_vm0, %v3882_v35, 0.0 }
 0x371   : > { %v4104_v29 = vadd.f32 %v4103_v1, %v4102_v36 }
 0x372   : > { %4678 = vmatmul.msk.f32.gmra.mxu2 %vm2565_vm8, %v3429_v4 }
 0x373   : > { %v4105_v20 = vrot.slane %v4104_v29, 1  ;;  %v1128_v33 = vpop.f32.mrf.mxu1 }
 0x374   : > { %v1700_v23 = vadd.f32 %v5061_v61, %v1128_v33  ;;  %v5301_v61 = vld [vmem:[%s6452_s14 + $0xe8] sm:$0xff]  }
 0x375   : > { %v3785_v47 = vpop.f32.mrf.mxu2  ;;  %v4106_v44 = vadd.f32 %v4105_v20, %v4104_v29 }
 0x376   : > { %v3883_v58 = vmul.f32 %v3785_v47, %v1695_v56 }
 0x377   : > { %v4247_v0 = vsel %vm1242_vm6, %v4106_v44, %v4246_v42 }
 0x378   : > { %v4108_v12 = vsel %vm707_vm0, %v3883_v58, 0.0 }
 0x379   : > { %v4109_v24 = vadd.f32 %v4108_v12, %v4107_v50 }
 0x37b   : > { %v4110_v38 = vrot.slane %v4109_v24, 4  ;;  %v1130_v21 = vpop.f32.mrf.mxu1 }
 0x37d   : > { %v4111_v16 = vadd.f32 %v4110_v38, %v4109_v24  ;;  %v3788_v55 = vpop.f32.mrf.mxu2  ;;  %v1701_v24 = vadd.f32 %v5062_v54, %v1130_v21  ;;  %v5065_v38 = vunpack.c.l.bf16 %v5299_v41 }
 0x37e   : > { %v3884_v45 = vmul.f32 %v3788_v55, %v1696_v15 }
 0x37f   : > { %v4112_v10 = vrot.slane %v4111_v16, 2 }
 0x380   : > { %v4116_v48 = vsel %vm707_vm0, %v3884_v45, 0.0 }
 0x381   : > { %v4113_v17 = vadd.f32 %v4112_v10, %v4111_v16 }
 0x383   : > { %v4114_v26 = vrot.slane %v4113_v17, 1  ;;  %v1133_v37 = vpop.f32.mrf.mxu1 }
 0x384   : > { %v1702_v45 = vadd.f32 %v5065_v38, %v1133_v37 }
 0x385   : > { %v3791_v46 = vpop.f32.mrf.mxu2  ;;  %v4284_v27 = vpop.f32.mrf.mxu0  ;;  %v4115_v11 = vadd.f32 %v4114_v26, %v4113_v17  ;;  %v5066_v26 = vunpack.c.h.bf16 %v5299_v41 }
 0x386   : > { %v3885_v63 = vmul.f32 %v3791_v46, %v1697_v51  ;;  %v4285_v30 = vadd.f32 %v7330_v14, %v4284_v27  ;;  %v1699_v14 = vadd.f32 %v5058_v28, %v1125_v7 }
 0x387   : > { %v4248_v13 = vsel %vm1245_vm7, %v4115_v11, %v4247_v0 }
 0x388   : > { %v4117_v8 = vsel %vm707_vm0, %v3885_v63, 0.0  ;;  %4294 = vst [vmem:[%s7350_s29 + $0x8] sm:$0xff] %v4285_v30  ;;  %4681 = vmatmul.msk.f32.gmra.mxu0 %vm707_vm0, %v4248_v13 }
 0x389   : > { %v4118_v43 = vadd.f32 %v4117_v8, %v4116_v48 }
 0x38b   : > { %v4119_v32 = vrot.slane %v4118_v43, 4  ;;  %v1135_v50 = vpop.f32.mrf.mxu1 }
 0x38c   : > { %v1703_v51 = vadd.f32 %v5066_v26, %v1135_v50 }
 0x38d   : > { %v3794_v18 = vpop.f32.mrf.mxu2  ;;  %v4120_v39 = vadd.f32 %v4119_v32, %v4118_v43 }
 0x38e   : > { %v3886_v34 = vmul.f32 %v3794_v18, %v1698_v59 }
 0x38f   : > { %v4121_v36 = vrot.slane %v4120_v39, 2 }
 0x390   : > { %v4125_v4 = vsel %vm707_vm0, %v3886_v34, 0.0 }
 0x391   : > { %v4122_v56 = vadd.f32 %v4121_v36, %v4120_v39  ;;  %v5074_v36 = vunpack.c.h.bf16 %v5301_v61 }
 0x393   : > { %v4123_v58 = vrot.slane %v4122_v56, 1  ;;  %v1138_v57 = vpop.f32.mrf.mxu1 }
 0x395   : > { %v3797_v3 = vpop.f32.mrf.mxu2  ;;  %v4124_v7 = vadd.f32 %v4123_v58, %v4122_v56 }
 0x396   : > { %v3887_v31 = vmul.f32 %v3797_v3, %v1699_v14  ;;  %v5300_v3 = vld [vmem:[%s6452_s14 + $0xe0] sm:$0xff]  }
 0x397   : > { %v5069_v37 = vunpack.c.l.bf16 %v5300_v3 }
 0x398   : > { %v4126_v6 = vsel %vm707_vm0, %v3887_v31, 0.0  ;;  %v5302_v31 = vld [vmem:[%s6452_s14 + $0xf0] sm:$0xff]  }
 0x399   : > { %v4127_v22 = vadd.f32 %v4126_v6, %v4125_v4  ;;  %v5070_v4 = vunpack.c.h.bf16 %v5300_v3  ;;  %v5073_v6 = vunpack.c.l.bf16 %v5301_v61  ;;  %v1704_v56 = vadd.f32 %v5069_v37, %v1138_v57  ;;  %v5303_v57 = vld [vmem:[%s6452_s14 + $0xf8] sm:$0xff]   ;;  %s5627_s14 = scalar_lea.hbm %s5626_s13, 32 }
 0x39a   : > { %p5628_p11 = scmp.ne.s32.totalorder %s5626_s13, %s5627_s14  ;;  %p5633_p1 = scmp.lt.s32.totalorder %s5631_s12, %s5627_s14 }
 0x39b   : > { %v4128_v49 = vrot.slane %v4127_v22, 4  ;;  %v1140_v27 = vpop.f32.mrf.mxu1 }
 0x39c   : > { %p5629_p12 = pnand %p5628_p11, %p5772_p5  ;;  %p5634_p2 = por %p5633_p1, %p5632_p0 }
 0x39d   : > { %v4129_v35 = vadd.f32 %v4128_v49, %v4127_v22  ;;  %v3800_v25 = vpop.f32.mrf.mxu2  ;;  %v5077_v22 = vunpack.c.l.bf16 %v5302_v31 }
 0x39e   : > { %v3888_v47 = vmul.f32 %v3800_v25, %v1700_v23  ;;  %p5630_p13 = pneg %p5629_p12 }
 0x39f   : > { %v4130_v1 = vrot.slane %v4129_v35, 2 }
 0x3a0   : > { %v4134_v16 = vsel %vm707_vm0, %v3888_v47, 0.0  ;;  %p5635_p3 = pnand %p5634_p2, %p5630_p13 }
 0x3a1   : > { %v4131_v52 = vadd.f32 %v4130_v1, %v4129_v35  ;;  %v1705_v35 = vadd.f32 %v5070_v4, %v1140_v27  ;;  %v5078_v1 = vunpack.c.h.bf16 %v5302_v31 }
 0x3a3   : > { %v4132_v12 = vrot.slane %v4131_v52, 1  ;;  %v1143_v43 = vpop.f32.mrf.mxu1 }
 0x3a4   : > { %v1706_v25 = vadd.f32 %v5073_v6, %v1143_v43 }
 0x3a5   : > { %v4133_v29 = vadd.f32 %v4132_v12, %v4131_v52  ;;  %v3803_v15 = vpop.f32.mrf.mxu2 }
 0x3a6   : > { %v3889_v40 = vmul.f32 %v3803_v15, %v1701_v24 }
 0x3a7   : > { %v4249_v5 = vsel %vm1227_vm1, %v4133_v29, %v4124_v7 }
 0x3a8   : > { %v4135_v55 = vsel %vm707_vm0, %v3889_v40, 0.0 }
 0x3a9   : > { %v4136_v20 = vadd.f32 %v4135_v55, %v4134_v16 }
 0x3ab   : > { %v4137_v10 = vrot.slane %v4136_v20, 4  ;;  %v1145_v32 = vpop.f32.mrf.mxu1 }
 0x3ac   : > { %v1707_v47 = vadd.f32 %v5074_v36, %v1145_v32 }
 0x3ad   : > { %v4138_v2 = vadd.f32 %v4137_v10, %v4136_v20  ;;  %v3806_v62 = vpop.f32.mrf.mxu2 }
 0x3ae   : > { %v3890_v17 = vmul.f32 %v3806_v62, %v1702_v45 }
 0x3af   : > { %v4139_v44 = vrot.slane %v4138_v2, 2 }
 0x3b0   : > { %v4143_v60 = vsel %vm707_vm0, %v3890_v17, 0.0  ;;  %v5081_v17 = vunpack.c.l.bf16 %v5303_v57 }
 0x3b1   : > { %v4140_v19 = vadd.f32 %v4139_v44, %v4138_v2 }
 0x3b3   : > { %v4141_v33 = vrot.slane %v4140_v19, 1  ;;  %v1148_v14 = vpop.f32.mrf.mxu1 }
 0x3b4   : > { %v1708_v58 = vadd.f32 %v5077_v22, %v1148_v14 }
 0x3b5   : > { %v4142_v53 = vadd.f32 %v4141_v33, %v4140_v19  ;;  %v3809_v46 = vpop.f32.mrf.mxu2 }
 0x3b6   : > { %v3891_v11 = vmul.f32 %v3809_v46, %v1703_v51 }
 0x3b7   : > { %v4250_v42 = vsel %vm1230_vm2, %v4142_v53, %v4249_v5  ;;  %v5082_v53 = vunpack.c.h.bf16 %v5303_v57 }
 0x3b8   : > { %v4144_v63 = vsel %vm707_vm0, %v3891_v11, 0.0 }
 0x3b9   : > { %v4145_v30 = vadd.f32 %v4144_v63, %v4143_v60 }
 0x3bb   : > { %v4146_v0 = vrot.slane %v4145_v30, 4  ;;  %v1150_v23 = vpop.f32.mrf.mxu1 }
 0x3bc   : > { %v1709_v41 = vadd.f32 %v5078_v1, %v1150_v23 }
 0x3bd   : > { %v4147_v13 = vadd.f32 %v4146_v0, %v4145_v30  ;;  %v3812_v48 = vpop.f32.mrf.mxu2 }
 0x3be   : > { %v3892_v50 = vmul.f32 %v3812_v48, %v1704_v56 }
 0x3bf   : > { %v4148_v8 = vrot.slane %v4147_v13, 2 }
 0x3c0   : > { %v4152_v40 = vsel %vm707_vm0, %v3892_v50, 0.0 }
 0x3c1   : > { %v4149_v59 = vadd.f32 %v4148_v8, %v4147_v13 }
 0x3c3   : > { %v4150_v18 = vrot.slane %v4149_v59, 1  ;;  %v1153_v5 = vpop.f32.mrf.mxu1 }
 0x3c4   : > { %v1710_v51 = vadd.f32 %v5081_v17, %v1153_v5 }
 0x3c5   : > { %v4151_v21 = vadd.f32 %v4150_v18, %v4149_v59  ;;  %v3815_v34 = vpop.f32.mrf.mxu2 }
 0x3c6   : > { %v3893_v54 = vmul.f32 %v3815_v34, %v1705_v35  ;;  %v5610_v35 = vld [vmem:[%s7618_s10] ss:$0 sm:$0xff] }
 0x3c7   : > { %v7549_v28 = vsel %vm1233_vm3, %v4151_v21, %v4250_v42 }
 0x3c8   : > { %v4153_v24 = vsel %vm707_vm0, %v3893_v54, 0.0 }
 0x3c9   : > { %v4154_v16 = vadd.f32 %v4153_v24, %v4152_v40 }
 0x3cb   : > { %v4155_v62 = vrot.slane %v4154_v16, 4  ;;  %v1155_v27 = vpop.f32.mrf.mxu1 }
 0x3cc   : > { %v1711_v60 = vadd.f32 %v5082_v53, %v1155_v27 }
 0x3cd   : > { %v3818_v9 = vpop.f32.mrf.mxu2  ;;  %v4156_v33 = vadd.f32 %v4155_v62, %v4154_v16 }
 0x3ce   : > { %v3894_v12 = vmul.f32 %v3818_v9, %v1706_v25 }
 0x3cf   : > { %v4157_v42 = vrot.slane %v4156_v33, 2 }
 0x3d0   : > { %v4161_v55 = vsel %vm707_vm0, %v3894_v12, 0.0 }
 0x3d1   : > { %v4158_v8 = vadd.f32 %v4157_v42, %v4156_v33 }
 0x3d3   : > { %v4159_v9 = vrot.slane %v4158_v8, 1 }
 0x3d5   : > { %v3821_v39 = vpop.f32.mrf.mxu2  ;;  %v4160_v31 = vadd.f32 %v4159_v9, %v4158_v8 }
 0x3d6   : > { %v3895_v52 = vmul.f32 %v3821_v39, %v1707_v47 }
 0x3d7   : > { %v4252_v22 = vsel %vm1236_vm4, %v4160_v31, %v7549_v28 }
 0x3d8   : > { %v4162_v15 = vsel %vm707_vm0, %v3895_v52, 0.0 }
 0x3d9   : > { %v4163_v45 = vadd.f32 %v4162_v15, %v4161_v55 }
 0x3db   : > { %v4164_v44 = vrot.slane %v4163_v45, 4 }
 0x3dd   : > { %v3824_v49 = vpop.f32.mrf.mxu2  ;;  %v4165_v46 = vadd.f32 %v4164_v44, %v4163_v45 }
 0x3de   : > { %v3896_v7 = vmul.f32 %v3824_v49, %v1708_v58 }
 0x3df   : > { %v4166_v30 = vrot.slane %v4165_v46, 2 }
 0x3e0   : > { %v4170_v10 = vsel %vm707_vm0, %v3896_v7, 0.0 }
 0x3e1   : > { %v4167_v18 = vadd.f32 %v4166_v30, %v4165_v46 }
 0x3e3   : > { %v4168_v14 = vrot.slane %v4167_v18, 1 }
 0x3e5   : > { %v3827_v29 = vpop.f32.mrf.mxu2  ;;  %v4169_v37 = vadd.f32 %v4168_v14, %v4167_v18 }
 0x3e6   : > { %v3897_v38 = vmul.f32 %v3827_v29, %v1709_v41 }
 0x3e7   : > { %v4253_v56 = vsel %vm1239_vm5, %v4169_v37, %v4252_v22 }
 0x3e8   : > { %v4171_v20 = vsel %vm707_vm0, %v3897_v38, 0.0 }
 0x3e9   : > { %v4172_v2 = vadd.f32 %v4171_v20, %v4170_v10 }
 0x3eb   : > { %v4173_v19 = vrot.slane %v4172_v2, 4 }
 0x3ed   : > { %v3830_v26 = vpop.f32.mrf.mxu2  ;;  %v4174_v11 = vadd.f32 %v4173_v19, %v4172_v2 }
 0x3ee   : > { %v3898_v63 = vmul.f32 %v3830_v26, %v1710_v51 }
 0x3ef   : > { %v4175_v13 = vrot.slane %v4174_v11, 2 }
 0x3f0   : > { %v4179_v43 = vsel %vm707_vm0, %v3898_v63, 0.0 }
 0x3f1   : > { %v4176_v34 = vadd.f32 %v4175_v13, %v4174_v11 }
 0x3f3   : > { %v4177_v3 = vrot.slane %v4176_v34, 1 }
 0x3f5   : > { %v3833_v0 = vpop.f32.mrf.mxu2  ;;  %v4178_v6 = vadd.f32 %v4177_v3, %v4176_v34 }
 0x3f6   : > { %v3899_v48 = vmul.f32 %v3833_v0, %v1711_v60 }
 0x3f7   : > { %v4254_v47 = vsel %vm1242_vm6, %v4178_v6, %v4253_v56 }
 0x3f8   : > { %v4180_v59 = vsel %vm707_vm0, %v3899_v48, 0.0 }
 0x3f9   : > { %v4181_v21 = vadd.f32 %v4180_v59, %v4179_v43 }
 0x3fb   : > { %v4182_v32 = vrot.slane %v4181_v21, 4 }
 0x3fd   : > { %v4183_v39 = vadd.f32 %v4182_v32, %v4181_v21 }
 0x3ff   : > { %v4184_v61 = vrot.slane %v4183_v39, 2 }
 0x401   : > { %v4185_v4 = vadd.f32 %v4184_v61, %v4183_v39 }
 0x403   : > { %v4186_v36 = vrot.slane %v4185_v4, 1 }
 0x405   : > { %v4287_v23 = vpop.f32.mrf.mxu0  ;;  %v4187_v49 = vadd.f32 %v4186_v36, %v4185_v4 }
 0x406   : > { %v4288_v25 = vadd.f32 %v5610_v35, %v4287_v23 }
 0x407   : > { %v4255_v1 = vsel %vm1245_vm7, %v4187_v49, %v4254_v47 }
 0x408   : > { %4295 = vst [vmem:[%s7350_s29 + $0x10] sm:$0xff] %v4288_v25  ;;  %4682 = vmatmul.msk.f32.gmra.mxu0 %vm707_vm0, %v4255_v1 }
 0x485   : > { %v4290_v28 = vpop.f32.mrf.mxu0 }
 0x486   : > { %v4291_v54 = vadd.f32 %v5610_v35, %v4290_v28 }
 0x488   : > { %4296 = vst [vmem:[%s7350_s29 + $0x18] sm:$0xff] %v4291_v54 }
 0x489   : > { %5638 = shalt.err (!%p5635_p3)
}
 0x48a   : > { %s5675_s16 = smov 128   ;;  %s5676_s29 = smov 8  }
 0x48b   : > { %5339 = dma.vmem_to_hbm [thread:$0]  (%p5772_p5), %s4311_s25, 512, %s4313_s22, %s4298_s24, %s5675_s16, %s5675_s16, %s5676_s29  }
 0x48c PF: > { %p5345_p4 = scmp.ge.s32.totalorder %s5673_s20, 2  ;;  %s4327_s0 = sand.u32 1, %s5661_s17  }
 0x48d   : > { %s4328_s1 = scalar_lea.sflag [#allocation3], %s4327_s0 }
 0x48e   : > { %p5342_p7 = pnand %p5345_p4, %p5776_p6 }
 0x490   : > { %p5343_p8 = pneg %p5342_p7 }
 0x492   : > { %5656 = dma.done.wait (%p5343_p8), %s4328_s1, 512  }
 0x493   : > { %5658 = vsyncadd (%p5343_p8), %s4328_s1, 4294966784  ;;  %p21_p9 = scmp.ge.s32.totalorder %s5760_s23, 4   ;;  %s7626_s17 = smov %s5665_s18 }
 0x494   : > { %s7627_s18 = smov %s5669_s19  ;;  %s7628_s19 = smov %s5770_s26 }
 0x495   : > { %s7629_s20 = smov %s5760_s23  ;;  %23 = sbr.rel (!%p21_p9) target bundleno = 6 (0x6), region = 108 }
 0x49a   :  { %4334 = vsyncpa [#allocation3], 1 }
 0x49b   :  { %4336 = vsyncpa [#allocation3 + $0x1], 1 }

</bundles_post_ra>
